<compile_context>
chip_gen: v5e
topology: v5e:2x2
jax: 0.10.0
libtpu: 0.0.40
codegen_flags: <defaults>
</compile_context>

<pallas_src>
import jax
import jax.numpy as jnp
from jax.experimental import pallas as pl
from jax.experimental.pallas import tpu as pltpu


LANE = 128
_TN = 128          # points per tile; multiple of 128 -> lane-dense transposed store


def _round_up(x, m):
    return ((x + m - 1) // m) * m


def _make_mlp_pool_kernel(num_layers, tn, nsample, c_out_pad):
    def kernel(*refs):
        x_ref = refs[0]
        out_ref = refs[-1]
        p = refs[1:-1]
        h = x_ref[0]                                   # (TN*S, Cin_pad) bf16
        for l in range(num_layers):
            w = p[2 * l][...]                          # (C_l, C_{l+1}) bf16, BN scale folded
            b = p[2 * l + 1][...]                      # (1, C_{l+1})   f32 folded BN shift
            acc = jnp.dot(h, w, preferred_element_type=jnp.float32)   # MXU, f32 acc
            acc = jnp.maximum(acc + b, 0.0)            # BN shift + ReLU in f32
            h = acc.astype(jnp.bfloat16) if l < num_layers - 1 else acc
        h = h.reshape(tn, nsample, c_out_pad)
        hmax = jnp.max(h, axis=1)                      # (TN, Cout_pad) neighbour max-pool
        out_ref[0] = hmax.T                            # (Cout_pad, TN) lane-dense store
    return kernel


def mlp_maxpool(x, weights, shifts, n_pad, nsample):
    """x: (B, Npad*S, Cin_pad) bf16 -> (B, Cout_pad, Npad) f32 (transposed, lane-dense)."""
    B, NS, cin_pad = x.shape
    num_layers = len(weights)
    c_out_pad = weights[-1].shape[1]
    tn = _TN
    assert n_pad % tn == 0 and NS == n_pad * nsample

    kernel = _make_mlp_pool_kernel(num_layers, tn, nsample, c_out_pad)

    in_specs = [pl.BlockSpec((1, tn * nsample, cin_pad), lambda b, n: (b, n, 0))]
    args = [x]
    for w, sh in zip(weights, shifts):
        in_specs.append(pl.BlockSpec(w.shape, lambda b, n: (0, 0)))
        in_specs.append(pl.BlockSpec(sh.shape, lambda b, n: (0, 0)))
        args += [w, sh]

    out_spec = pl.BlockSpec((1, c_out_pad, tn), lambda b, n: (b, 0, n))

    return pl.pallas_call(
        kernel,
        out_shape=jax.ShapeDtypeStruct((B, c_out_pad, n_pad), jnp.float32),
        grid=(B, n_pad // tn),
        in_specs=in_specs,
        out_specs=out_spec,
        compiler_params=pltpu.CompilerParams(
            # both axes independent; lets v7x megacore shard the point tiles
            dimension_semantics=("parallel", "parallel")),
    )(*args)


def init_params(key, in_channel, mlp):
    """Deterministic synthetic Conv2d(1x1, bias=False) + BatchNorm2d (eval) params.

    Returns:
      padded params  : per-layer (weight_bf16 (Cin_pad, Cout_pad) with BN scale
                       folded in, shift_f32 (1, Cout_pad)), zero-padded to 128.
      reference params: unpadded f32 (folded weight, shift) for the pure-JAX ref.
    """
    eps = 1e-5
    last = in_channel * 2 + 3              # corr_func == 'concat'
    weights_pad, shifts_pad = [], []
    weights_ref, shifts_ref = [], []
    for out_ch in mlp:
        key, k = jax.random.split(key)
        # torch Conv2d weight is (out, in, 1, 1); we store its transpose (in, out).
        w = jax.random.normal(k, (last, out_ch), jnp.float32) / jnp.sqrt(float(last))
        gamma = 1.0 + 0.1 * jnp.arange(out_ch, dtype=jnp.float32)
        beta = 0.05 * jnp.arange(out_ch, dtype=jnp.float32)
        rmean = 0.01 * jnp.arange(out_ch, dtype=jnp.float32)
        rvar = 1.0 + 0.02 * jnp.arange(out_ch, dtype=jnp.float32)
        s = gamma / jnp.sqrt(rvar + eps)
        b = beta - rmean * s
        w_folded = w * s[None, :]          # fold BN scale into the conv weight

        in_pad = _round_up(last, LANE)
        out_pad = _round_up(out_ch, LANE)
        w_p = jnp.zeros((in_pad, out_pad), jnp.float32).at[:last, :out_ch].set(w_folded)
        b_p = jnp.zeros((1, out_pad), jnp.float32).at[0, :out_ch].set(b)

        weights_pad.append(w_p.astype(jnp.bfloat16))
        shifts_pad.append(b_p)
        weights_ref.append(w_folded)
        shifts_ref.append(b.reshape(1, out_ch))
        last = out_ch
    return (weights_pad, shifts_pad), (weights_ref, shifts_ref)


def group_corr_features(pos1, pos2, feature1, feature2, radius, nsample):
    """KNN (radius fallback) + gather + 'concat' correlation (plain JAX glue).

    pos1/pos2: (B,3,N), feature1/feature2: (B,C,N)
    Returns x: (B, N, S_pad, 3+2C) f32, S_pad = round_up(nsample, 8).
    """
    B, _, N = pos1.shape
    pos1_t = jnp.transpose(pos1, (0, 2, 1))
    pos2_t = jnp.transpose(pos2, (0, 2, 1))
    feat1_t = jnp.transpose(feature1, (0, 2, 1))
    feat2_t = jnp.transpose(feature2, (0, 2, 1))

    # squared distances in matmul form: ||p1||^2 + ||p2||^2 - 2 p1.p2 (MXU-friendly)
    p1sq = jnp.sum(pos1_t * pos1_t, axis=-1, keepdims=True)        # (B,N,1)
    p2sq = jnp.sum(pos2_t * pos2_t, axis=-1, keepdims=True)        # (B,N,1)
    d2 = p1sq + jnp.swapaxes(p2sq, 1, 2) - 2.0 * jnp.einsum(
        'bnd,bmd->bnm', pos1_t, pos2_t)
    d2 = jnp.maximum(d2, 0.0)

    neg_d2, idx = jax.lax.top_k(-d2, nsample)                      # ascending distance
    dist = jnp.sqrt(jnp.maximum(-neg_d2, 0.0))
    idx = jnp.where(dist > radius, idx[:, :, :1], idx)             # knn radius fallback

    # pad nsample to a multiple of 8 with duplicates of the nearest neighbour
    # (duplicates do not change the max-pool result)
    s_pad = _round_up(nsample, 8)
    if s_pad != nsample:
        idx = jnp.concatenate(
            [idx, jnp.broadcast_to(idx[:, :, :1], (B, N, s_pad - nsample))], axis=-1)

    gather = jax.vmap(lambda pts, ix: pts[ix])                     # (M,C),(N,S)->(N,S,C)
    pos2_grouped = gather(pos2_t, idx)                             # (B,N,S,3)
    feat2_grouped = gather(feat2_t, idx)                           # (B,N,S,C)

    pos_diff = pos2_grouped - pos1_t[:, :, None, :]
    feat1_rep = jnp.broadcast_to(feat1_t[:, :, None, :], feat2_grouped.shape)
    # channel order matches torch.cat([pos_diff, feat2_grouped, feature1], dim=1)
    x = jnp.concatenate([pos_diff, feat2_grouped, feat1_rep], axis=-1)
    return x, s_pad


def flow_embedding_forward(pos1, pos2, feature1, feature2, params, radius, nsample):
    """pos1/pos2: (B,3,N), feature1/feature2: (B,C,N) -> (pos1, (B, mlp[-1], N))."""
    weights_pad, shifts_pad, out_channels = params
    B, _, N = pos1.shape

    x, s_pad = group_corr_features(pos1, pos2, feature1, feature2, radius, nsample)
    cin = x.shape[-1]
    cin_pad = weights_pad[0].shape[0]
    n_pad = _round_up(N, _TN)

    # zero-pad point axis + channels, cast to bf16 (native MXU input), flatten (N,S)
    x = jnp.pad(x, ((0, 0), (0, n_pad - N), (0, 0), (0, cin_pad - cin)))
    x = x.astype(jnp.bfloat16).reshape(B, n_pad * s_pad, cin_pad)

    out = mlp_maxpool(x, weights_pad, shifts_pad, n_pad, s_pad)    # (B, Cout_pad, Npad)
    return pos1, out[:, :out_channels, :N]                         # (B, mlp[-1], N)


def flow_embedding_reference(pos1, pos2, feature1, feature2, ref_params, radius, nsample):
    """Pure-JAX f32 reference of the same forward (same grouping path)."""
    weights, shifts = ref_params
    x, _ = group_corr_features(pos1, pos2, feature1, feature2, radius, nsample)
    h = x
    for w, b in zip(weights, shifts):
        h = jnp.maximum(jnp.einsum('bnsc,cd->bnsd', h, w) + b, 0.0)
    h = jnp.max(h, axis=2)                                         # (B, N, Cout)
    return jnp.transpose(h, (0, 2, 1))                             # (B, Cout, N)


if __name__ == "__main__":
    B, C, N = 2, 4, 16
    nsample = 8
    radius = 0.5
    mlp = [32, 32]

    key = jax.random.PRNGKey(0)
    k1, k2, k3, k4, kp = jax.random.split(key, 5)
    pos1 = jax.random.normal(k1, (B, 3, N), jnp.float32)
    pos2 = pos1 + 0.1 * jax.random.normal(k2, (B, 3, N), jnp.float32)
    feature1 = jax.random.normal(k3, (B, C, N), jnp.float32)
    feature2 = jax.random.normal(k4, (B, C, N), jnp.float32)

    pad_params, ref_params = init_params(kp, C, mlp)
    params = (pad_params[0], pad_params[1], mlp[-1])

    pos_out, feat_out = flow_embedding_forward(
        pos1, pos2, feature1, feature2, params, radius, nsample)
    jax.block_until_ready(feat_out)

    assert pos_out.shape == (B, 3, N)
    assert feat_out.shape == (B, mlp[-1], N)
    assert bool(jnp.all(jnp.isfinite(feat_out)))

    # correctness vs f32 reference (bf16 MXU inputs -> allow small relative drift)
    ref = flow_embedding_reference(
        pos1, pos2, feature1, feature2, ref_params, radius, nsample)
    rel_err = float(jnp.max(jnp.abs(feat_out - ref)) /
                    (jnp.max(jnp.abs(ref)) + 1e-6))
    assert rel_err < 1e-1, f"relative error too large: {rel_err}"
    print("KERNEL_OK")
</pallas_src>

<mosaic_0001>
module attributes {stable_mosaic.version = 11 : i64} {
  func.func @kernel(%arg0: i32, %arg1: i32, %arg2: memref<1x1024x128xbf16, #tpu.memory_space<vmem>>, %arg3: memref<128x128xbf16, #tpu.memory_space<vmem>>, %arg4: memref<1x128xf32, #tpu.memory_space<vmem>>, %arg5: memref<128x128xbf16, #tpu.memory_space<vmem>>, %arg6: memref<1x128xf32, #tpu.memory_space<vmem>>, %arg7: memref<1x128x128xf32, #tpu.memory_space<vmem>>) attributes {dimension_semantics = [#tpu.dimension_semantics<parallel>, #tpu.dimension_semantics<parallel>], iteration_bounds = array<i64: 2, 1>, scalar_prefetch = 0 : i64, scratch_operands = 0 : i64, tpu.core_type = #tpu.core_type<tc>, window_params = [{transform_indices = @transform_0, window_bounds = array<i64: 1, 1024, 128>}, {pipeline_mode = #tpu.pipeline_mode<synchronous>, transform_indices = @transform_1, window_bounds = array<i64: 128, 128>}, {pipeline_mode = #tpu.pipeline_mode<synchronous>, transform_indices = @transform_2, window_bounds = array<i64: 1, 128>}, {pipeline_mode = #tpu.pipeline_mode<synchronous>, transform_indices = @transform_3, window_bounds = array<i64: 128, 128>}, {pipeline_mode = #tpu.pipeline_mode<synchronous>, transform_indices = @transform_4, window_bounds = array<i64: 1, 128>}, {transform_indices = @transform_5, window_bounds = array<i64: 1, 128, 128>}]} {
    %c0 = arith.constant 0 : index
    %c0_0 = arith.constant 0 : index
    %c0_1 = arith.constant 0 : index
    %0 = vector.load %arg2[%c0, %c0_0, %c0_1] : memref<1x1024x128xbf16, #tpu.memory_space<vmem>>, vector<1x1024x128xbf16>
    %1 = vector.shape_cast %0 : vector<1x1024x128xbf16> to vector<1024x128xbf16>
    %c0_2 = arith.constant 0 : index
    %c0_3 = arith.constant 0 : index
    %2 = vector.load %arg3[%c0_2, %c0_3] : memref<128x128xbf16, #tpu.memory_space<vmem>>, vector<128x128xbf16>
    %c0_4 = arith.constant 0 : index
    %c0_5 = arith.constant 0 : index
    %3 = vector.load %arg4[%c0_4, %c0_5] : memref<1x128xf32, #tpu.memory_space<vmem>>, vector<1x128xf32>
    %cst = arith.constant dense<0.000000e+00> : vector<1024x128xf32>
    %4 = tpu.matmul %1, %2, %cst {dimension_numbers = #tpu.dot_dimension_numbers<[1], [0], [0], [1], [0, 0, 1, 1], [], []>} : vector<1024x128xbf16>, vector<128x128xbf16>, vector<1024x128xf32> -> vector<1024x128xf32>
    %5 = vector.broadcast %3 : vector<1x128xf32> to vector<1024x128xf32>
    %6 = arith.addf %4, %5 : vector<1024x128xf32>
    %cst_6 = arith.constant 0.000000e+00 : f32
    %7 = vector.broadcast %cst_6 : f32 to vector<1024x128xf32>
    %8 = arith.maximumf %6, %7 : vector<1024x128xf32>
    %9 = arith.truncf %8 : vector<1024x128xf32> to vector<1024x128xbf16>
    %c0_7 = arith.constant 0 : index
    %c0_8 = arith.constant 0 : index
    %10 = vector.load %arg5[%c0_7, %c0_8] : memref<128x128xbf16, #tpu.memory_space<vmem>>, vector<128x128xbf16>
    %c0_9 = arith.constant 0 : index
    %c0_10 = arith.constant 0 : index
    %11 = vector.load %arg6[%c0_9, %c0_10] : memref<1x128xf32, #tpu.memory_space<vmem>>, vector<1x128xf32>
    %cst_11 = arith.constant dense<0.000000e+00> : vector<1024x128xf32>
    %12 = tpu.matmul %9, %10, %cst_11 {dimension_numbers = #tpu.dot_dimension_numbers<[1], [0], [0], [1], [0, 0, 1, 1], [], []>} : vector<1024x128xbf16>, vector<128x128xbf16>, vector<1024x128xf32> -> vector<1024x128xf32>
    %13 = vector.broadcast %11 : vector<1x128xf32> to vector<1024x128xf32>
    %14 = arith.addf %12, %13 : vector<1024x128xf32>
    %cst_12 = arith.constant 0.000000e+00 : f32
    %15 = vector.broadcast %cst_12 : f32 to vector<1024x128xf32>
    %16 = arith.maximumf %14, %15 : vector<1024x128xf32>
    %17 = vector.shape_cast %16 : vector<1024x128xf32> to vector<128x8x128xf32>
    %cst_13 = arith.constant dense<0xFF800000> : vector<128x128xf32>
    %18 = vector.multi_reduction <maximumf>, %17, %cst_13 [1] : vector<128x8x128xf32> to vector<128x128xf32>
    %19 = tpu.transpose %18, [1, 0] : vector<128x128xf32> -> vector<128x128xf32>
    %c0_14 = arith.constant 0 : index
    %c0_15 = arith.constant 0 : index
    %c0_16 = arith.constant 0 : index
    %20 = vector.load %arg7[%c0_14, %c0_15, %c0_16] : memref<1x128x128xf32, #tpu.memory_space<vmem>>, vector<1x128x128xf32>
    %21 = vector.shape_cast %20 : vector<1x128x128xf32> to vector<128x128xf32>
    %22 = vector.shape_cast %19 : vector<128x128xf32> to vector<1x128x128xf32>
    tpu.vector_store %arg7[%c0_14, %c0_15, %c0_16], %22 {strides = array<i32>} : memref<1x128x128xf32, #tpu.memory_space<vmem>>, vector<1x128x128xf32>,
    return
  }
  func.func @transform_0(%arg0: i32, %arg1: i32) -> (i32, i32, i32) {
    %c0_i32 = arith.constant 0 : i32
    %c0_i32_0 = arith.constant 0 : i32
    return %arg0, %arg1, %c0_i32 : i32, i32, i32
  }
  func.func @transform_1(%arg0: i32, %arg1: i32) -> (i32, i32) {
    %c0_i32 = arith.constant 0 : i32
    %c0_i32_0 = arith.constant 0 : i32
    %c0_i32_1 = arith.constant 0 : i32
    return %c0_i32, %c0_i32_0 : i32, i32
  }
  func.func @transform_2(%arg0: i32, %arg1: i32) -> (i32, i32) {
    %c0_i32 = arith.constant 0 : i32
    %c0_i32_0 = arith.constant 0 : i32
    %c0_i32_1 = arith.constant 0 : i32
    return %c0_i32, %c0_i32_0 : i32, i32
  }
  func.func @transform_3(%arg0: i32, %arg1: i32) -> (i32, i32) {
    %c0_i32 = arith.constant 0 : i32
    %c0_i32_0 = arith.constant 0 : i32
    %c0_i32_1 = arith.constant 0 : i32
    return %c0_i32, %c0_i32_0 : i32, i32
  }
  func.func @transform_4(%arg0: i32, %arg1: i32) -> (i32, i32) {
    %c0_i32 = arith.constant 0 : i32
    %c0_i32_0 = arith.constant 0 : i32
    %c0_i32_1 = arith.constant 0 : i32
    return %c0_i32, %c0_i32_0 : i32, i32
  }
  func.func @transform_5(%arg0: i32, %arg1: i32) -> (i32, i32, i32) {
    %c0_i32 = arith.constant 0 : i32
    %c0_i32_0 = arith.constant 0 : i32
    return %arg0, %c0_i32, %arg1 : i32, i32, i32
  }
}

</mosaic_0001>

<bundles_post_ra>
// kernel: tpu_custom_call.1
= control target key start
LH: loop header
LB: loop body
LE: loop exit
PB: predicated region body
PF: predicated region fallthrough
CT: control target
= control target key end

     0   :  { %s4570_s0 = inlined_call_operand.hbm [shape: bf16[2,1024,128], index: 0, kind: input, shape index: {}]   ;;  %s4571_s1 = inlined_call_operand.hbm [shape: bf16[128,128], index: 1, kind: input, shape index: {}]   ;;  %s4572_s2 = inlined_call_operand.vmem [shape: f32[1,128], index: 2, kind: input, shape index: {}]   ;;  %s4573_s3 = inlined_call_operand.hbm [shape: bf16[128,128], index: 3, kind: input, shape index: {}]   ;;  %s4574_s4 = inlined_call_operand.vmem [shape: f32[1,128], index: 4, kind: input, shape index: {}]   ;;  %s4575_s5 = inlined_call_operand.hbm [shape: f32[2,128,128], index: 5, kind: output, shape index: {}]  }
   0x1   :  { %4578 = sst [smem:[#allocation12_spill]] %s4571_s1 }
   0x2   :  { %4579 = sst [smem:[#allocation13_spill]] %s4573_s3 }
   0x3   :  { %10 = vsyncpa [#allocation3], 0 }
   0x4   :  { %12 = vsyncpa [#allocation3 + $0x1], 0 }
   0x5   :  { %13 = vsyncpa [#allocation6], 0 }
   0x6   :  { %14 = vsyncpa [#allocation4], 0 }
   0x7   :  { %16 = vsyncpa [#allocation4 + $0x1], 0  ;;  %s3869_s18 = smov 0   ;;  %s3871_s19 = smov 0  }
   0x8   :  { %s3873_s20 = smov 0   ;;  %s3875_s21 = smov 0  }
   0x9   :  { %s3877_s22 = smov 0   ;;  %s3879_s23 = smov 0  }
   0xa LB: > { %s3124_s24 = sadd.s32 4294967295, %s3831_s23   ;;  %s3125_s25 = sadd.s32 4294967294, %s3831_s23   ;;  %s3831_s23 = sphi %s3879_s23, %s22_s23   ;;  %s3827_s22 = sphi %s3877_s22, %s4593_s22   ;;  %s3823_s21 = sphi %s3875_s21, %s4592_s21   ;;  %s3819_s20 = sphi %s3873_s20, %s4591_s20   ;;  %s3815_s19 = sphi %s3871_s19, %s4590_s19   ;;  %s3811_s18 = sphi %s3869_s18, %s4589_s18  }
   0xb   : > { %p56_p0 = scmp.ne.s32.totalorder %s3815_s19, %s3811_s18  ;;  %p3905_p1 = scmp.eq.s32.totalorder %s3124_s24, 0 }
   0xc   : > { %p172_p2 = scmp.eq.s32.totalorder %s3125_s25, 1  ;;  %p3126_p4 = scmp.ge.s32.totalorder %s3831_s23, 1 }
   0xd   : > { %p3911_p3 = por %p3905_p1, %p56_p0  ;;  %p179_p6 = scmp.lt.s32.totalorder %s3831_s23, 3 }
   0xe   : > { %p3916_p5 = por %p172_p2, %p56_p0  ;;  %s4583_s1 = sld [smem:[#allocation12_spill]] }
   0xf   : > { %p3924_p7 = pnand %p3126_p4, %p179_p6  ;;  %s3833_s8 = smov [#allocation5]  }
  0x10   : > { %s192_s9 = sshll.u32 %s3833_s8, 4  ;;  %p3129_p10 = scmp.ge.s32.totalorder %s3831_s23, 2  ;;  %s193_s9 = int_to_ptr.vmem [resolvable:$true] %s192_s9 }
  0x11   : > { %p3573_p8 = pneg %p3924_p7  ;;  %s4585_s3 = sld [smem:[#allocation13_spill]] }
  0x12   : > { %s4576_s13 = smov 64   ;;  %s4577_s14 = smov 4  }
  0x13   : > { %p3574_p9 = pnand %p3573_p8, %p3905_p1  ;;  %s3836_s15 = smov [#allocation7]  }
  0x14   : > { %s190_s6 = sshll.u32 %s4583_s1, 4  ;;  %s209_s16 = sshll.u32 %s3836_s15, 4  ;;  %s191_s6 = int_to_ptr.hbm [resolvable:$true] %s190_s6  ;;  %s210_s16 = int_to_ptr.vmem [resolvable:$true] %s209_s16 }
  0x15   : > { %3576 = dma.hbm_to_vmem [thread:$0]  (!%p3574_p9), %s191_s6, 1024, %s193_s9, [#allocation6], %s4576_s13, %s4576_s13, %s4577_s14  }
  0x16   : > { %p166_p11 = scmp.eq.s32.totalorder %s3124_s24, 1  ;;  %s34_s17 = sadd.s32 1, %s3827_s22 }
  0x17   : > { %s207_s12 = sshll.u32 %s4585_s3, 4  ;;  %p36_p12 = scmp.ge.s32.totalorder %s34_s17, 2  ;;  %s208_s12 = int_to_ptr.hbm [resolvable:$true] %s207_s12 }
  0x18   : > { %3579 = dma.hbm_to_vmem [thread:$0]  (!%p3574_p9), %s208_s12, 1024, %s210_s16, [#allocation6], %s4576_s13, %s4576_s13, %s4577_s14  }
  0x19   : > { %s43_s25 = sadd.s32 1, %s3819_s20  ;;  %p50_p13 = scmp.ne.s32.totalorder %s3819_s20, %s3815_s19 }
  0x1a   : > { %p51_p0 = scmp.eq.s32.totalorder %s3831_s23, 0  ;;  %s4595_s17 = smov (%p36_p12, %s34_s17), 0 }
  0x1b   : > { %p3951_p2 = por %p166_p11, %p50_p13  ;;  %p3590_p4 = scmp.lt.s32.totalorder %s3831_s23, 2 }
  0x1c   : > { %s38_s30 = ssub.s32 %s3827_s22, %s4595_s17  ;;  %s226_s6 = sand.u32 1, %s3819_s20  }
  0x1d   : > { %p41_p6 = scmp.eq.s32.totalorder %s38_s30, 0  ;;  %p52_p8 = por %p51_p0, %p50_p13 }
  0x1e   : > { %s3130_s8 = sshll.u32 %s226_s6, 9  ;;  %s3463_s24 = sshll.u32 %s3827_s22, 9 }
  0x1f   : > { %s3961_s9 = scalar_select %p41_p6, %s3819_s20, %s43_s25  }
  0x20   : > { %s237_s12 = scalar_lea.hbm %s4570_s0, %s3463_s24  ;;  %s230_s16 = scalar_lea.vmem [#allocation2], %s3130_s8 }
  0x21   : > { %s238_s15 = sshll.u32 %s237_s12, 4  ;;  %s240_s13 = sshll.u32 %s230_s16, 4  ;;  %s239_s15 = int_to_ptr.hbm [resolvable:$true] %s238_s15  ;;  %s241_s13 = int_to_ptr.vmem [resolvable:$true] %s240_s13 }
  0x22   : > { %p3581_p9 = pnand %p3590_p4, %p52_p8  ;;  %s227_s14 = scalar_lea.sflag [#allocation3], %s226_s6 }
  0x23   : > { %s4587_s1 = smov 4   ;;  %s4588_s3 = smov 64  }
  0x24   : > { %3583 = dma.hbm_to_vmem [thread:$0]  (!%p3581_p9), %s239_s15, 8192, %s241_s13, %s227_s14, %s4588_s3, %s4588_s3, %s4587_s1  }
  0x25   : > { %252 = sbr.rel (%p3924_p7) target bundleno = 1097 (0x449), region = 40  ;;  %s3974_s25 = sand.u32 (!%p3924_p7), 1, %s3815_s19  }
  0x26   : > { %s3134_s30 = sshll.u32 (!%p3924_p7), %s3974_s25, 9  ;;  %s255_s8 = scalar_lea.sflag (!%p3924_p7), [#allocation3], %s3974_s25 }
  0x27   : > { %s3978_s24 = scalar_lea.vmem (!%p3924_p7), [#allocation2], %s3134_s30 }
  0x2a   : > { %3798 = dma.done.wait (%p3911_p3), %s255_s8, 8192  }
  0x2b   : > { %3800 = vsyncadd (%p3911_p3), %s255_s8, 4294959104 }
  0x2c   : > { %3802 = dma.done.wait (%p3905_p1), [#allocation6], 2048  }
  0x2d   : > { %3804 = vsyncadd (%p3905_p1), [#allocation6], 4294965248  ;;  %v3535_v0 = vld [vmem:[#allocation5 + $0x38] sm:$0xff]  ;;  %v3534_v1 = vld [vmem:[#allocation5 + $0x30] sm:$0xff]  ;;  %vm2819_vm0 = vcmask 1041409   ;;  %vm2821_vm1 = vcmask 1042434  }
  0x2e   : > { %877 = vmatpush.bf16.msra.mxu0 %v3535_v0  ;;  %3545 = vmatpush.bf16.msra.mxu2 %v3535_v0  ;;  %v3533_v2 = vld [vmem:[#allocation5 + $0x28] sm:$0xff]  ;;  %v3532_v3 = vld [vmem:[#allocation5 + $0x20] sm:$0xff]  ;;  %v3531_v4 = vld [vmem:[#allocation5 + $0x18] sm:$0xff]  ;;  %vm2823_vm2 = vcmask 1043459   ;;  %vm2825_vm3 = vcmask 1044484   ;;  %vm2827_vm4 = vcmask 1045509  }
  0x2f   : > { %v3530_v5 = vld [vmem:[#allocation5 + $0x10] sm:$0xff]  ;;  %v3529_v6 = vld [vmem:[#allocation5 + $0x8] sm:$0xff]  ;;  %v3528_v7 = vld [vmem:[#allocation5] sm:$0xff]  ;;  %vm2829_vm5 = vcmask 1046534   ;;  %vm2831_vm6 = vcmask 1047559   ;;  %s3137_s8 = sshll.u32 %s3974_s25, 7 }
  0x30   : > { %v3464_v8 = vld [vmem:[%s3978_s24] sm:$0xff]  ;;  %v3465_v10 = vld [vmem:[%s3978_s24 + $0x8] sm:$0xff]  ;;  %v3466_v12 = vld [vmem:[%s3978_s24 + $0x10] sm:$0xff]  ;;  %s3544_s1 = sshll.u32 %s3823_s21, 7  ;;  %s3003_s14 = scalar_lea.sflag [#allocation4], %s3974_s25 }
  0x31   : > { %v3496_v9 = vld [vmem:[%s3978_s24 + $0x100] sm:$0xff]  ;;  %v3497_v11 = vld [vmem:[%s3978_s24 + $0x108] sm:$0xff]  ;;  %v3498_v13 = vld [vmem:[%s3978_s24 + $0x110] sm:$0xff]  ;;  %s3015_s27 = scalar_lea.hbm %s4575_s5, %s3544_s1  ;;  %s3765_s12 = scalar_lea.hbm %s4575_s5, 256 }
  0x32   : > { %878 = vmatpush.bf16.msra.mxu0 %v3534_v1  ;;  %3546 = vmatpush.bf16.msra.mxu2 %v3534_v1  ;;  %v3467_v14 = vld [vmem:[%s3978_s24 + $0x18] sm:$0xff]  ;;  %v3468_v16 = vld [vmem:[%s3978_s24 + $0x20] sm:$0xff]  ;;  %v3469_v19 = vld [vmem:[%s3978_s24 + $0x28] sm:$0xff]  ;;  %s3018_s13 = sshll.u32 %s3015_s27, 4  ;;  %s3019_s13 = int_to_ptr.hbm [resolvable:$true] %s3018_s13 }
  0x33   : > { %v3499_v15 = vld [vmem:[%s3978_s24 + $0x118] sm:$0xff]  ;;  %v3500_v17 = vld [vmem:[%s3978_s24 + $0x120] sm:$0xff]  ;;  %v3501_v20 = vld [vmem:[%s3978_s24 + $0x128] sm:$0xff]  ;;  %s3759_s6 = sshra.s32 %s3019_s13, 4  ;;  %s3760_s6 = int_to_ptr.hbm [resolvable:$true] %s3759_s6 }
  0x34   : > { %v3543_v18 = vld [vmem:[#allocation7 + $0x38] sm:$0xff]  ;;  %v3542_v21 = vld [vmem:[#allocation7 + $0x30] sm:$0xff]  ;;  %v3541_v22 = vld [vmem:[#allocation7 + $0x28] sm:$0xff]  ;;  %s3761_s10 = scalar_lea.hbm %s3760_s6, 128  ;;  %p3766_p11 = scmp.lt.s32.totalorder %s3760_s6, %s4575_s5 }
  0x35   : > { %1466 = vmatpush.bf16.msra.mxu1 %v3543_v18  ;;  %3553 = vmatpush.bf16.msra.mxu3 %v3543_v18  ;;  %v3540_v23 = vld [vmem:[#allocation7 + $0x20] sm:$0xff]  ;;  %v3539_v24 = vld [vmem:[#allocation7 + $0x18] sm:$0xff]  ;;  %v3470_v25 = vld [vmem:[%s3978_s24 + $0x30] sm:$0xff]  ;;  %p3762_p1 = scmp.ne.s32.totalorder %s3760_s6, %s3761_s10  ;;  %p3767_p12 = scmp.lt.s32.totalorder %s3765_s12, %s3761_s10 }
  0x36   : > { %879 = vmatpush.bf16.msra.mxu0 %v3533_v2  ;;  %3547 = vmatpush.bf16.msra.mxu2 %v3533_v2  ;;  %v3502_v26 = vld [vmem:[%s3978_s24 + $0x130] sm:$0xff]  ;;  %v3537_v28 = vld [vmem:[#allocation7 + $0x8] sm:$0xff]  ;;  %v3536_v29 = vld [vmem:[#allocation7] sm:$0xff] }
  0x37   : > { %v3538_v27 = vld [vmem:[#allocation7 + $0x10] sm:$0xff]  ;;  %v3471_v30 = vld [vmem:[%s3978_s24 + $0x38] sm:$0xff]  ;;  %v3472_v32 = vld [vmem:[%s3978_s24 + $0x40] sm:$0xff]  ;;  %p3763_p3 = pnand %p3762_p1, %p3951_p2  ;;  %p3768_p13 = por %p3767_p12, %p3766_p11 }
  0x38   : > { %v3503_v31 = vld [vmem:[%s3978_s24 + $0x138] sm:$0xff]  ;;  %v3504_v33 = vld [vmem:[%s3978_s24 + $0x140] sm:$0xff]  ;;  %v3473_v47 = vld [vmem:[%s3978_s24 + $0x48] sm:$0xff] }
  0x39   : > { %1467 = vmatpush.bf16.msra.mxu1 %v3542_v21  ;;  %3554 = vmatpush.bf16.msra.mxu3 %v3542_v21  ;;  %v4009_v35 = vld [vmem:[%s4572_s2] ss:$0 sm:$0xff]  ;;  %v3505_v48 = vld [vmem:[%s3978_s24 + $0x148] sm:$0xff]  ;;  %v3474_v63 = vld [vmem:[%s3978_s24 + $0x50] sm:$0xff]  ;;  %p3764_p7 = pneg %p3763_p3 }
  0x3a   : > { %880 = vmatpush.bf16.msra.mxu0 %v3532_v3  ;;  %3548 = vmatpush.bf16.msra.mxu2 %v3532_v3  ;;  %v3506_v0 = vld [vmem:[%s3978_s24 + $0x150] sm:$0xff] }
  0x3b   : > { %p3769_p0 = pnand %p3768_p13, %p3764_p7 }
  0x3d   : > { %1468 = vmatpush.bf16.msra.mxu1 %v3541_v22  ;;  %3555 = vmatpush.bf16.msra.mxu3 %v3541_v22 }
  0x3e   : > { %881 = vmatpush.bf16.msra.mxu0 %v3531_v4  ;;  %3549 = vmatpush.bf16.msra.mxu2 %v3531_v4 }
  0x41   : > { %1469 = vmatpush.bf16.msra.mxu1 %v3540_v23  ;;  %3556 = vmatpush.bf16.msra.mxu3 %v3540_v23 }
  0x42   : > { %882 = vmatpush.bf16.msra.mxu0 %v3530_v5  ;;  %3550 = vmatpush.bf16.msra.mxu2 %v3530_v5 }
  0x45   : > { %1470 = vmatpush.bf16.msra.mxu1 %v3539_v24  ;;  %3557 = vmatpush.bf16.msra.mxu3 %v3539_v24 }
  0x46   : > { %883 = vmatpush.bf16.msra.mxu0 %v3529_v6  ;;  %3551 = vmatpush.bf16.msra.mxu2 %v3529_v6 }
  0x49   : > { %1471 = vmatpush.bf16.msra.mxu1 %v3538_v27  ;;  %3558 = vmatpush.bf16.msra.mxu3 %v3538_v27 }
  0x4a   : > { %884 = vmatpush.bf16.msra.mxu0 %v3528_v7  ;;  %3552 = vmatpush.bf16.msra.mxu2 %v3528_v7 }
  0x4d   : > { %885 = vmatmul.bf16.vlgmr.msra.gmra.mxu0 %v3464_v8  ;;  %1045 = vmatmul.bf16.vlgmr.msra.gmra.mxu2 %v3496_v9 }
  0x4e   : > { %1472 = vmatpush.bf16.msra.mxu1 %v3537_v28  ;;  %3559 = vmatpush.bf16.msra.mxu3 %v3537_v28 }
  0x52   : > { %1473 = vmatpush.bf16.msra.mxu1 %v3536_v29  ;;  %3560 = vmatpush.bf16.msra.mxu3 %v3536_v29 }
  0x5d   : > { %890 = vmatmul.bf16.gmra.mxu0 %v3465_v10  ;;  %1050 = vmatmul.bf16.gmra.mxu2 %v3497_v11 }
  0x6d   : > { %895 = vmatmul.bf16.gmra.mxu0 %v3466_v12  ;;  %1055 = vmatmul.bf16.gmra.mxu2 %v3498_v13 }
  0x7d   : > { %900 = vmatmul.bf16.gmra.mxu0 %v3467_v14  ;;  %1060 = vmatmul.bf16.gmra.mxu2 %v3499_v15  ;;  %v3475_v15 = vld [vmem:[%s3978_s24 + $0x58] sm:$0xff] }
  0x8d   : > { %905 = vmatmul.bf16.gmra.mxu0 %v3468_v16  ;;  %1065 = vmatmul.bf16.gmra.mxu2 %v3500_v17  ;;  %v3507_v16 = vld [vmem:[%s3978_s24 + $0x158] sm:$0xff] }
  0x9d   : > { %910 = vmatmul.bf16.gmra.mxu0 %v3469_v19  ;;  %1070 = vmatmul.bf16.gmra.mxu2 %v3501_v20 }
  0xad   : > { %915 = vmatmul.bf16.gmra.mxu0 %v3470_v25  ;;  %1075 = vmatmul.bf16.gmra.mxu2 %v3502_v26 }
  0xbd   : > { %920 = vmatmul.bf16.gmra.mxu0 %v3471_v30  ;;  %1080 = vmatmul.bf16.gmra.mxu2 %v3503_v31  ;;  %v3476_v31 = vld [vmem:[%s3978_s24 + $0x60] sm:$0xff] }
  0xca   : > { %v886_v34 = vpop.f32.mrf.mxu0 }
  0xcb   : > { %v887_v37 = vadd.f32 %v4009_v35, %v886_v34 }
  0xcd   : > { %925 = vmatmul.bf16.gmra.mxu0 %v3472_v32  ;;  %1085 = vmatmul.bf16.gmra.mxu2 %v3504_v33  ;;  %v1206_v40 = vmax.f32 %v887_v37, 0.0  ;;  %v3508_v32 = vld [vmem:[%s3978_s24 + $0x160] sm:$0xff] }
  0xd0   : > { %v1046_v36 = vpop.f32.mrf.mxu2 }
  0xd1   : > { %v1047_v41 = vadd.f32 %v4009_v35, %v1046_v36 }
  0xd2   : > { %v888_v38 = vpop.f32.mrf.mxu0 }
  0xd3   : > { %v889_v39 = vadd.f32 %v4009_v35, %v888_v38  ;;  %v1270_v45 = vmax.f32 %v1047_v41, 0.0 }
  0xd5   : > { %v1207_v42 = vmax.f32 %v889_v39, 0.0 }
  0xd7   : > { %v1334_v43 = vpack.c.bf16 %v1207_v42, %v1206_v40 }
  0xd8   : > { %v1048_v44 = vpop.f32.mrf.mxu2 }
  0xd9   : > { %v1049_v46 = vadd.f32 %v4009_v35, %v1048_v44  ;;  %1474 = vmatmul.bf16.vlgmr.msra.gmra.mxu1 %v1334_v43 }
  0xda   : > { %v891_v49 = vpop.f32.mrf.mxu0 }
  0xdb   : > { %v1271_v50 = vmax.f32 %v1049_v46, 0.0  ;;  %v892_v53 = vadd.f32 %v4009_v35, %v891_v49  ;;  %v3509_v49 = vld [vmem:[%s3978_s24 + $0x168] sm:$0xff] }
  0xdd   : > { %930 = vmatmul.bf16.gmra.mxu0 %v3473_v47  ;;  %1090 = vmatmul.bf16.gmra.mxu2 %v3505_v48  ;;  %v1366_v51 = vpack.c.bf16 %v1271_v50, %v1270_v45  ;;  %v1208_v56 = vmax.f32 %v892_v53, 0.0  ;;  %v3477_v48 = vld [vmem:[%s3978_s24 + $0x68] sm:$0xff] }
  0xdf   : > { %1634 = vmatmul.bf16.vlgmr.msra.gmra.mxu3 %v1366_v51 }
  0xe0   : > { %v1051_v52 = vpop.f32.mrf.mxu2 }
  0xe1   : > { %v1052_v57 = vadd.f32 %v4009_v35, %v1051_v52 }
  0xe2   : > { %v893_v54 = vpop.f32.mrf.mxu0 }
  0xe3   : > { %v894_v55 = vadd.f32 %v4009_v35, %v893_v54  ;;  %v1272_v61 = vmax.f32 %v1052_v57, 0.0 }
  0xe5   : > { %v1209_v58 = vmax.f32 %v894_v55, 0.0 }
  0xe7   : > { %v1335_v59 = vpack.c.bf16 %v1209_v58, %v1208_v56 }
  0xe8   : > { %v1053_v60 = vpop.f32.mrf.mxu2 }
  0xe9   : > { %v1054_v62 = vadd.f32 %v4009_v35, %v1053_v60  ;;  %1479 = vmatmul.bf16.gmra.mxu1 %v1335_v59 }
  0xea   : > { %v896_v1 = vpop.f32.mrf.mxu0 }
  0xeb   : > { %v1273_v2 = vmax.f32 %v1054_v62, 0.0  ;;  %v897_v5 = vadd.f32 %v4009_v35, %v896_v1  ;;  %v3510_v1 = vld [vmem:[%s3978_s24 + $0x170] sm:$0xff] }
  0xed   : > { %935 = vmatmul.bf16.gmra.mxu0 %v3474_v63  ;;  %1095 = vmatmul.bf16.gmra.mxu2 %v3506_v0  ;;  %v1367_v3 = vpack.c.bf16 %v1273_v2, %v1272_v61  ;;  %v1210_v8 = vmax.f32 %v897_v5, 0.0  ;;  %v3478_v0 = vld [vmem:[%s3978_s24 + $0x70] sm:$0xff] }
  0xef   : > { %1639 = vmatmul.bf16.gmra.mxu3 %v1367_v3 }
  0xf0   : > { %v1056_v4 = vpop.f32.mrf.mxu2 }
  0xf1   : > { %v1057_v9 = vadd.f32 %v4009_v35, %v1056_v4 }
  0xf2   : > { %v898_v6 = vpop.f32.mrf.mxu0 }
  0xf3   : > { %v899_v7 = vadd.f32 %v4009_v35, %v898_v6  ;;  %v1274_v13 = vmax.f32 %v1057_v9, 0.0 }
  0xf5   : > { %v1211_v10 = vmax.f32 %v899_v7, 0.0 }
  0xf7   : > { %v1336_v11 = vpack.c.bf16 %v1211_v10, %v1210_v8 }
  0xf8   : > { %v1058_v12 = vpop.f32.mrf.mxu2 }
  0xf9   : > { %v1059_v14 = vadd.f32 %v4009_v35, %v1058_v12  ;;  %1484 = vmatmul.bf16.gmra.mxu1 %v1336_v11 }
  0xfa   : > { %v901_v17 = vpop.f32.mrf.mxu0 }
  0xfb   : > { %v1275_v18 = vmax.f32 %v1059_v14, 0.0  ;;  %v902_v21 = vadd.f32 %v4009_v35, %v901_v17  ;;  %v3511_v17 = vld [vmem:[%s3978_s24 + $0x178] sm:$0xff] }
  0xfd   : > { %940 = vmatmul.bf16.gmra.mxu0 %v3475_v15  ;;  %1100 = vmatmul.bf16.gmra.mxu2 %v3507_v16  ;;  %v1368_v19 = vpack.c.bf16 %v1275_v18, %v1274_v13  ;;  %v1212_v24 = vmax.f32 %v902_v21, 0.0  ;;  %v3479_v16 = vld [vmem:[%s3978_s24 + $0x78] sm:$0xff] }
  0xff   : > { %1644 = vmatmul.bf16.gmra.mxu3 %v1368_v19 }
 0x100   : > { %v1061_v20 = vpop.f32.mrf.mxu2 }
 0x101   : > { %v1062_v25 = vadd.f32 %v4009_v35, %v1061_v20 }
 0x102   : > { %v903_v22 = vpop.f32.mrf.mxu0 }
 0x103   : > { %v904_v23 = vadd.f32 %v4009_v35, %v903_v22  ;;  %v1276_v29 = vmax.f32 %v1062_v25, 0.0 }
 0x105   : > { %v1213_v26 = vmax.f32 %v904_v23, 0.0 }
 0x107   : > { %v1337_v27 = vpack.c.bf16 %v1213_v26, %v1212_v24 }
 0x108   : > { %v1063_v28 = vpop.f32.mrf.mxu2 }
 0x109   : > { %v1064_v30 = vadd.f32 %v4009_v35, %v1063_v28  ;;  %1489 = vmatmul.bf16.gmra.mxu1 %v1337_v27 }
 0x10a   : > { %v906_v33 = vpop.f32.mrf.mxu0 }
 0x10b   : > { %v1277_v34 = vmax.f32 %v1064_v30, 0.0  ;;  %v907_v38 = vadd.f32 %v4009_v35, %v906_v33  ;;  %v3512_v33 = vld [vmem:[%s3978_s24 + $0x180] sm:$0xff] }
 0x10d   : > { %945 = vmatmul.bf16.gmra.mxu0 %v3476_v31  ;;  %1105 = vmatmul.bf16.gmra.mxu2 %v3508_v32  ;;  %v1369_v36 = vpack.c.bf16 %v1277_v34, %v1276_v29  ;;  %v1214_v41 = vmax.f32 %v907_v38, 0.0  ;;  %v3480_v32 = vld [vmem:[%s3978_s24 + $0x80] sm:$0xff] }
 0x10f   : > { %1649 = vmatmul.bf16.gmra.mxu3 %v1369_v36 }
 0x110   : > { %v1066_v37 = vpop.f32.mrf.mxu2 }
 0x111   : > { %v1067_v42 = vadd.f32 %v4009_v35, %v1066_v37 }
 0x112   : > { %v908_v39 = vpop.f32.mrf.mxu0 }
 0x113   : > { %v909_v40 = vadd.f32 %v4009_v35, %v908_v39  ;;  %v1278_v46 = vmax.f32 %v1067_v42, 0.0 }
 0x115   : > { %v1215_v43 = vmax.f32 %v909_v40, 0.0 }
 0x117   : > { %v1338_v44 = vpack.c.bf16 %v1215_v43, %v1214_v41 }
 0x118   : > { %v1068_v45 = vpop.f32.mrf.mxu2 }
 0x119   : > { %v1069_v47 = vadd.f32 %v4009_v35, %v1068_v45  ;;  %1494 = vmatmul.bf16.gmra.mxu1 %v1338_v44 }
 0x11a   : > { %v911_v50 = vpop.f32.mrf.mxu0 }
 0x11b   : > { %v1279_v51 = vmax.f32 %v1069_v47, 0.0  ;;  %v912_v54 = vadd.f32 %v4009_v35, %v911_v50  ;;  %v3481_v50 = vld [vmem:[%s3978_s24 + $0x88] sm:$0xff] }
 0x11d   : > { %950 = vmatmul.bf16.gmra.mxu0 %v3477_v48  ;;  %1110 = vmatmul.bf16.gmra.mxu2 %v3509_v49  ;;  %v1370_v52 = vpack.c.bf16 %v1279_v51, %v1278_v46  ;;  %v1216_v57 = vmax.f32 %v912_v54, 0.0  ;;  %v3513_v51 = vld [vmem:[%s3978_s24 + $0x188] sm:$0xff] }
 0x11f   : > { %1654 = vmatmul.bf16.gmra.mxu3 %v1370_v52 }
 0x120   : > { %v1071_v53 = vpop.f32.mrf.mxu2 }
 0x121   : > { %v1072_v58 = vadd.f32 %v4009_v35, %v1071_v53 }
 0x122   : > { %v913_v55 = vpop.f32.mrf.mxu0 }
 0x123   : > { %v914_v56 = vadd.f32 %v4009_v35, %v913_v55  ;;  %v1280_v62 = vmax.f32 %v1072_v58, 0.0  ;;  %v4069_v58 = vld [vmem:[%s4574_s4] ss:$0 sm:$0xff] }
 0x125   : > { %v1217_v59 = vmax.f32 %v914_v56, 0.0 }
 0x127   : > { %v1339_v60 = vpack.c.bf16 %v1217_v59, %v1216_v57 }
 0x128   : > { %v1073_v61 = vpop.f32.mrf.mxu2 }
 0x129   : > { %v1074_v63 = vadd.f32 %v4009_v35, %v1073_v61  ;;  %1499 = vmatmul.bf16.gmra.mxu1 %v1339_v60 }
 0x12a   : > { %v916_v2 = vpop.f32.mrf.mxu0 }
 0x12b   : > { %v1281_v3 = vmax.f32 %v1074_v63, 0.0  ;;  %v917_v6 = vadd.f32 %v4009_v35, %v916_v2 }
 0x12d   : > { %955 = vmatmul.bf16.gmra.mxu0 %v3478_v0  ;;  %1115 = vmatmul.bf16.gmra.mxu2 %v3510_v1  ;;  %v1371_v4 = vpack.c.bf16 %v1281_v3, %v1280_v62  ;;  %v1218_v9 = vmax.f32 %v917_v6, 0.0 }
 0x12f   : > { %1659 = vmatmul.bf16.gmra.mxu3 %v1371_v4 }
 0x130   : > { %v1076_v5 = vpop.f32.mrf.mxu2 }
 0x131   : > { %v1077_v10 = vadd.f32 %v4009_v35, %v1076_v5 }
 0x132   : > { %v918_v7 = vpop.f32.mrf.mxu0 }
 0x133   : > { %v919_v8 = vadd.f32 %v4009_v35, %v918_v7  ;;  %v1282_v14 = vmax.f32 %v1077_v10, 0.0  ;;  %v3514_v10 = vld [vmem:[%s3978_s24 + $0x190] sm:$0xff] }
 0x135   : > { %v1219_v11 = vmax.f32 %v919_v8, 0.0 }
 0x137   : > { %v1340_v12 = vpack.c.bf16 %v1219_v11, %v1218_v9  ;;  %v3482_v9 = vld [vmem:[%s3978_s24 + $0x90] sm:$0xff] }
 0x138   : > { %v1078_v13 = vpop.f32.mrf.mxu2 }
 0x139   : > { %v1079_v15 = vadd.f32 %v4009_v35, %v1078_v13  ;;  %1504 = vmatmul.bf16.gmra.mxu1 %v1340_v12 }
 0x13a   : > { %v921_v18 = vpop.f32.mrf.mxu0 }
 0x13b   : > { %v1283_v19 = vmax.f32 %v1079_v15, 0.0  ;;  %v922_v22 = vadd.f32 %v4009_v35, %v921_v18 }
 0x13d   : > { %960 = vmatmul.bf16.gmra.mxu0 %v3479_v16  ;;  %1120 = vmatmul.bf16.gmra.mxu2 %v3511_v17  ;;  %v1372_v20 = vpack.c.bf16 %v1283_v19, %v1282_v14  ;;  %v1220_v25 = vmax.f32 %v922_v22, 0.0 }
 0x13f   : > { %1664 = vmatmul.bf16.gmra.mxu3 %v1372_v20 }
 0x140   : > { %v1081_v21 = vpop.f32.mrf.mxu2 }
 0x141   : > { %v1082_v26 = vadd.f32 %v4009_v35, %v1081_v21 }
 0x142   : > { %v923_v23 = vpop.f32.mrf.mxu0 }
 0x143   : > { %v924_v24 = vadd.f32 %v4009_v35, %v923_v23  ;;  %v1284_v30 = vmax.f32 %v1082_v26, 0.0 }
 0x145   : > { %v1221_v27 = vmax.f32 %v924_v24, 0.0 }
 0x147   : > { %v1341_v28 = vpack.c.bf16 %v1221_v27, %v1220_v25 }
 0x148   : > { %v1083_v29 = vpop.f32.mrf.mxu2 }
 0x149   : > { %v1084_v31 = vadd.f32 %v4009_v35, %v1083_v29  ;;  %1509 = vmatmul.bf16.gmra.mxu1 %v1341_v28 }
 0x14a   : > { %v926_v34 = vpop.f32.mrf.mxu0 }
 0x14b   : > { %v1285_v36 = vmax.f32 %v1084_v31, 0.0  ;;  %v927_v39 = vadd.f32 %v4009_v35, %v926_v34 }
 0x14d   : > { %965 = vmatmul.bf16.gmra.mxu0 %v3480_v32  ;;  %1125 = vmatmul.bf16.gmra.mxu2 %v3512_v33  ;;  %v1373_v37 = vpack.c.bf16 %v1285_v36, %v1284_v30  ;;  %v1222_v42 = vmax.f32 %v927_v39, 0.0 }
 0x14f   : > { %1669 = vmatmul.bf16.gmra.mxu3 %v1373_v37 }
 0x150   : > { %v1086_v38 = vpop.f32.mrf.mxu2 }
 0x151   : > { %v1087_v43 = vadd.f32 %v4009_v35, %v1086_v38 }
 0x152   : > { %v928_v40 = vpop.f32.mrf.mxu0 }
 0x153   : > { %v929_v41 = vadd.f32 %v4009_v35, %v928_v40  ;;  %v1286_v48 = vmax.f32 %v1087_v43, 0.0 }
 0x155   : > { %v1223_v44 = vmax.f32 %v929_v41, 0.0 }
 0x156   : > { %v1475_v45 = vpop.f32.mrf.mxu1 }
 0x157   : > { %v1342_v46 = vpack.c.bf16 %v1223_v44, %v1222_v42  ;;  %v1476_v27 = vadd.f32 %v4069_v58, %v1475_v45 }
 0x158   : > { %v1088_v47 = vpop.f32.mrf.mxu2 }
 0x159   : > { %v1089_v49 = vadd.f32 %v4009_v35, %v1088_v47  ;;  %1514 = vmatmul.bf16.gmra.mxu1 %v1342_v46  ;;  %v1795_v40 = vmax.f32 %v1476_v27, 0.0 }
 0x15a   : > { %v931_v52 = vpop.f32.mrf.mxu0 }
 0x15b   : > { %v1287_v53 = vmax.f32 %v1089_v49, 0.0  ;;  %v932_v57 = vadd.f32 %v4009_v35, %v931_v52  ;;  %v3483_v49 = vld [vmem:[%s3978_s24 + $0x98] sm:$0xff] }
 0x15d   : > { %970 = vmatmul.bf16.gmra.mxu0 %v3481_v50  ;;  %1130 = vmatmul.bf16.gmra.mxu2 %v3513_v51  ;;  %v1374_v54 = vpack.c.bf16 %v1287_v53, %v1286_v48  ;;  %v1224_v63 = vmax.f32 %v932_v57, 0.0  ;;  %v3515_v50 = vld [vmem:[%s3978_s24 + $0x198] sm:$0xff] }
 0x15e   : > { %v1477_v55 = vpop.f32.mrf.mxu1 }
 0x15f   : > { %1674 = vmatmul.bf16.gmra.mxu3 %v1374_v54  ;;  %v1478_v32 = vadd.f32 %v4069_v58, %v1477_v55 }
 0x160   : > { %v1091_v56 = vpop.f32.mrf.mxu2 }
 0x161   : > { %v1092_v0 = vadd.f32 %v4009_v35, %v1091_v56  ;;  %v1796_v46 = vmax.f32 %v1478_v32, 0.0  ;;  %v1923_v56 = vrot.slane %v1795_v40, 4 }
 0x162   : > { %v933_v59 = vpop.f32.mrf.mxu0  ;;  %v1635_v60 = vpop.f32.mrf.mxu3 }
 0x163   : > { %v934_v61 = vadd.f32 %v4009_v35, %v933_v59  ;;  %v1636_v62 = vadd.f32 %v4069_v58, %v1635_v60  ;;  %v1288_v7 = vmax.f32 %v1092_v0, 0.0  ;;  %v1929_v0 = vrot.slane %v1796_v46, 4 }
 0x165   : > { %v1225_v1 = vmax.f32 %v934_v61, 0.0  ;;  %v1859_v2 = vmax.f32 %v1636_v62, 0.0 }
 0x166   : > { %v1480_v3 = vpop.f32.mrf.mxu1 }
 0x167   : > { %v1343_v4 = vpack.c.bf16 %v1225_v1, %v1224_v63  ;;  %v2307_v5 = vrot.slane %v1859_v2, 4  ;;  %v1481_v51 = vadd.f32 %v4069_v58, %v1480_v3 }
 0x168   : > { %v1093_v6 = vpop.f32.mrf.mxu2 }
 0x169   : > { %v1094_v8 = vadd.f32 %v4009_v35, %v1093_v6  ;;  %1519 = vmatmul.bf16.gmra.mxu1 %v1343_v4  ;;  %v2308_v11 = vmax.f32 %v1859_v2, %v2307_v5  ;;  %v1797_v2 = vmax.f32 %v1481_v51, 0.0  ;;  %v1924_v6 = vmax.f32 %v1795_v40, %v1923_v56  ;;  %v3516_v51 = vld [vmem:[%s3978_s24 + $0x1a0] sm:$0xff] }
 0x16a   : > { %v936_v12 = vpop.f32.mrf.mxu0  ;;  %v1637_v13 = vpop.f32.mrf.mxu3 }
 0x16b   : > { %v1289_v14 = vmax.f32 %v1094_v8, 0.0  ;;  %v2309_v15 = vrot.slane %v2308_v11, 2  ;;  %v1638_v16 = vadd.f32 %v4069_v58, %v1637_v13  ;;  %v937_v23 = vadd.f32 %v4009_v35, %v936_v12 }
 0x16c   : > { %v1930_v13 = vmax.f32 %v1796_v46, %v1929_v0 }
 0x16d   : > { %975 = vmatmul.bf16.gmra.mxu0 %v3482_v9  ;;  %1135 = vmatmul.bf16.gmra.mxu2 %v3514_v10  ;;  %v1375_v17 = vpack.c.bf16 %v1289_v14, %v1288_v7  ;;  %v1860_v18 = vmax.f32 %v1638_v16, 0.0  ;;  %v2310_v20 = vmax.f32 %v2308_v11, %v2309_v15  ;;  %v1226_v33 = vmax.f32 %v937_v23, 0.0 }
 0x16e   : > { %v1482_v19 = vpop.f32.mrf.mxu1  ;;  %v1935_v15 = vrot.slane %v1797_v2, 4 }
 0x16f   : > { %1679 = vmatmul.bf16.gmra.mxu3 %v1375_v17  ;;  %v2313_v21 = vrot.slane %v1860_v18, 4  ;;  %v2311_v29 = vrot.slane %v2310_v20, 1  ;;  %v1483_v57 = vadd.f32 %v4069_v58, %v1482_v19 }
 0x170   : > { %v1096_v22 = vpop.f32.mrf.mxu2  ;;  %v1936_v32 = vmax.f32 %v1797_v2, %v1935_v15 }
 0x171   : > { %v2314_v24 = vmax.f32 %v1860_v18, %v2313_v21  ;;  %v1097_v34 = vadd.f32 %v4009_v35, %v1096_v22  ;;  %v2312_v42 = vmax.f32 %v2310_v20, %v2311_v29  ;;  %v1798_v7 = vmax.f32 %v1483_v57, 0.0 }
 0x172   : > { %v938_v25 = vpop.f32.mrf.mxu0  ;;  %v1640_v26 = vpop.f32.mrf.mxu3  ;;  %v1925_v21 = vrot.slane %v1924_v6, 2 }
 0x173   : > { %v939_v28 = vadd.f32 %v4009_v35, %v938_v25  ;;  %v2315_v30 = vrot.slane %v2314_v24, 2  ;;  %v1641_v31 = vadd.f32 %v4069_v58, %v1640_v26  ;;  %v1290_v47 = vmax.f32 %v1097_v34, 0.0 }
 0x174   : > { %v1941_v22 = vrot.slane %v1798_v7, 4 }
 0x175   : > { %v1227_v36 = vmax.f32 %v939_v28, 0.0  ;;  %v2316_v37 = vmax.f32 %v2314_v24, %v2315_v30  ;;  %v1861_v38 = vmax.f32 %v1641_v31, 0.0  ;;  %v1931_v28 = vrot.slane %v1930_v13, 2 }
 0x176   : > { %v1485_v39 = vpop.f32.mrf.mxu1 }
 0x177   : > { %v1344_v41 = vpack.c.bf16 %v1227_v36, %v1226_v33  ;;  %v2317_v43 = vrot.slane %v2316_v37, 1  ;;  %v2319_v44 = vrot.slane %v1861_v38, 4  ;;  %v1486_v62 = vadd.f32 %v4069_v58, %v1485_v39 }
 0x178   : > { %v1098_v45 = vpop.f32.mrf.mxu2  ;;  %v1942_v39 = vmax.f32 %v1798_v7, %v1941_v22  ;;  %v1932_v46 = vmax.f32 %v1930_v13, %v1931_v28 }
 0x179   : > { %v1099_v48 = vadd.f32 %v4009_v35, %v1098_v45  ;;  %1524 = vmatmul.bf16.gmra.mxu1 %v1344_v41  ;;  %v2318_v52 = vmax.f32 %v2316_v37, %v2317_v43  ;;  %v2320_v53 = vmax.f32 %v1861_v38, %v2319_v44  ;;  %v1799_v10 = vmax.f32 %v1486_v62, 0.0 }
 0x17a   : > { %v941_v54 = vpop.f32.mrf.mxu0  ;;  %v1642_v55 = vpop.f32.mrf.mxu3  ;;  %v1926_v38 = vmax.f32 %v1924_v6, %v1925_v21 }
 0x17b   : > { %v1291_v59 = vmax.f32 %v1099_v48, 0.0  ;;  %v2882_v60 = vsel %vm2819_vm0, %v2318_v52, %v2312_v42  ;;  %v2321_v61 = vrot.slane %v2320_v53, 2  ;;  %v1643_v63 = vadd.f32 %v4069_v58, %v1642_v55 }
 0x17c   : > { %v942_v14 = vadd.f32 %v4009_v35, %v941_v54  ;;  %v1947_v25 = vrot.slane %v1799_v10, 4  ;;  %v1937_v52 = vrot.slane %v1936_v32, 2 }
 0x17d   : > { %980 = vmatmul.bf16.gmra.mxu0 %v3483_v49  ;;  %1140 = vmatmul.bf16.gmra.mxu2 %v3515_v50  ;;  %v1376_v1 = vpack.c.bf16 %v1291_v59, %v1290_v47  ;;  %v2322_v3 = vmax.f32 %v2320_v53, %v2321_v61  ;;  %v1862_v4 = vmax.f32 %v1643_v63, 0.0  ;;  %v3484_v50 = vld [vmem:[%s3978_s24 + $0xa0] sm:$0xff]  ;;  %v1927_v59 = vrot.slane %v1926_v38, 1 }
 0x17e   : > { %v1487_v5 = vpop.f32.mrf.mxu1  ;;  %v1228_v29 = vmax.f32 %v942_v14, 0.0  ;;  %v1948_v42 = vmax.f32 %v1799_v10, %v1947_v25  ;;  %v1938_v6 = vmax.f32 %v1936_v32, %v1937_v52 }
 0x17f   : > { %v1488_v8 = vadd.f32 %v4069_v58, %v1487_v5  ;;  %1684 = vmatmul.bf16.gmra.mxu3 %v1376_v1  ;;  %v2323_v9 = vrot.slane %v2322_v3, 1  ;;  %v2325_v11 = vrot.slane %v1862_v4, 4  ;;  %v1928_v14 = vmax.f32 %v1926_v38, %v1927_v59  ;;  %v3517_v59 = vld [vmem:[%s3978_s24 + $0x1a8] sm:$0xff] }
 0x180   : > { %v1101_v12 = vpop.f32.mrf.mxu2  ;;  %v1949_v63 = vrot.slane %v1948_v42, 2  ;;  %v1939_v22 = vrot.slane %v1938_v6, 1 }
 0x181   : > { %v2324_v16 = vmax.f32 %v2322_v3, %v2323_v9  ;;  %v2326_v17 = vmax.f32 %v1862_v4, %v2325_v11  ;;  %v1800_v18 = vmax.f32 %v1488_v8, 0.0  ;;  %v1102_v30 = vadd.f32 %v4009_v35, %v1101_v12 }
 0x182   : > { %v943_v19 = vpop.f32.mrf.mxu0  ;;  %v1645_v20 = vpop.f32.mrf.mxu3  ;;  %v1933_v3 = vrot.slane %v1932_v46, 1  ;;  %v1950_v15 = vmax.f32 %v1948_v42, %v1949_v63 }
 0x183   : > { %v944_v23 = vadd.f32 %v4009_v35, %v943_v19  ;;  %v2883_v24 = vsel %vm2821_vm1, %v2324_v16, %v2882_v60  ;;  %v2327_v26 = vrot.slane %v2326_v17, 2  ;;  %v1646_v27 = vadd.f32 %v4069_v58, %v1645_v20 }
 0x184   : > { %v1953_v34 = vrot.slane %v1800_v18, 4  ;;  %v1292_v47 = vmax.f32 %v1102_v30, 0.0  ;;  %v1943_v60 = vrot.slane %v1942_v39, 2  ;;  %v1934_v19 = vmax.f32 %v1932_v46, %v1933_v3 }
 0x185   : > { %v1229_v31 = vmax.f32 %v944_v23, 0.0  ;;  %v2328_v33 = vmax.f32 %v2326_v17, %v2327_v26  ;;  %v1863_v36 = vmax.f32 %v1646_v27, 0.0  ;;  %v1951_v32 = vrot.slane %v1950_v15, 1 }
 0x186   : > { %v1490_v37 = vpop.f32.mrf.mxu1  ;;  %v1954_v54 = vmax.f32 %v1800_v18, %v1953_v34  ;;  %v1944_v11 = vmax.f32 %v1942_v39, %v1943_v60  ;;  %v2820_v46 = vsel %vm2819_vm0, %v1934_v19, %v1928_v14 }
 0x187   : > { %v1491_v40 = vadd.f32 %v4069_v58, %v1490_v37  ;;  %v1345_v41 = vpack.c.bf16 %v1229_v31, %v1228_v29  ;;  %v2329_v43 = vrot.slane %v2328_v33, 1  ;;  %v2331_v44 = vrot.slane %v1863_v36, 4 }
 0x188   : > { %v1103_v45 = vpop.f32.mrf.mxu2  ;;  %v1955_v7 = vrot.slane %v1954_v54, 2  ;;  %v1945_v28 = vrot.slane %v1944_v11, 1 }
 0x189   : > { %v1801_v48 = vmax.f32 %v1491_v40, 0.0  ;;  %v1104_v49 = vadd.f32 %v4009_v35, %v1103_v45  ;;  %1529 = vmatmul.bf16.gmra.mxu1 %v1345_v41  ;;  %v2330_v53 = vmax.f32 %v2328_v33, %v2329_v43  ;;  %v2332_v55 = vmax.f32 %v1863_v36, %v2331_v44 }
 0x18a   : > { %v946_v56 = vpop.f32.mrf.mxu0  ;;  %v1647_v57 = vpop.f32.mrf.mxu3  ;;  %v1956_v23 = vmax.f32 %v1954_v54, %v1955_v7  ;;  %v1940_v41 = vmax.f32 %v1938_v6, %v1939_v22  ;;  %v1952_v54 = vmax.f32 %v1950_v15, %v1951_v32 }
 0x18b   : > { %v1959_v61 = vrot.slane %v1801_v48, 4  ;;  %v1293_v62 = vmax.f32 %v1104_v49, 0.0  ;;  %v2333_v0 = vrot.slane %v2332_v55, 2  ;;  %v1648_v1 = vadd.f32 %v4069_v58, %v1647_v57  ;;  %v3485_v57 = vld [vmem:[%s3978_s24 + $0xa8] sm:$0xff] }
 0x18c   : > { %v2884_v2 = vsel %vm2823_vm2, %v2330_v53, %v2883_v24  ;;  %v947_v20 = vadd.f32 %v4009_v35, %v946_v56  ;;  %v1957_v42 = vrot.slane %v1956_v23, 1 }
 0x18d   : > { %v1960_v4 = vmax.f32 %v1801_v48, %v1959_v61  ;;  %985 = vmatmul.bf16.gmra.mxu0 %v3484_v50  ;;  %1145 = vmatmul.bf16.gmra.mxu2 %v3516_v51  ;;  %v1377_v5 = vpack.c.bf16 %v1293_v62, %v1292_v47  ;;  %v2334_v8 = vmax.f32 %v2332_v55, %v2333_v0  ;;  %v1864_v9 = vmax.f32 %v1648_v1, 0.0 }
 0x18e   : > { %v1492_v10 = vpop.f32.mrf.mxu1  ;;  %v1230_v37 = vmax.f32 %v947_v20, 0.0  ;;  %v1946_v50 = vmax.f32 %v1944_v11, %v1945_v28  ;;  %v1958_v61 = vmax.f32 %v1956_v23, %v1957_v42 }
 0x18f   : > { %v1961_v12 = vrot.slane %v1960_v4, 2  ;;  %v1493_v13 = vadd.f32 %v4069_v58, %v1492_v10  ;;  %1689 = vmatmul.bf16.gmra.mxu3 %v1377_v5  ;;  %v2335_v16 = vrot.slane %v2334_v8, 1  ;;  %v2337_v17 = vrot.slane %v1864_v9, 4 }
 0x190   : > { %v1106_v18 = vpop.f32.mrf.mxu2 }
 0x191   : > { %v1802_v21 = vmax.f32 %v1493_v13, 0.0  ;;  %v2336_v24 = vmax.f32 %v2334_v8, %v2335_v16  ;;  %v2338_v25 = vmax.f32 %v1864_v9, %v2337_v17  ;;  %v1962_v29 = vmax.f32 %v1960_v4, %v1961_v12 }
 0x192   : > { %v948_v26 = vpop.f32.mrf.mxu0  ;;  %v1650_v27 = vpop.f32.mrf.mxu3  ;;  %v1107_v39 = vadd.f32 %v4009_v35, %v1106_v18 }
 0x193   : > { %v1965_v30 = vrot.slane %v1802_v21, 4  ;;  %v949_v31 = vadd.f32 %v4009_v35, %v948_v26  ;;  %v2339_v33 = vrot.slane %v2338_v25, 2  ;;  %v1651_v34 = vadd.f32 %v4069_v58, %v1650_v27 }
 0x194   : > { %v2885_v36 = vsel %vm2825_vm3, %v2336_v24, %v2884_v2  ;;  %v1963_v47 = vrot.slane %v1962_v29, 1  ;;  %v1294_v55 = vmax.f32 %v1107_v39, 0.0  ;;  %v2822_v2 = vsel %vm2821_vm1, %v1940_v41, %v2820_v46  ;;  %v3518_v46 = vld [vmem:[%s3978_s24 + $0x1b0] sm:$0xff] }
 0x195   : > { %v1966_v38 = vmax.f32 %v1802_v21, %v1965_v30  ;;  %v1231_v40 = vmax.f32 %v949_v31, 0.0  ;;  %v2340_v43 = vmax.f32 %v2338_v25, %v2339_v33  ;;  %v1865_v44 = vmax.f32 %v1651_v34, 0.0 }
 0x196   : > { %v4110_v45 = vpop.f32.mrf.mxu1  ;;  %v1964_v5 = vmax.f32 %v1962_v29, %v1963_v47  ;;  %v2824_v8 = vsel %vm2823_vm2, %v1946_v50, %v2822_v2 }
 0x197   : > { %v1967_v48 = vrot.slane %v1966_v38, 2  ;;  %v1346_v49 = vpack.c.bf16 %v1231_v40, %v1230_v37  ;;  %v2341_v51 = vrot.slane %v2340_v43, 1  ;;  %v2343_v52 = vrot.slane %v1865_v44, 4 }
 0x198   : > { %v1108_v53 = vpop.f32.mrf.mxu2  ;;  %v2826_v12 = vsel %vm2825_vm3, %v1952_v54, %v2824_v8 }
 0x199   : > { %v1109_v56 = vadd.f32 %v4009_v35, %v1108_v53  ;;  %1534 = vmatmul.bf16.gmra.mxu1 %v1346_v49  ;;  %v1968_v60 = vmax.f32 %v1966_v38, %v1967_v48  ;;  %v2342_v62 = vmax.f32 %v2340_v43, %v2341_v51  ;;  %v2344_v63 = vmax.f32 %v1865_v44, %v2343_v52  ;;  %v3486_v44 = vld [vmem:[%s3978_s24 + $0xb0] sm:$0xff] }
 0x19a   : > { %v951_v0 = vpop.f32.mrf.mxu0  ;;  %v1652_v1 = vpop.f32.mrf.mxu3  ;;  %v2828_v16 = vsel %vm2827_vm4, %v1958_v61, %v2826_v12  ;;  %v1496_v12 = vadd.f32 %v4069_v58, %v4110_v45 }
 0x19b   : > { %v1295_v3 = vmax.f32 %v1109_v56, 0.0  ;;  %v1653_v4 = vadd.f32 %v4069_v58, %v1652_v1  ;;  %v2345_v6 = vrot.slane %v2344_v63, 2  ;;  %v1969_v7 = vrot.slane %v1968_v60, 1 }
 0x19c   : > { %v2886_v9 = vsel %vm2827_vm4, %v2342_v62, %v2885_v36  ;;  %v2830_v18 = vsel %vm2829_vm5, %v1964_v5, %v2828_v16  ;;  %v952_v24 = vadd.f32 %v4009_v35, %v951_v0 }
 0x19d   : > { %v1866_v10 = vmax.f32 %v1653_v4, 0.0  ;;  %990 = vmatmul.bf16.gmra.mxu0 %v3485_v57  ;;  %1150 = vmatmul.bf16.gmra.mxu2 %v3517_v59  ;;  %v1378_v11 = vpack.c.bf16 %v1295_v3, %v1294_v55  ;;  %v2346_v13 = vmax.f32 %v2344_v63, %v2345_v6  ;;  %v1970_v15 = vmax.f32 %v1968_v60, %v1969_v7 }
 0x19e   : > { %v4121_v14 = vpop.f32.mrf.mxu1  ;;  %v1232_v33 = vmax.f32 %v952_v24, 0.0 }
 0x19f   : > { %v2349_v17 = vrot.slane %v1866_v10, 4  ;;  %1694 = vmatmul.bf16.gmra.mxu3 %v1378_v11  ;;  %v2347_v19 = vrot.slane %v2346_v13, 1  ;;  %v2832_v21 = vsel %vm2831_vm6, %v1970_v15, %v2830_v18 }
 0x1a0   : > { %v1111_v20 = vpop.f32.mrf.mxu2  ;;  %2954 = vxpose.xlu0.b32.start [1/16] %v2832_v21, 128 }
 0x1a1   : > { %v2350_v22 = vmax.f32 %v1866_v10, %v2349_v17  ;;  %v2348_v23 = vmax.f32 %v2346_v13, %v2347_v19  ;;  %v1112_v32 = vadd.f32 %v4009_v35, %v1111_v20  ;;  %v1498_v19 = vadd.f32 %v4069_v58, %v4121_v14 }
 0x1a2   : > { %v953_v25 = vpop.f32.mrf.mxu0  ;;  %v1655_v26 = vpop.f32.mrf.mxu3 }
 0x1a3   : > { %v2351_v27 = vrot.slane %v2350_v22, 2  ;;  %v954_v28 = vadd.f32 %v4009_v35, %v953_v25  ;;  %v1656_v29 = vadd.f32 %v4069_v58, %v1655_v26  ;;  %v2887_v30 = vsel %vm2829_vm5, %v2348_v23, %v2886_v9  ;;  %v3519_v23 = vld [vmem:[%s3978_s24 + $0x1b8] sm:$0xff] }
 0x1a4   : > { %v1296_v42 = vmax.f32 %v1112_v32, 0.0 }
 0x1a5   : > { %v2352_v31 = vmax.f32 %v2350_v22, %v2351_v27  ;;  %v1233_v34 = vmax.f32 %v954_v28, 0.0  ;;  %v1867_v36 = vmax.f32 %v1656_v29, 0.0  ;;  %v3487_v22 = vld [vmem:[%s3978_s24 + $0xb8] sm:$0xff]  ;;  %v1803_v28 = vmax.f32 %v1496_v12, 0.0 }
 0x1a6   : > { %v1500_v37 = vpop.f32.mrf.mxu1 }
 0x1a7   : > { %v2353_v38 = vrot.slane %v2352_v31, 1  ;;  %v2355_v39 = vrot.slane %v1867_v36, 4  ;;  %v1347_v41 = vpack.c.bf16 %v1233_v34, %v1232_v33  ;;  %v1501_v24 = vadd.f32 %v4069_v58, %v1500_v37 }
 0x1a8   : > { %v1113_v40 = vpop.f32.mrf.mxu2  ;;  %v1804_v33 = vmax.f32 %v1498_v19, 0.0 }
 0x1a9   : > { %v1114_v43 = vadd.f32 %v4009_v35, %v1113_v40  ;;  %v2354_v47 = vmax.f32 %v2352_v31, %v2353_v38  ;;  %v2356_v48 = vmax.f32 %v1867_v36, %v2355_v39  ;;  %1539 = vmatmul.bf16.gmra.mxu1 %v1347_v41  ;;  %v1805_v36 = vmax.f32 %v1501_v24, 0.0  ;;  %v3488_v24 = vld [vmem:[%s3978_s24 + $0xc0] sm:$0xff] }
 0x1aa   : > { %v956_v49 = vpop.f32.mrf.mxu0  ;;  %v1657_v50 = vpop.f32.mrf.mxu3  ;;  %v1971_v40 = vrot.slane %v1803_v28, 4 }
 0x1ab   : > { %v1297_v51 = vmax.f32 %v1114_v43, 0.0  ;;  %v2357_v52 = vrot.slane %v2356_v48, 2  ;;  %v1658_v53 = vadd.f32 %v4069_v58, %v1657_v50  ;;  %v4136_v54 = vsel %vm2831_vm6, %v2354_v47, %v2887_v30 }
 0x1ac   : > { %v957_v62 = vadd.f32 %v4009_v35, %v956_v49  ;;  %v4158_v49 = vld [vmem:[%s4572_s2] ss:$0 sm:$0xff] }
 0x1ad   : > { %995 = vmatmul.bf16.gmra.mxu0 %v3486_v44  ;;  %1155 = vmatmul.bf16.gmra.mxu2 %v3518_v46  ;;  %v1379_v55 = vpack.c.bf16 %v1297_v51, %v1296_v42  ;;  %v1868_v56 = vmax.f32 %v1658_v53, 0.0  ;;  %v2358_v59 = vmax.f32 %v2356_v48, %v2357_v52  ;;  %v1977_v48 = vrot.slane %v1804_v33, 4 }
 0x1ae   : > { %v1502_v57 = vpop.f32.mrf.mxu1  ;;  %v1234_v6 = vmax.f32 %v957_v62, 0.0  ;;  %v1983_v51 = vrot.slane %v1805_v36, 4 }
 0x1af   : > { %1699 = vmatmul.bf16.gmra.mxu3 %v1379_v55  ;;  %v2361_v60 = vrot.slane %v1868_v56, 4  ;;  %v2359_v3 = vrot.slane %v2358_v59, 1  ;;  %v1503_v29 = vadd.f32 %v4069_v58, %v1502_v57 }
 0x1b0   : > { %v1116_v61 = vpop.f32.mrf.mxu2 }
 0x1b1   : > { %v2362_v63 = vmax.f32 %v1868_v56, %v2361_v60  ;;  %v1117_v7 = vadd.f32 %v4009_v35, %v1116_v61  ;;  %v2360_v15 = vmax.f32 %v2358_v59, %v2359_v3  ;;  %v1806_v41 = vmax.f32 %v1503_v29, 0.0 }
 0x1b2   : > { %v958_v0 = vpop.f32.mrf.mxu0  ;;  %v1660_v1 = vpop.f32.mrf.mxu3  ;;  %v1972_v59 = vmax.f32 %v1803_v28, %v1971_v40 }
 0x1b3   : > { %v959_v2 = vadd.f32 %v4009_v35, %v958_v0  ;;  %v2363_v4 = vrot.slane %v2362_v63, 2  ;;  %v1661_v5 = vadd.f32 %v4069_v58, %v1660_v1  ;;  %v1298_v20 = vmax.f32 %v1117_v7, 0.0 }
 0x1b4   : > { %v1989_v60 = vrot.slane %v1806_v41, 4 }
 0x1b5   : > { %v1235_v8 = vmax.f32 %v959_v2, 0.0  ;;  %v2364_v9 = vmax.f32 %v2362_v63, %v2363_v4  ;;  %v1869_v10 = vmax.f32 %v1661_v5, 0.0  ;;  %v1978_v2 = vmax.f32 %v1804_v33, %v1977_v48 }
 0x1b6   : > { %v1505_v11 = vpop.f32.mrf.mxu1  ;;  %v1990_v12 = vmax.f32 %v1806_v41, %v1989_v60 }
 0x1b7   : > { %v1348_v13 = vpack.c.bf16 %v1235_v8, %v1234_v6  ;;  %v2365_v16 = vrot.slane %v2364_v9, 1  ;;  %v2367_v17 = vrot.slane %v1869_v10, 4  ;;  %v1506_v14 = vadd.f32 %v4069_v58, %v1505_v11 }
 0x1b8   : > { %v1118_v18 = vpop.f32.mrf.mxu2  ;;  %v1984_v6 = vmax.f32 %v1805_v36, %v1983_v51  ;;  %v1973_v11 = vrot.slane %v1972_v59, 2 }
 0x1b9   : > { %v1119_v21 = vadd.f32 %v4009_v35, %v1118_v18  ;;  %v2366_v25 = vmax.f32 %v2364_v9, %v2365_v16  ;;  %v2368_v26 = vmax.f32 %v1869_v10, %v2367_v17  ;;  %1544 = vmatmul.bf16.gmra.mxu1 %v1348_v13  ;;  %v1807_v44 = vmax.f32 %v1506_v14, 0.0 }
 0x1ba   : > { %v961_v27 = vpop.f32.mrf.mxu0  ;;  %v1662_v45 = vpop.f32.mrf.mxu3 }
 0x1bb   : > { %v1299_v30 = vmax.f32 %v1119_v21, 0.0  ;;  %v2889_v31 = vsel %vm2819_vm0, %v2366_v25, %v2360_v15  ;;  %v2369_v32 = vrot.slane %v2368_v26, 2  ;;  %v1663_v35 = vadd.f32 %v4069_v58, %v1662_v45  ;;  %v3520_v25 = vld [vmem:[%s3978_s24 + $0x1c0] sm:$0xff] }
 0x1bc   : > { %v962_v50 = vadd.f32 %v4158_v49, %v961_v27  ;;  %v1995_v63 = vrot.slane %v1807_v44, 4 }
 0x1bd   : > { %1000 = vmatmul.bf16.gmra.mxu0 %v3487_v22  ;;  %1160 = vmatmul.bf16.gmra.mxu2 %v3519_v23  ;;  %v1380_v34 = vpack.c.bf16 %v1299_v30, %v1298_v20  ;;  %v2370_v37 = vmax.f32 %v2368_v26, %v2369_v32  ;;  %v1870_v38 = vmax.f32 %v1663_v35, 0.0  ;;  %v1979_v20 = vrot.slane %v1978_v2, 2 }
 0x1be   : > { %v1507_v39 = vpop.f32.mrf.mxu1  ;;  %v1236_v3 = vmax.f32 %v962_v50, 0.0  ;;  %v1996_v16 = vmax.f32 %v1807_v44, %v1995_v63  ;;  %v1985_v26 = vrot.slane %v1984_v6, 2  ;;  %v1991_v32 = vrot.slane %v1990_v12, 2 }
 0x1bf   : > { %v1508_v42 = vadd.f32 %v4069_v58, %v1507_v39  ;;  %1704 = vmatmul.bf16.gmra.mxu3 %v1380_v34  ;;  %v2371_v43 = vrot.slane %v2370_v37, 1  ;;  %v2373_v46 = vrot.slane %v1870_v38, 4 }
 0x1c0   : > { %v1121_v47 = vpop.f32.mrf.mxu2  ;;  %v1997_v33 = vrot.slane %v1996_v16, 2  ;;  %v1986_v41 = vmax.f32 %v1984_v6, %v1985_v26 }
 0x1c1   : > { %v2372_v52 = vmax.f32 %v2370_v37, %v2371_v43  ;;  %v2374_v53 = vmax.f32 %v1870_v38, %v2373_v46  ;;  %v1808_v55 = vmax.f32 %v1508_v42, 0.0  ;;  %v1122_v4 = vadd.f32 %v4158_v49, %v1121_v47 }
 0x1c2   : > { %v963_v56 = vpop.f32.mrf.mxu0  ;;  %v1665_v57 = vpop.f32.mrf.mxu3  ;;  %v1980_v38 = vmax.f32 %v1978_v2, %v1979_v20  ;;  %v1992_v47 = vmax.f32 %v1990_v12, %v1991_v32  ;;  %v1998_v51 = vmax.f32 %v1996_v16, %v1997_v33  ;;  %v3521_v33 = vld [vmem:[%s3978_s24 + $0x1c8] sm:$0xff] }
 0x1c3   : > { %v964_v61 = vadd.f32 %v4158_v49, %v963_v56  ;;  %v2890_v62 = vsel %vm2821_vm1, %v2372_v52, %v2889_v31  ;;  %v2375_v0 = vrot.slane %v2374_v53, 2  ;;  %v1666_v1 = vadd.f32 %v4069_v58, %v1665_v57 }
 0x1c4   : > { %v2001_v8 = vrot.slane %v1808_v55, 4  ;;  %v1300_v21 = vmax.f32 %v1122_v4, 0.0  ;;  %v1974_v31 = vmax.f32 %v1972_v59, %v1973_v11  ;;  %v1981_v57 = vrot.slane %v1980_v38, 1 }
 0x1c5   : > { %v1237_v5 = vmax.f32 %v964_v61, 0.0  ;;  %v2376_v7 = vmax.f32 %v2374_v53, %v2375_v0  ;;  %v1871_v9 = vmax.f32 %v1666_v1, 0.0  ;;  %v1987_v61 = vrot.slane %v1986_v41, 1 }
 0x1c6   : > { %v1510_v10 = vpop.f32.mrf.mxu1  ;;  %v2002_v45 = vmax.f32 %v1808_v55, %v2001_v8  ;;  %v1975_v56 = vrot.slane %v1974_v31, 1  ;;  %v1982_v16 = vmax.f32 %v1980_v38, %v1981_v57 }
 0x1c7   : > { %v1511_v13 = vadd.f32 %v4069_v58, %v1510_v10  ;;  %v1349_v15 = vpack.c.bf16 %v1237_v5, %v1236_v3  ;;  %v2377_v17 = vrot.slane %v2376_v7, 1  ;;  %v2379_v18 = vrot.slane %v1871_v9, 4 }
 0x1c8   : > { %v1123_v19 = vpop.f32.mrf.mxu2  ;;  %v2003_v42 = vrot.slane %v2002_v45, 2  ;;  %v1993_v3 = vrot.slane %v1992_v47, 1 }
 0x1c9   : > { %v1809_v22 = vmax.f32 %v1511_v13, 0.0  ;;  %v1124_v23 = vadd.f32 %v4158_v49, %v1123_v19  ;;  %v2378_v27 = vmax.f32 %v2376_v7, %v2377_v17  ;;  %v2380_v28 = vmax.f32 %v1871_v9, %v2379_v18  ;;  %1549 = vmatmul.bf16.gmra.mxu1 %v1349_v15 }
 0x1ca   : > { %v966_v29 = vpop.f32.mrf.mxu0  ;;  %v1667_v30 = vpop.f32.mrf.mxu3  ;;  %v1999_v7 = vrot.slane %v1998_v51, 1  ;;  %v1994_v26 = vmax.f32 %v1992_v47, %v1993_v3 }
 0x1cb   : > { %v2007_v14 = vrot.slane %v1809_v22, 4  ;;  %v1301_v35 = vmax.f32 %v1124_v23, 0.0  ;;  %v2381_v34 = vrot.slane %v2380_v28, 2  ;;  %v1668_v36 = vadd.f32 %v4069_v58, %v1667_v30 }
 0x1cc   : > { %v2891_v37 = vsel %vm2823_vm2, %v2378_v27, %v2890_v62  ;;  %v967_v59 = vadd.f32 %v4158_v49, %v966_v29  ;;  %v2004_v62 = vmax.f32 %v2002_v45, %v2003_v42  ;;  %v2000_v29 = vmax.f32 %v1998_v51, %v1999_v7 }
 0x1cd   : > { %v2008_v39 = vmax.f32 %v1809_v22, %v2007_v14  ;;  %1005 = vmatmul.bf16.gmra.mxu0 %v3488_v24  ;;  %1165 = vmatmul.bf16.gmra.mxu2 %v3520_v25  ;;  %v1381_v40 = vpack.c.bf16 %v1301_v35, %v1300_v21  ;;  %v2382_v43 = vmax.f32 %v2380_v28, %v2381_v34  ;;  %v1872_v44 = vmax.f32 %v1668_v36, 0.0  ;;  %v3489_v35 = vld [vmem:[%s3978_s24 + $0xc8] sm:$0xff] }
 0x1ce   : > { %v1512_v46 = vpop.f32.mrf.mxu1  ;;  %v1238_v11 = vmax.f32 %v967_v59, 0.0  ;;  %v2005_v17 = vrot.slane %v2004_v62, 1  ;;  %v1988_v21 = vmax.f32 %v1986_v41, %v1987_v61  ;;  %v1976_v25 = vmax.f32 %v1974_v31, %v1975_v56 }
 0x1cf   : > { %v2009_v48 = vrot.slane %v2008_v39, 2  ;;  %v1513_v50 = vadd.f32 %v4069_v58, %v1512_v46  ;;  %1709 = vmatmul.bf16.gmra.mxu3 %v1381_v40  ;;  %v2383_v52 = vrot.slane %v2382_v43, 1  ;;  %v2385_v53 = vrot.slane %v1872_v44, 4 }
 0x1d0   : > { %v1126_v55 = vpop.f32.mrf.mxu2  ;;  %v2833_v34 = vsel %vm2819_vm0, %v1982_v16, %v1976_v25  ;;  %v2006_v36 = vmax.f32 %v2004_v62, %v2005_v17 }
 0x1d1   : > { %v1810_v60 = vmax.f32 %v1513_v50, 0.0  ;;  %v2384_v63 = vmax.f32 %v2382_v43, %v2383_v52  ;;  %v2386_v0 = vmax.f32 %v1872_v44, %v2385_v53  ;;  %v2010_v4 = vmax.f32 %v2008_v39, %v2009_v48 }
 0x1d2   : > { %v968_v1 = vpop.f32.mrf.mxu0  ;;  %v1670_v2 = vpop.f32.mrf.mxu3  ;;  %v1127_v13 = vadd.f32 %v4158_v49, %v1126_v55  ;;  %v2834_v31 = vsel %vm2821_vm1, %v1988_v21, %v2833_v34 }
 0x1d3   : > { %v2013_v5 = vrot.slane %v1810_v60, 4  ;;  %v969_v6 = vadd.f32 %v4158_v49, %v968_v1  ;;  %v2387_v8 = vrot.slane %v2386_v0, 2  ;;  %v1671_v9 = vadd.f32 %v4069_v58, %v1670_v2 }
 0x1d4   : > { %v2892_v10 = vsel %vm2825_vm3, %v2384_v63, %v2891_v37  ;;  %v2011_v22 = vrot.slane %v2010_v4, 1  ;;  %v1302_v32 = vmax.f32 %v1127_v13, 0.0  ;;  %v2835_v47 = vsel %vm2823_vm2, %v1994_v26, %v2834_v31 }
 0x1d5   : > { %v2014_v12 = vmax.f32 %v1810_v60, %v2013_v5  ;;  %v1239_v15 = vmax.f32 %v969_v6, 0.0  ;;  %v2388_v18 = vmax.f32 %v2386_v0, %v2387_v8  ;;  %v1873_v19 = vmax.f32 %v1671_v9, 0.0 }
 0x1d6   : > { %v4177_v20 = vpop.f32.mrf.mxu1  ;;  %v2012_v41 = vmax.f32 %v2010_v4, %v2011_v22  ;;  %v2836_v52 = vsel %vm2825_vm3, %v2000_v29, %v2835_v47 }
 0x1d7   : > { %v2015_v23 = vrot.slane %v2014_v12, 2  ;;  %v1350_v24 = vpack.c.bf16 %v1239_v15, %v1238_v11  ;;  %v2389_v27 = vrot.slane %v2388_v18, 1  ;;  %v2391_v45 = vrot.slane %v1873_v19, 4 }
 0x1d8   : > { %v1128_v28 = vpop.f32.mrf.mxu2  ;;  %v2837_v57 = vsel %vm2827_vm4, %v2006_v36, %v2836_v52 }
 0x1d9   : > { %v2016_v30 = vmax.f32 %v2014_v12, %v2015_v23  ;;  %v1129_v14 = vadd.f32 %v4158_v49, %v1128_v28  ;;  %v2390_v37 = vmax.f32 %v2388_v18, %v2389_v27  ;;  %v2392_v38 = vmax.f32 %v1873_v19, %v2391_v45  ;;  %1554 = vmatmul.bf16.gmra.mxu1 %v1350_v24  ;;  %v3490_v23 = vld [vmem:[%s3978_s24 + $0xd0] sm:$0xff] }
 0x1da   : > { %v971_v39 = vpop.f32.mrf.mxu0  ;;  %v1672_v40 = vpop.f32.mrf.mxu3  ;;  %v2838_v60 = vsel %vm2829_vm5, %v2012_v41, %v2837_v57  ;;  %v3522_v24 = vld [vmem:[%s3978_s24 + $0x1d0] sm:$0xff] }
 0x1db   : > { %v1303_v42 = vmax.f32 %v1129_v14, 0.0  ;;  %v1673_v43 = vadd.f32 %v4069_v58, %v1672_v40  ;;  %v2393_v44 = vrot.slane %v2392_v38, 2  ;;  %v2017_v46 = vrot.slane %v2016_v30, 1 }
 0x1dc   : > { %v2893_v48 = vsel %vm2827_vm4, %v2390_v37, %v2892_v10  ;;  %v972_v2 = vadd.f32 %v4158_v49, %v971_v39 }
 0x1dd   : > { %v1874_v50 = vmax.f32 %v1673_v43, 0.0  ;;  %1010 = vmatmul.bf16.gmra.mxu0 %v3489_v35  ;;  %1170 = vmatmul.bf16.gmra.mxu2 %v3521_v33  ;;  %v1382_v51 = vpack.c.bf16 %v1303_v42, %v1302_v32  ;;  %v2394_v53 = vmax.f32 %v2392_v38, %v2393_v44  ;;  %v2018_v56 = vmax.f32 %v2016_v30, %v2017_v46  ;;  %v4210_v43 = vld [vmem:[%s4574_s4] ss:$0 sm:$0xff] }
 0x1de   : > { %v4188_v55 = vpop.f32.mrf.mxu1  ;;  %v1240_v11 = vmax.f32 %v972_v2, 0.0  ;;  %v3523_v2 = vld [vmem:[%s3978_s24 + $0x1d8] sm:$0xff] }
 0x1df   : > { %v2397_v59 = vrot.slane %v1874_v50, 4  ;;  %1714 = vmatmul.bf16.gmra.mxu3 %v1382_v51  ;;  %v2395_v61 = vrot.slane %v2394_v53, 1  ;;  %v2839_v63 = vsel %vm2831_vm6, %v2018_v56, %v2838_v60 }
 0x1e0   : > { %v1131_v62 = vpop.f32.mrf.mxu2  ;;  %2955 = vxpose.xlu0.b32.cont [2/16] %v2839_v63, 128 }
 0x1e1   : > { %v2398_v0 = vmax.f32 %v1874_v50, %v2397_v59  ;;  %v2396_v1 = vmax.f32 %v2394_v53, %v2395_v61  ;;  %v1132_v10 = vadd.f32 %v4158_v49, %v1131_v62  ;;  %v1516_v53 = vadd.f32 %v4210_v43, %v4177_v20 }
 0x1e2   : > { %v973_v3 = vpop.f32.mrf.mxu0  ;;  %v1675_v4 = vpop.f32.mrf.mxu3  ;;  %v1518_v62 = vadd.f32 %v4210_v43, %v4188_v55 }
 0x1e3   : > { %v2399_v5 = vrot.slane %v2398_v0, 2  ;;  %v974_v6 = vadd.f32 %v4158_v49, %v973_v3  ;;  %v1676_v7 = vadd.f32 %v4069_v58, %v1675_v4  ;;  %v2894_v8 = vsel %vm2829_vm5, %v2396_v1, %v2893_v48  ;;  %v3491_v1 = vld [vmem:[%s3978_s24 + $0xd8] sm:$0xff] }
 0x1e4   : > { %v1304_v21 = vmax.f32 %v1132_v10, 0.0 }
 0x1e5   : > { %v2400_v9 = vmax.f32 %v2398_v0, %v2399_v5  ;;  %v1241_v12 = vmax.f32 %v974_v6, 0.0  ;;  %v1875_v13 = vmax.f32 %v1676_v7, 0.0  ;;  %v1811_v7 = vmax.f32 %v1516_v53, 0.0 }
 0x1e6   : > { %v1520_v15 = vpop.f32.mrf.mxu1 }
 0x1e7   : > { %v2401_v16 = vrot.slane %v2400_v9, 1  ;;  %v2403_v17 = vrot.slane %v1875_v13, 4  ;;  %v1351_v19 = vpack.c.bf16 %v1241_v12, %v1240_v11  ;;  %v1521_v3 = vadd.f32 %v4210_v43, %v1520_v15 }
 0x1e8   : > { %v1133_v18 = vpop.f32.mrf.mxu2 }
 0x1e9   : > { %v1134_v22 = vadd.f32 %v4158_v49, %v1133_v18  ;;  %v2402_v25 = vmax.f32 %v2400_v9, %v2401_v16  ;;  %v2404_v26 = vmax.f32 %v1875_v13, %v2403_v17  ;;  %1559 = vmatmul.bf16.gmra.mxu1 %v1351_v19  ;;  %v1812_v13 = vmax.f32 %v1518_v62, 0.0 }
 0x1ea   : > { %v976_v27 = vpop.f32.mrf.mxu0  ;;  %v1677_v45 = vpop.f32.mrf.mxu3  ;;  %v1813_v16 = vmax.f32 %v1521_v3, 0.0 }
 0x1eb   : > { %v1305_v28 = vmax.f32 %v1134_v22, 0.0  ;;  %v2405_v29 = vrot.slane %v2404_v26, 2  ;;  %v1678_v30 = vadd.f32 %v4069_v58, %v1677_v45  ;;  %v4203_v32 = vsel %vm2831_vm6, %v2402_v25, %v2894_v8 }
 0x1ec   : > { %v977_v38 = vadd.f32 %v4158_v49, %v976_v27  ;;  %v2025_v45 = vrot.slane %v1812_v13, 4 }
 0x1ed   : > { %1015 = vmatmul.bf16.gmra.mxu0 %v3490_v23  ;;  %1175 = vmatmul.bf16.gmra.mxu2 %v3522_v24  ;;  %v1383_v14 = vpack.c.bf16 %v1305_v28, %v1304_v21  ;;  %v1876_v35 = vmax.f32 %v1678_v30, 0.0  ;;  %v2406_v34 = vmax.f32 %v2404_v26, %v2405_v29  ;;  %v2019_v21 = vrot.slane %v1811_v7, 4 }
 0x1ee   : > { %v1522_v33 = vpop.f32.mrf.mxu1  ;;  %v1242_v46 = vmax.f32 %v977_v38, 0.0  ;;  %v2031_v29 = vrot.slane %v1813_v16, 4 }
 0x1ef   : > { %1719 = vmatmul.bf16.gmra.mxu3 %v1383_v14  ;;  %v2409_v36 = vrot.slane %v1876_v35, 4  ;;  %v2407_v58 = vrot.slane %v2406_v34, 1  ;;  %v1523_v8 = vadd.f32 %v4210_v43, %v1522_v33 }
 0x1f0   : > { %v1136_v37 = vpop.f32.mrf.mxu2 }
 0x1f1   : > { %v2410_v39 = vmax.f32 %v1876_v35, %v2409_v36  ;;  %v1137_v47 = vadd.f32 %v4158_v49, %v1136_v37  ;;  %v2408_v57 = vmax.f32 %v2406_v34, %v2407_v58  ;;  %v1814_v22 = vmax.f32 %v1523_v8, 0.0 }
 0x1f2   : > { %v978_v40 = vpop.f32.mrf.mxu0  ;;  %v1680_v31 = vpop.f32.mrf.mxu3  ;;  %v2020_v36 = vmax.f32 %v1811_v7, %v2019_v21  ;;  %v2026_v58 = vmax.f32 %v1812_v13, %v2025_v45 }
 0x1f3   : > { %v979_v41 = vadd.f32 %v4158_v49, %v978_v40  ;;  %v2411_v42 = vrot.slane %v2410_v39, 2  ;;  %v1681_v44 = vadd.f32 %v4210_v43, %v1680_v31  ;;  %v1306_v63 = vmax.f32 %v1137_v47, 0.0 }
 0x1f4   : > { %v2037_v37 = vrot.slane %v1814_v22, 4  ;;  %v2032_v47 = vmax.f32 %v1813_v16, %v2031_v29  ;;  %v2021_v53 = vrot.slane %v2020_v36, 2 }
 0x1f5   : > { %v1243_v48 = vmax.f32 %v979_v41, 0.0  ;;  %v2412_v50 = vmax.f32 %v2410_v39, %v2411_v42  ;;  %v1877_v51 = vmax.f32 %v1681_v44, 0.0 }
 0x1f6   : > { %v1525_v52 = vpop.f32.mrf.mxu1 }
 0x1f7   : > { %v1352_v56 = vpack.c.bf16 %v1243_v48, %v1242_v46  ;;  %v2413_v59 = vrot.slane %v2412_v50, 1  ;;  %v2415_v60 = vrot.slane %v1877_v51, 4  ;;  %v1526_v55 = vadd.f32 %v4210_v43, %v1525_v52 }
 0x1f8   : > { %v1138_v61 = vpop.f32.mrf.mxu2 }
 0x1f9   : > { %v1139_v0 = vadd.f32 %v4158_v49, %v1138_v61  ;;  %v2414_v4 = vmax.f32 %v2412_v50, %v2413_v59  ;;  %v2416_v5 = vmax.f32 %v1877_v51, %v2415_v60  ;;  %1564 = vmatmul.bf16.gmra.mxu1 %v1352_v56  ;;  %v1815_v25 = vmax.f32 %v1526_v55, 0.0 }
 0x1fa   : > { %v981_v6 = vpop.f32.mrf.mxu0  ;;  %v1682_v20 = vpop.f32.mrf.mxu3  ;;  %v2038_v56 = vmax.f32 %v1814_v22, %v2037_v37 }
 0x1fb   : > { %v1307_v9 = vmax.f32 %v1139_v0, 0.0  ;;  %v2896_v10 = vsel %vm2819_vm0, %v2414_v4, %v2408_v57  ;;  %v2417_v11 = vrot.slane %v2416_v5, 2  ;;  %v1683_v12 = vadd.f32 %v4210_v43, %v1682_v20  ;;  %v3492_v4 = vld [vmem:[%s3978_s24 + $0xe0] sm:$0xff] }
 0x1fc   : > { %v982_v28 = vadd.f32 %v4158_v49, %v981_v6  ;;  %v2043_v40 = vrot.slane %v1815_v25, 4  ;;  %v2027_v0 = vrot.slane %v2026_v58, 2  ;;  %v2033_v6 = vrot.slane %v2032_v47, 2 }
 0x1fd   : > { %1020 = vmatmul.bf16.gmra.mxu0 %v3491_v1  ;;  %1180 = vmatmul.bf16.gmra.mxu2 %v3523_v2  ;;  %v1384_v15 = vpack.c.bf16 %v1307_v9, %v1306_v63  ;;  %v2418_v17 = vmax.f32 %v2416_v5, %v2417_v11  ;;  %v1878_v18 = vmax.f32 %v1683_v12, 0.0  ;;  %v3524_v5 = vld [vmem:[%s3978_s24 + $0x1e0] sm:$0xff]  ;;  %v2022_v11 = vmax.f32 %v2020_v36, %v2021_v53 }
 0x1fe   : > { %v1527_v19 = vpop.f32.mrf.mxu1  ;;  %v1244_v42 = vmax.f32 %v982_v28, 0.0  ;;  %v2044_v60 = vmax.f32 %v1815_v25, %v2043_v40  ;;  %v2039_v55 = vrot.slane %v2038_v56, 2 }
 0x1ff   : > { %v1528_v23 = vadd.f32 %v4210_v43, %v1527_v19  ;;  %1724 = vmatmul.bf16.gmra.mxu3 %v1384_v15  ;;  %v2419_v24 = vrot.slane %v2418_v17, 1  ;;  %v2421_v26 = vrot.slane %v1878_v18, 4  ;;  %v2028_v19 = vmax.f32 %v2026_v58, %v2027_v0 }
 0x200   : > { %v1141_v27 = vpop.f32.mrf.mxu2  ;;  %v2045_v15 = vrot.slane %v2044_v60, 2  ;;  %v2040_v45 = vmax.f32 %v2038_v56, %v2039_v55 }
 0x201   : > { %v2420_v30 = vmax.f32 %v2418_v17, %v2419_v24  ;;  %v2422_v14 = vmax.f32 %v1878_v18, %v2421_v26  ;;  %v1816_v35 = vmax.f32 %v1528_v23, 0.0  ;;  %v1142_v44 = vadd.f32 %v4158_v49, %v1141_v27 }
 0x202   : > { %v983_v33 = vpop.f32.mrf.mxu0  ;;  %v1685_v34 = vpop.f32.mrf.mxu3  ;;  %v2034_v23 = vmax.f32 %v2032_v47, %v2033_v6  ;;  %v2029_v36 = vrot.slane %v2028_v19, 1 }
 0x203   : > { %v984_v38 = vadd.f32 %v4158_v49, %v983_v33  ;;  %v2897_v39 = vsel %vm2821_vm1, %v2420_v30, %v2896_v10  ;;  %v2423_v31 = vrot.slane %v2422_v14, 2  ;;  %v1686_v41 = vadd.f32 %v4210_v43, %v1685_v34 }
 0x204   : > { %v2049_v50 = vrot.slane %v1816_v35, 4  ;;  %v1308_v1 = vmax.f32 %v1142_v44, 0.0  ;;  %v2046_v30 = vmax.f32 %v2044_v60, %v2045_v15  ;;  %v2023_v34 = vrot.slane %v2022_v11, 1  ;;  %v3493_v15 = vld [vmem:[%s3978_s24 + $0xe8] sm:$0xff] }
 0x205   : > { %v1245_v46 = vmax.f32 %v984_v38, 0.0  ;;  %v2424_v48 = vmax.f32 %v2422_v14, %v2423_v31  ;;  %v1879_v51 = vmax.f32 %v1686_v41, 0.0  ;;  %v2041_v44 = vrot.slane %v2040_v45, 1 }
 0x206   : > { %v1530_v52 = vpop.f32.mrf.mxu1  ;;  %v2050_v7 = vmax.f32 %v1816_v35, %v2049_v50  ;;  %v2047_v50 = vrot.slane %v2046_v30, 1  ;;  %v2024_v6 = vmax.f32 %v2022_v11, %v2023_v34 }
 0x207   : > { %v1531_v57 = vadd.f32 %v4210_v43, %v1530_v52  ;;  %v1353_v59 = vpack.c.bf16 %v1245_v46, %v1244_v42  ;;  %v2425_v61 = vrot.slane %v2424_v48, 1  ;;  %v2427_v62 = vrot.slane %v1879_v51, 4 }
 0x208   : > { %v1143_v63 = vpop.f32.mrf.mxu2  ;;  %v2051_v24 = vrot.slane %v2050_v7, 2 }
 0x209   : > { %v1817_v2 = vmax.f32 %v1531_v57, 0.0  ;;  %v1144_v3 = vadd.f32 %v4158_v49, %v1143_v63  ;;  %v2426_v20 = vmax.f32 %v2424_v48, %v2425_v61  ;;  %v2428_v8 = vmax.f32 %v1879_v51, %v2427_v62  ;;  %1569 = vmatmul.bf16.gmra.mxu1 %v1353_v59 }
 0x20a   : > { %v986_v9 = vpop.f32.mrf.mxu0  ;;  %v1687_v10 = vpop.f32.mrf.mxu3  ;;  %v2052_v40 = vmax.f32 %v2050_v7, %v2051_v24  ;;  %v2030_v61 = vmax.f32 %v2028_v19, %v2029_v36 }
 0x20b   : > { %v2055_v12 = vrot.slane %v1817_v2, 4  ;;  %v1309_v13 = vmax.f32 %v1144_v3, 0.0  ;;  %v2429_v16 = vrot.slane %v2428_v8, 2  ;;  %v1688_v17 = vadd.f32 %v4210_v43, %v1687_v10 }
 0x20c   : > { %v2898_v18 = vsel %vm2823_vm2, %v2426_v20, %v2897_v39  ;;  %v987_v37 = vadd.f32 %v4158_v49, %v986_v9  ;;  %v2035_v39 = vrot.slane %v2034_v23, 1  ;;  %v2053_v62 = vrot.slane %v2052_v40, 1 }
 0x20d   : > { %v2056_v21 = vmax.f32 %v1817_v2, %v2055_v12  ;;  %1025 = vmatmul.bf16.gmra.mxu0 %v3492_v4  ;;  %1185 = vmatmul.bf16.gmra.mxu2 %v3524_v5  ;;  %v1385_v22 = vpack.c.bf16 %v1309_v13, %v1308_v1  ;;  %v2430_v25 = vmax.f32 %v2428_v8, %v2429_v16  ;;  %v1880_v26 = vmax.f32 %v1688_v17, 0.0  ;;  %v3525_v16 = vld [vmem:[%s3978_s24 + $0x1e8] sm:$0xff] }
 0x20e   : > { %v1532_v27 = vpop.f32.mrf.mxu1  ;;  %v1246_v56 = vmax.f32 %v987_v37, 0.0  ;;  %v2036_v2 = vmax.f32 %v2034_v23, %v2035_v39  ;;  %v2042_v20 = vmax.f32 %v2040_v45, %v2041_v44  ;;  %v2048_v10 = vmax.f32 %v2046_v30, %v2047_v50 }
 0x20f   : > { %v2057_v28 = vrot.slane %v2056_v21, 2  ;;  %v1533_v29 = vadd.f32 %v4210_v43, %v1532_v27  ;;  %1729 = vmatmul.bf16.gmra.mxu3 %v1385_v22  ;;  %v2431_v14 = vrot.slane %v2430_v25, 1  ;;  %v2433_v35 = vrot.slane %v1880_v26, 4 }
 0x210   : > { %v1146_v33 = vpop.f32.mrf.mxu2  ;;  %v2840_v17 = vsel %vm2819_vm0, %v2030_v61, %v2024_v6  ;;  %v3526_v6 = vld [vmem:[%s3978_s24 + $0x1f0] sm:$0xff] }
 0x211   : > { %v1818_v38 = vmax.f32 %v1533_v29, 0.0  ;;  %v2432_v31 = vmax.f32 %v2430_v25, %v2431_v14  ;;  %v2434_v41 = vmax.f32 %v1880_v26, %v2433_v35  ;;  %v2058_v46 = vmax.f32 %v2056_v21, %v2057_v28 }
 0x212   : > { %v988_v58 = vpop.f32.mrf.mxu0  ;;  %v1690_v42 = vpop.f32.mrf.mxu3  ;;  %v1147_v59 = vadd.f32 %v4158_v49, %v1146_v33  ;;  %v2841_v11 = vsel %vm2821_vm1, %v2036_v2, %v2840_v17 }
 0x213   : > { %v2061_v47 = vrot.slane %v1818_v38, 4  ;;  %v989_v48 = vadd.f32 %v4158_v49, %v988_v58  ;;  %v2435_v51 = vrot.slane %v2434_v41, 2  ;;  %v1691_v52 = vadd.f32 %v4210_v43, %v1690_v42 }
 0x214   : > { %v2899_v53 = vsel %vm2825_vm3, %v2432_v31, %v2898_v18  ;;  %v2059_v3 = vrot.slane %v2058_v46, 1  ;;  %v1310_v12 = vmax.f32 %v1147_v59, 0.0  ;;  %v2054_v18 = vmax.f32 %v2052_v40, %v2053_v62 }
 0x215   : > { %v2062_v57 = vmax.f32 %v1818_v38, %v2061_v47  ;;  %v1247_v60 = vmax.f32 %v989_v48, 0.0  ;;  %v2436_v63 = vmax.f32 %v2434_v41, %v2435_v51  ;;  %v1881_v0 = vmax.f32 %v1691_v52, 0.0 }
 0x216   : > { %v4244_v1 = vpop.f32.mrf.mxu1  ;;  %v2060_v24 = vmax.f32 %v2058_v46, %v2059_v3  ;;  %v2842_v28 = vsel %vm2823_vm2, %v2042_v20, %v2841_v11 }
 0x217   : > { %v2063_v4 = vrot.slane %v2062_v57, 2  ;;  %v1354_v5 = vpack.c.bf16 %v1247_v60, %v1246_v56  ;;  %v2437_v7 = vrot.slane %v2436_v63, 1  ;;  %v2439_v8 = vrot.slane %v1881_v0, 4 }
 0x218   : > { %v1148_v9 = vpop.f32.mrf.mxu2  ;;  %v2843_v35 = vsel %vm2825_vm3, %v2048_v10, %v2842_v28 }
 0x219   : > { %v2064_v55 = vmax.f32 %v2062_v57, %v2063_v4  ;;  %v1149_v13 = vadd.f32 %v4158_v49, %v1148_v9  ;;  %v2438_v19 = vmax.f32 %v2436_v63, %v2437_v7  ;;  %v2440_v21 = vmax.f32 %v1881_v0, %v2439_v8  ;;  %1574 = vmatmul.bf16.gmra.mxu1 %v1354_v5  ;;  %v3494_v5 = vld [vmem:[%s3978_s24 + $0xf0] sm:$0xff] }
 0x21a   : > { %v991_v22 = vpop.f32.mrf.mxu0  ;;  %v1692_v23 = vpop.f32.mrf.mxu3  ;;  %v2844_v37 = vsel %vm2827_vm4, %v2054_v18, %v2843_v35 }
 0x21b   : > { %v1311_v25 = vmax.f32 %v1149_v13, 0.0  ;;  %v1693_v26 = vadd.f32 %v4210_v43, %v1692_v23  ;;  %v2441_v27 = vrot.slane %v2440_v21, 2  ;;  %v2065_v45 = vrot.slane %v2064_v55, 1 }
 0x21c   : > { %v2900_v29 = vsel %vm2827_vm4, %v2438_v19, %v2899_v53  ;;  %v2845_v39 = vsel %vm2829_vm5, %v2060_v24, %v2844_v37  ;;  %v992_v44 = vadd.f32 %v4158_v49, %v991_v22 }
 0x21d   : > { %v1386_v30 = vpack.c.bf16 %v1311_v25, %v1310_v12  ;;  %v1882_v14 = vmax.f32 %v1693_v26, 0.0  ;;  %1030 = vmatmul.bf16.gmra.mxu0 %v3493_v15  ;;  %1190 = vmatmul.bf16.gmra.mxu2 %v3525_v16  ;;  %v2442_v33 = vmax.f32 %v2440_v21, %v2441_v27  ;;  %v2066_v36 = vmax.f32 %v2064_v55, %v2065_v45 }
 0x21e   : > { %v1537_v34 = vpop.f32.mrf.mxu1  ;;  %v1248_v57 = vmax.f32 %v992_v44, 0.0 }
 0x21f   : > { %v2445_v38 = vrot.slane %v1882_v14, 4  ;;  %1734 = vmatmul.bf16.gmra.mxu3 %v1386_v30  ;;  %v2443_v40 = vrot.slane %v2442_v33, 1  ;;  %v2846_v41 = vsel %vm2831_vm6, %v2066_v36, %v2845_v39  ;;  %v1538_v11 = vadd.f32 %v4210_v43, %v1537_v34 }
 0x220   : > { %v1151_v31 = vpop.f32.mrf.mxu2  ;;  %2956 = vxpose.xlu0.b32.cont [3/16] %v2846_v41, 128  ;;  %v1536_v36 = vadd.f32 %v4210_v43, %v4244_v1 }
 0x221   : > { %v2446_v58 = vmax.f32 %v1882_v14, %v2445_v38  ;;  %v2444_v42 = vmax.f32 %v2442_v33, %v2443_v40  ;;  %v1152_v56 = vadd.f32 %v4158_v49, %v1151_v31  ;;  %v1820_v34 = vmax.f32 %v1538_v11, 0.0 }
 0x222   : > { %v993_v46 = vpop.f32.mrf.mxu0  ;;  %v1695_v47 = vpop.f32.mrf.mxu3 }
 0x223   : > { %v2447_v48 = vrot.slane %v2446_v58, 2  ;;  %v994_v50 = vadd.f32 %v4158_v49, %v993_v46  ;;  %v1696_v51 = vadd.f32 %v4210_v43, %v1695_v47  ;;  %v2901_v52 = vsel %vm2829_vm5, %v2444_v42, %v2900_v29 }
 0x224   : > { %v1312_v3 = vmax.f32 %v1152_v56, 0.0  ;;  %v2073_v56 = vrot.slane %v1820_v34, 4 }
 0x225   : > { %v2448_v53 = vmax.f32 %v2446_v58, %v2447_v48  ;;  %v1249_v59 = vmax.f32 %v994_v50, 0.0  ;;  %v1883_v60 = vmax.f32 %v1696_v51, 0.0  ;;  %v3495_v48 = vld [vmem:[%s3978_s24 + $0xf8] sm:$0xff]  ;;  %v1819_v51 = vmax.f32 %v1536_v36, 0.0 }
 0x226   : > { %v1540_v61 = vpop.f32.mrf.mxu1  ;;  %v3527_v50 = vld [vmem:[%s3978_s24 + $0x1f8] sm:$0xff]  ;;  %s4513_s24 = scalar_lea.vmem [#allocation8], %s3137_s8 }
 0x227   : > { %v2449_v62 = vrot.slane %v2448_v53, 1  ;;  %v1355_v63 = vpack.c.bf16 %v1249_v59, %v1248_v57  ;;  %v2451_v0 = vrot.slane %v1883_v60, 4  ;;  %v1541_v41 = vadd.f32 %v4210_v43, %v1540_v61  ;;  %s3016_s7 = sshll.u32 %s4513_s24, 4  ;;  %s3017_s7 = int_to_ptr.vmem [resolvable:$true] %s3016_s7 }
 0x228   : > { %v1153_v2 = vpop.f32.mrf.mxu2 }
 0x229   : > { %v1154_v4 = vadd.f32 %v4158_v49, %v1153_v2  ;;  %v2450_v20 = vmax.f32 %v2448_v53, %v2449_v62  ;;  %v2452_v7 = vmax.f32 %v1883_v60, %v2451_v0  ;;  %1579 = vmatmul.bf16.gmra.mxu1 %v1355_v63  ;;  %v1821_v61 = vmax.f32 %v1541_v41, 0.0 }
 0x22a   : > { %v996_v8 = vpop.f32.mrf.mxu0  ;;  %v1697_v9 = vpop.f32.mrf.mxu3 }
 0x22b   : > { %v1313_v10 = vmax.f32 %v1154_v4, 0.0  ;;  %v1698_v55 = vadd.f32 %v4210_v43, %v1697_v9  ;;  %v2453_v12 = vrot.slane %v2452_v7, 2  ;;  %v4268_v13 = vsel %vm2831_vm6, %v2450_v20, %v2901_v52 }
 0x22c   : > { %v997_v21 = vadd.f32 %v4158_v49, %v996_v8  ;;  %v2079_v8 = vrot.slane %v1821_v61, 4 }
 0x22d   : > { %v1387_v15 = vpack.c.bf16 %v1313_v10, %v1312_v3  ;;  %v1884_v16 = vmax.f32 %v1698_v55, 0.0  ;;  %1035 = vmatmul.bf16.gmra.mxu0 %v3494_v5  ;;  %1195 = vmatmul.bf16.gmra.mxu2 %v3526_v6  ;;  %v2454_v17 = vmax.f32 %v2452_v7, %v2453_v12  ;;  %v2067_v5 = vrot.slane %v1819_v51, 4 }
 0x22e   : > { %v1542_v19 = vpop.f32.mrf.mxu1  ;;  %v1250_v29 = vmax.f32 %v997_v21, 0.0  ;;  %v2074_v6 = vmax.f32 %v1820_v34, %v2073_v56 }
 0x22f   : > { %v2457_v18 = vrot.slane %v1884_v16, 4  ;;  %1739 = vmatmul.bf16.gmra.mxu3 %v1387_v15  ;;  %v2455_v26 = vrot.slane %v2454_v17, 1  ;;  %v1543_v52 = vadd.f32 %v4210_v43, %v1542_v19 }
 0x230   : > { %v1156_v22 = vpop.f32.mrf.mxu2 }
 0x231   : > { %v2458_v23 = vmax.f32 %v1884_v16, %v2457_v18  ;;  %v1157_v14 = vadd.f32 %v4158_v49, %v1156_v22  ;;  %v2456_v37 = vmax.f32 %v2454_v17, %v2455_v26  ;;  %v1822_v3 = vmax.f32 %v1543_v52, 0.0 }
 0x232   : > { %v998_v24 = vpop.f32.mrf.mxu0  ;;  %v1700_v25 = vpop.f32.mrf.mxu3  ;;  %v2075_v26 = vrot.slane %v2074_v6, 2 }
 0x233   : > { %v2459_v27 = vrot.slane %v2458_v23, 2  ;;  %v999_v45 = vadd.f32 %v4158_v49, %v998_v24  ;;  %v1701_v28 = vadd.f32 %v4210_v43, %v1700_v25  ;;  %v1314_v44 = vmax.f32 %v1157_v14, 0.0 }
 0x234   : > { %v2085_v17 = vrot.slane %v1822_v3, 4 }
 0x235   : > { %v2460_v30 = vmax.f32 %v2458_v23, %v2459_v27  ;;  %v1251_v35 = vmax.f32 %v999_v45, 0.0  ;;  %v1885_v33 = vmax.f32 %v1701_v28, 0.0  ;;  %v2068_v23 = vmax.f32 %v1819_v51, %v2067_v5 }
 0x236   : > { %v1545_v31 = vpop.f32.mrf.mxu1  ;;  %v2080_v27 = vmax.f32 %v1821_v61, %v2079_v8 }
 0x237   : > { %v2461_v38 = vrot.slane %v2460_v30, 1  ;;  %v1356_v39 = vpack.c.bf16 %v1251_v35, %v1250_v29  ;;  %v2463_v40 = vrot.slane %v1885_v33, 4  ;;  %v1546_v62 = vadd.f32 %v4210_v43, %v1545_v31 }
 0x238   : > { %v1158_v58 = vpop.f32.mrf.mxu2  ;;  %v2076_v31 = vmax.f32 %v2074_v6, %v2075_v26 }
 0x239   : > { %v2462_v42 = vmax.f32 %v2460_v30, %v2461_v38  ;;  %v2464_v46 = vmax.f32 %v1885_v33, %v2463_v40  ;;  %v1159_v47 = vadd.f32 %v4158_v49, %v1158_v58  ;;  %1584 = vmatmul.bf16.gmra.mxu1 %v1356_v39  ;;  %v1823_v9 = vmax.f32 %v1546_v62, 0.0 }
 0x23a   : > { %v1001_v1 = vpop.f32.mrf.mxu0  ;;  %v1702_v53 = vpop.f32.mrf.mxu3  ;;  %v2086_v33 = vmax.f32 %v1822_v3, %v2085_v17  ;;  %v2077_v3 = vrot.slane %v2076_v31, 1 }
 0x23b   : > { %v2903_v57 = vsel %vm2819_vm0, %v2462_v42, %v2456_v37  ;;  %v2465_v59 = vrot.slane %v2464_v46, 2  ;;  %v1315_v60 = vmax.f32 %v1159_v47, 0.0  ;;  %v1703_v63 = vadd.f32 %v4210_v43, %v1702_v53 }
 0x23c   : > { %v1002_v16 = vadd.f32 %v4158_v49, %v1001_v1  ;;  %v2091_v45 = vrot.slane %v1823_v9, 4  ;;  %v2069_v37 = vrot.slane %v2068_v23, 2  ;;  %v2087_v51 = vrot.slane %v2086_v33, 2 }
 0x23d   : > { %v2466_v0 = vmax.f32 %v2464_v46, %v2465_v59  ;;  %v1388_v2 = vpack.c.bf16 %v1315_v60, %v1314_v44  ;;  %1040 = vmatmul.bf16.gmra.mxu0 %v3495_v48  ;;  %1200 = vmatmul.bf16.gmra.mxu2 %v3527_v50  ;;  %v1886_v4 = vmax.f32 %v1703_v63, 0.0  ;;  %v2081_v46 = vrot.slane %v2080_v27, 2 }
 0x23e   : > { %v1547_v7 = vpop.f32.mrf.mxu1  ;;  %v1252_v29 = vmax.f32 %v1002_v16, 0.0  ;;  %v2092_v41 = vmax.f32 %v1823_v9, %v2091_v45  ;;  %v2070_v62 = vmax.f32 %v2068_v23, %v2069_v37 }
 0x23f   : > { %v2467_v20 = vrot.slane %v2466_v0, 1  ;;  %1744 = vmatmul.bf16.gmra.mxu3 %v1388_v2  ;;  %v2469_v10 = vrot.slane %v1886_v4, 4  ;;  %v1548_v55 = vadd.f32 %v4210_v43, %v1547_v7  ;;  %v2088_v7 = vmax.f32 %v2086_v33, %v2087_v51 }
 0x240   : > { %v1161_v12 = vpop.f32.mrf.mxu2  ;;  %v2093_v63 = vrot.slane %v2092_v41, 2 }
 0x241   : > { %v2468_v15 = vmax.f32 %v2466_v0, %v2467_v20  ;;  %v2470_v18 = vmax.f32 %v1886_v4, %v2469_v10  ;;  %v1824_v19 = vmax.f32 %v1548_v55, 0.0  ;;  %v1162_v30 = vadd.f32 %v4158_v49, %v1161_v12 }
 0x242   : > { %v1003_v21 = vpop.f32.mrf.mxu0  ;;  %v1705_v22 = vpop.f32.mrf.mxu3  ;;  %v2082_v20 = vmax.f32 %v2080_v27, %v2081_v46 }
 0x243   : > { %v2904_v11 = vsel %vm2821_vm1, %v2468_v15, %v2903_v57  ;;  %v1004_v24 = vadd.f32 %v4158_v49, %v1003_v21  ;;  %v1706_v25 = vadd.f32 %v4210_v43, %v1705_v22  ;;  %v2471_v28 = vrot.slane %v2470_v18, 2  ;;  %v4295_v49 = vld [vmem:[%s4572_s2] ss:$0 sm:$0xff] }
 0x244   : > { %v2097_v34 = vrot.slane %v1824_v19, 4  ;;  %v1316_v47 = vmax.f32 %v1162_v30, 0.0  ;;  %v2094_v15 = vmax.f32 %v2092_v41, %v2093_v63  ;;  %v2071_v21 = vrot.slane %v2070_v62, 1 }
 0x245   : > { %v1253_v14 = vmax.f32 %v1004_v24, 0.0  ;;  %v1887_v35 = vmax.f32 %v1706_v25, 0.0  ;;  %v2472_v36 = vmax.f32 %v2470_v18, %v2471_v28  ;;  %v2078_v22 = vmax.f32 %v2076_v31, %v2077_v3 }
 0x246   : > { %v1550_v40 = vpop.f32.mrf.mxu1  ;;  %v2098_v1 = vmax.f32 %v1824_v19, %v2097_v34  ;;  %v2083_v24 = vrot.slane %v2082_v20, 1  ;;  %v2089_v25 = vrot.slane %v2088_v7, 1  ;;  %v2095_v33 = vrot.slane %v2094_v15, 1 }
 0x247   : > { %v1357_v38 = vpack.c.bf16 %v1253_v14, %v1252_v29  ;;  %v2475_v39 = vrot.slane %v1887_v35, 4  ;;  %v2473_v58 = vrot.slane %v2472_v36, 1  ;;  %v1551_v42 = vadd.f32 %v4210_v43, %v1550_v40 }
 0x248   : > { %v1163_v44 = vpop.f32.mrf.mxu2  ;;  %v2099_v8 = vrot.slane %v2098_v1, 2  ;;  %v2072_v41 = vmax.f32 %v2070_v62, %v2071_v21 }
 0x249   : > { %v2476_v48 = vmax.f32 %v1887_v35, %v2475_v39  ;;  %v1164_v50 = vadd.f32 %v4295_v49, %v1163_v44  ;;  %v2474_v52 = vmax.f32 %v2472_v36, %v2473_v58  ;;  %v1825_v53 = vmax.f32 %v1551_v42, 0.0  ;;  %1589 = vmatmul.bf16.gmra.mxu1 %v1357_v38 }
 0x24a   : > { %v1006_v56 = vpop.f32.mrf.mxu0  ;;  %v1707_v57 = vpop.f32.mrf.mxu3  ;;  %v2100_v26 = vmax.f32 %v2098_v1, %v2099_v8  ;;  %v2084_v58 = vmax.f32 %v2082_v20, %v2083_v24  ;;  %v2090_v1 = vmax.f32 %v2088_v7, %v2089_v25 }
 0x24b   : > { %v2477_v59 = vrot.slane %v2476_v48, 2  ;;  %v1317_v60 = vmax.f32 %v1164_v50, 0.0  ;;  %v1708_v61 = vadd.f32 %v4210_v43, %v1707_v57  ;;  %v2103_v0 = vrot.slane %v1825_v53, 4 }
 0x24c   : > { %v2905_v2 = vsel %vm2823_vm2, %v2474_v52, %v2904_v11  ;;  %v1007_v17 = vadd.f32 %v4295_v49, %v1006_v56  ;;  %v2101_v42 = vrot.slane %v2100_v26, 1  ;;  %v2847_v52 = vsel %vm2819_vm0, %v2078_v22, %v2072_v41 }
 0x24d   : > { %v2478_v4 = vmax.f32 %v2476_v48, %v2477_v59  ;;  %v1389_v5 = vpack.c.bf16 %v1317_v60, %v1316_v47  ;;  %v1888_v6 = vmax.f32 %v1708_v61, 0.0  ;;  %v2104_v9 = vmax.f32 %v1825_v53, %v2103_v0 }
 0x24e   : > { %v1552_v12 = vpop.f32.mrf.mxu1  ;;  %v1254_v36 = vmax.f32 %v1007_v17, 0.0  ;;  %v2096_v53 = vmax.f32 %v2094_v15, %v2095_v33  ;;  %v2848_v63 = vsel %vm2821_vm1, %v2084_v58, %v2847_v52  ;;  %v2102_v0 = vmax.f32 %v2100_v26, %v2101_v42 }
 0x24f   : > { %v2479_v10 = vrot.slane %v2478_v4, 1  ;;  %v2481_v55 = vrot.slane %v1888_v6, 4  ;;  %1749 = vmatmul.bf16.gmra.mxu3 %v1389_v5  ;;  %v2105_v16 = vrot.slane %v2104_v9, 2  ;;  %v1553_v18 = vadd.f32 %v4210_v43, %v1552_v12 }
 0x250   : > { %v1166_v19 = vpop.f32.mrf.mxu2 }
 0x251   : > { %v2480_v23 = vmax.f32 %v2478_v4, %v2479_v10  ;;  %v2482_v11 = vmax.f32 %v1888_v6, %v2481_v55  ;;  %v1826_v27 = vmax.f32 %v1553_v18, 0.0  ;;  %v2106_v29 = vmax.f32 %v2104_v9, %v2105_v16 }
 0x252   : > { %v1008_v45 = vpop.f32.mrf.mxu0  ;;  %v1710_v28 = vpop.f32.mrf.mxu3  ;;  %v1167_v39 = vadd.f32 %v4295_v49, %v1166_v19  ;;  %v2849_v9 = vsel %vm2823_vm2, %v2090_v1, %v2848_v63 }
 0x253   : > { %v2483_v30 = vrot.slane %v2482_v11, 2  ;;  %v1009_v14 = vadd.f32 %v4295_v49, %v1008_v45  ;;  %v1711_v35 = vadd.f32 %v4210_v43, %v1710_v28  ;;  %v2109_v34 = vrot.slane %v1826_v27, 4 }
 0x254   : > { %v2906_v37 = vsel %vm2825_vm3, %v2480_v23, %v2905_v2  ;;  %v2107_v46 = vrot.slane %v2106_v29, 1  ;;  %v1318_v60 = vmax.f32 %v1167_v39, 0.0  ;;  %v2850_v16 = vsel %vm2825_vm3, %v2096_v53, %v2849_v9 }
 0x255   : > { %v2484_v38 = vmax.f32 %v2482_v11, %v2483_v30  ;;  %v1255_v40 = vmax.f32 %v1009_v14, 0.0  ;;  %v1889_v31 = vmax.f32 %v1711_v35, 0.0  ;;  %v2110_v44 = vmax.f32 %v1826_v27, %v2109_v34 }
 0x256   : > { %v4306_v51 = vpop.f32.mrf.mxu1  ;;  %v2108_v5 = vmax.f32 %v2106_v29, %v2107_v46  ;;  %v2851_v18 = vsel %vm2827_vm4, %v2102_v0, %v2850_v16 }
 0x257   : > { %v2485_v47 = vrot.slane %v2484_v38, 1  ;;  %v1358_v48 = vpack.c.bf16 %v1255_v40, %v1254_v36  ;;  %v2487_v50 = vrot.slane %v1889_v31, 4  ;;  %v2111_v56 = vrot.slane %v2110_v44, 2 }
 0x258   : > { %v1168_v57 = vpop.f32.mrf.mxu2  ;;  %v2852_v23 = vsel %vm2829_vm5, %v2108_v5, %v2851_v18  ;;  %v1556_v16 = vadd.f32 %v4210_v43, %v4306_v51 }
 0x259   : > { %v2486_v59 = vmax.f32 %v2484_v38, %v2485_v47  ;;  %v2488_v61 = vmax.f32 %v1889_v31, %v2487_v50  ;;  %v1169_v62 = vadd.f32 %v4295_v49, %v1168_v57  ;;  %v2112_v2 = vmax.f32 %v2110_v44, %v2111_v56  ;;  %1594 = vmatmul.bf16.gmra.mxu1 %v1358_v48 }
 0x25a   : > { %v1011_v3 = vpop.f32.mrf.mxu0  ;;  %v1712_v4 = vpop.f32.mrf.mxu3 }
 0x25b   : > { %v2489_v6 = vrot.slane %v2488_v61, 2  ;;  %v1319_v20 = vmax.f32 %v1169_v62, 0.0  ;;  %v1713_v7 = vadd.f32 %v4210_v43, %v1712_v4  ;;  %v2113_v8 = vrot.slane %v2112_v2, 1 }
 0x25c   : > { %v2907_v10 = vsel %vm2827_vm4, %v2486_v59, %v2906_v37  ;;  %v1012_v11 = vadd.f32 %v4295_v49, %v1011_v3 }
 0x25d   : > { %v2490_v55 = vmax.f32 %v2488_v61, %v2489_v6  ;;  %v1390_v12 = vpack.c.bf16 %v1319_v20, %v1318_v60  ;;  %v1890_v15 = vmax.f32 %v1713_v7, 0.0  ;;  %v2114_v17 = vmax.f32 %v2112_v2, %v2113_v8 }
 0x25e   : > { %v1557_v22 = vpop.f32.mrf.mxu1  ;;  %v1256_v35 = vmax.f32 %v1012_v11, 0.0 }
 0x25f   : > { %v2491_v19 = vrot.slane %v2490_v55, 1  ;;  %v2493_v21 = vrot.slane %v1890_v15, 4  ;;  %1754 = vmatmul.bf16.gmra.mxu3 %v1390_v12  ;;  %v2853_v25 = vsel %vm2831_vm6, %v2114_v17, %v2852_v23  ;;  %v1558_v3 = vadd.f32 %v4210_v43, %v1557_v22 }
 0x260   : > { %v1171_v24 = vpop.f32.mrf.mxu2  ;;  %2957 = vxpose.xlu0.b32.cont [4/16] %v2853_v25, 128 }
 0x261   : > { %v2492_v26 = vmax.f32 %v2490_v55, %v2491_v19  ;;  %v2494_v27 = vmax.f32 %v1890_v15, %v2493_v21  ;;  %v1172_v34 = vadd.f32 %v4295_v49, %v1171_v24  ;;  %v1828_v17 = vmax.f32 %v1558_v3, 0.0 }
 0x262   : > { %v1013_v45 = vpop.f32.mrf.mxu0  ;;  %v1715_v28 = vpop.f32.mrf.mxu3 }
 0x263   : > { %v2495_v29 = vrot.slane %v2494_v27, 2  ;;  %v1014_v30 = vadd.f32 %v4295_v49, %v1013_v45  ;;  %v1716_v14 = vadd.f32 %v4210_v43, %v1715_v28  ;;  %v2908_v33 = vsel %vm2829_vm5, %v2492_v26, %v2907_v10 }
 0x264   : > { %v1320_v42 = vmax.f32 %v1172_v34, 0.0  ;;  %v1827_v28 = vmax.f32 %v1556_v16, 0.0 }
 0x265   : > { %v2496_v36 = vmax.f32 %v2494_v27, %v2495_v29  ;;  %v1257_v37 = vmax.f32 %v1014_v30, 0.0  ;;  %v1891_v38 = vmax.f32 %v1716_v14, 0.0  ;;  %v2121_v14 = vrot.slane %v1828_v17, 4 }
 0x266   : > { %v1560_v31 = vpop.f32.mrf.mxu1 }
 0x267   : > { %v1359_v39 = vpack.c.bf16 %v1257_v37, %v1256_v35  ;;  %v2499_v40 = vrot.slane %v1891_v38, 4  ;;  %v2497_v41 = vrot.slane %v2496_v36, 1  ;;  %v1561_v11 = vadd.f32 %v4210_v43, %v1560_v31 }
 0x268   : > { %v1173_v58 = vpop.f32.mrf.mxu2 }
 0x269   : > { %v2500_v44 = vmax.f32 %v1891_v38, %v2499_v40  ;;  %v1174_v46 = vadd.f32 %v4295_v49, %v1173_v58  ;;  %v2498_v47 = vmax.f32 %v2496_v36, %v2497_v41  ;;  %1599 = vmatmul.bf16.gmra.mxu1 %v1359_v39  ;;  %v1829_v34 = vmax.f32 %v1561_v11, 0.0 }
 0x26a   : > { %v1016_v48 = vpop.f32.mrf.mxu0  ;;  %v1717_v50 = vpop.f32.mrf.mxu3  ;;  %v2115_v58 = vrot.slane %v1827_v28, 4 }
 0x26b   : > { %v2501_v52 = vrot.slane %v2500_v44, 2  ;;  %v1321_v1 = vmax.f32 %v1174_v46, 0.0  ;;  %v1718_v53 = vadd.f32 %v4210_v43, %v1717_v50  ;;  %v4326_v56 = vsel %vm2831_vm6, %v2498_v47, %v2908_v33 }
 0x26c   : > { %v1017_v63 = vadd.f32 %v4295_v49, %v1016_v48  ;;  %v2127_v47 = vrot.slane %v1829_v34, 4 }
 0x26d   : > { %v1391_v57 = vpack.c.bf16 %v1321_v1, %v1320_v42  ;;  %v1892_v59 = vmax.f32 %v1718_v53, 0.0  ;;  %v2502_v60 = vmax.f32 %v2500_v44, %v2501_v52  ;;  %v2122_v42 = vmax.f32 %v1828_v17, %v2121_v14 }
 0x26e   : > { %v1562_v62 = vpop.f32.mrf.mxu1  ;;  %v1258_v9 = vmax.f32 %v1017_v63, 0.0 }
 0x26f   : > { %v2505_v61 = vrot.slane %v1892_v59, 4  ;;  %1759 = vmatmul.bf16.gmra.mxu3 %v1391_v57  ;;  %v2503_v6 = vrot.slane %v2502_v60, 1  ;;  %v1563_v29 = vadd.f32 %v4210_v43, %v1562_v62 }
 0x270   : > { %v1176_v0 = vpop.f32.mrf.mxu2 }
 0x271   : > { %v2506_v2 = vmax.f32 %v1892_v59, %v2505_v61  ;;  %v1177_v55 = vadd.f32 %v4295_v49, %v1176_v0  ;;  %v2504_v18 = vmax.f32 %v2502_v60, %v2503_v6  ;;  %v1830_v31 = vmax.f32 %v1563_v29, 0.0 }
 0x272   : > { %v1018_v4 = vpop.f32.mrf.mxu0  ;;  %v1720_v5 = vpop.f32.mrf.mxu3  ;;  %v2116_v0 = vmax.f32 %v1827_v28, %v2115_v58  ;;  %v2128_v6 = vmax.f32 %v1829_v34, %v2127_v47 }
 0x273   : > { %v2507_v20 = vrot.slane %v2506_v2, 2  ;;  %v1019_v7 = vadd.f32 %v4295_v49, %v1018_v4  ;;  %v1721_v8 = vadd.f32 %v4210_v43, %v1720_v5  ;;  %v1322_v26 = vmax.f32 %v1177_v55, 0.0  ;;  %v4348_v4 = vld [vmem:[%s4574_s4] ss:$0 sm:$0xff] }
 0x274   : > { %v2133_v59 = vrot.slane %v1830_v31, 4  ;;  %v2123_v5 = vrot.slane %v2122_v42, 2  ;;  %v2117_v17 = vrot.slane %v2116_v0, 2 }
 0x275   : > { %v2508_v10 = vmax.f32 %v2506_v2, %v2507_v20  ;;  %v1259_v12 = vmax.f32 %v1019_v7, 0.0  ;;  %v1893_v15 = vmax.f32 %v1721_v8, 0.0 }
 0x276   : > { %v1565_v23 = vpop.f32.mrf.mxu1 }
 0x277   : > { %v2509_v19 = vrot.slane %v2508_v10, 1  ;;  %v1360_v21 = vpack.c.bf16 %v1259_v12, %v1258_v9  ;;  %v2511_v22 = vrot.slane %v1893_v15, 4  ;;  %v1566_v37 = vadd.f32 %v4210_v43, %v1565_v23 }
 0x278   : > { %v1178_v24 = vpop.f32.mrf.mxu2  ;;  %v2134_v12 = vmax.f32 %v1830_v31, %v2133_v59 }
 0x279   : > { %v2510_v25 = vmax.f32 %v2508_v10, %v2509_v19  ;;  %v2512_v27 = vmax.f32 %v1893_v15, %v2511_v22  ;;  %v1179_v45 = vadd.f32 %v4295_v49, %v1178_v24  ;;  %1604 = vmatmul.bf16.gmra.mxu1 %v1360_v21  ;;  %v1831_v48 = vmax.f32 %v1566_v37, 0.0 }
 0x27a   : > { %v1021_v30 = vpop.f32.mrf.mxu0  ;;  %v1722_v51 = vpop.f32.mrf.mxu3  ;;  %v2124_v22 = vmax.f32 %v2122_v42, %v2123_v5  ;;  %v2135_v29 = vrot.slane %v2134_v12, 2 }
 0x27b   : > { %v2910_v35 = vsel %vm2819_vm0, %v2510_v25, %v2504_v18  ;;  %v2513_v33 = vrot.slane %v2512_v27, 2  ;;  %v1323_v36 = vmax.f32 %v1179_v45, 0.0  ;;  %v1723_v38 = vadd.f32 %v4210_v43, %v1722_v51 }
 0x27c   : > { %v1022_v57 = vadd.f32 %v4295_v49, %v1021_v30  ;;  %v2139_v20 = vrot.slane %v1831_v48, 4  ;;  %v2136_v47 = vmax.f32 %v2134_v12, %v2135_v29 }
 0x27d   : > { %v2514_v39 = vmax.f32 %v2512_v27, %v2513_v33  ;;  %v1392_v40 = vpack.c.bf16 %v1323_v36, %v1322_v26  ;;  %v1894_v41 = vmax.f32 %v1723_v38, 0.0  ;;  %v2129_v26 = vrot.slane %v2128_v6, 2 }
 0x27e   : > { %v1567_v46 = vpop.f32.mrf.mxu1  ;;  %v1260_v8 = vmax.f32 %v1022_v57, 0.0  ;;  %v2140_v23 = vmax.f32 %v1831_v48, %v2139_v20  ;;  %v2118_v38 = vmax.f32 %v2116_v0, %v2117_v17  ;;  %v2137_v5 = vrot.slane %v2136_v47, 1 }
 0x27f   : > { %v2515_v44 = vrot.slane %v2514_v39, 1  ;;  %1764 = vmatmul.bf16.gmra.mxu3 %v1392_v40  ;;  %v2517_v50 = vrot.slane %v1894_v41, 4  ;;  %v1568_v52 = vadd.f32 %v4210_v43, %v1567_v46  ;;  %v2130_v46 = vmax.f32 %v2128_v6, %v2129_v26 }
 0x280   : > { %v1181_v1 = vpop.f32.mrf.mxu2 }
 0x281   : > { %v2516_v53 = vmax.f32 %v2514_v39, %v2515_v44  ;;  %v2518_v60 = vmax.f32 %v1894_v41, %v2517_v50  ;;  %v1832_v61 = vmax.f32 %v1568_v52, 0.0  ;;  %v1182_v9 = vadd.f32 %v4295_v49, %v1181_v1 }
 0x282   : > { %v1023_v62 = vpop.f32.mrf.mxu0  ;;  %v1725_v63 = vpop.f32.mrf.mxu3  ;;  %v2141_v39 = vrot.slane %v2140_v23, 2  ;;  %v2125_v41 = vrot.slane %v2124_v22, 1 }
 0x283   : > { %v2911_v2 = vsel %vm2821_vm1, %v2516_v53, %v2910_v35  ;;  %v1024_v3 = vadd.f32 %v4295_v49, %v1023_v62  ;;  %v1726_v43 = vadd.f32 %v4348_v4, %v1725_v63  ;;  %v2519_v7 = vrot.slane %v2518_v60, 2 }
 0x284   : > { %v2145_v16 = vrot.slane %v1832_v61, 4  ;;  %v1324_v27 = vmax.f32 %v1182_v9, 0.0  ;;  %v2142_v57 = vmax.f32 %v2140_v23, %v2141_v39  ;;  %v2119_v63 = vrot.slane %v2118_v38, 1 }
 0x285   : > { %v1261_v10 = vmax.f32 %v1024_v3, 0.0  ;;  %v1895_v55 = vmax.f32 %v1726_v43, 0.0  ;;  %v2520_v15 = vmax.f32 %v2518_v60, %v2519_v7  ;;  %v2126_v0 = vmax.f32 %v2124_v22, %v2125_v41 }
 0x286   : > { %v1570_v21 = vpop.f32.mrf.mxu1  ;;  %v2146_v51 = vmax.f32 %v1832_v61, %v2145_v16  ;;  %v2131_v43 = vrot.slane %v2130_v46, 1 }
 0x287   : > { %v1361_v18 = vpack.c.bf16 %v1261_v10, %v1260_v8  ;;  %v2523_v19 = vrot.slane %v1895_v55, 4  ;;  %v2521_v11 = vrot.slane %v2520_v15, 1  ;;  %v1571_v24 = vadd.f32 %v4348_v4, %v1570_v21 }
 0x288   : > { %v1183_v25 = vpop.f32.mrf.mxu2  ;;  %v2147_v48 = vrot.slane %v2146_v51, 2 }
 0x289   : > { %v2524_v45 = vmax.f32 %v1895_v55, %v2523_v19  ;;  %v1184_v28 = vadd.f32 %v4295_v49, %v1183_v25  ;;  %v2522_v30 = vmax.f32 %v2520_v15, %v2521_v11  ;;  %v1833_v14 = vmax.f32 %v1571_v24, 0.0  ;;  %1609 = vmatmul.bf16.gmra.mxu1 %v1361_v18 }
 0x28a   : > { %v1026_v35 = vpop.f32.mrf.mxu0  ;;  %v1727_v33 = vpop.f32.mrf.mxu3  ;;  %v2148_v6 = vmax.f32 %v2146_v51, %v2147_v48  ;;  %v2143_v15 = vrot.slane %v2142_v57, 1  ;;  %v2120_v11 = vmax.f32 %v2118_v38, %v2119_v63  ;;  %v2132_v24 = vmax.f32 %v2130_v46, %v2131_v43 }
 0x28b   : > { %v2525_v36 = vrot.slane %v2524_v45, 2  ;;  %v1325_v34 = vmax.f32 %v1184_v28, 0.0  ;;  %v1728_v37 = vadd.f32 %v4348_v4, %v1727_v33  ;;  %v2151_v40 = vrot.slane %v1833_v14, 4 }
 0x28c   : > { %v2912_v31 = vsel %vm2823_vm2, %v2522_v30, %v2911_v2  ;;  %v1027_v60 = vadd.f32 %v4295_v49, %v1026_v35  ;;  %v2149_v25 = vrot.slane %v2148_v6, 1  ;;  %v2854_v51 = vsel %vm2819_vm0, %v2126_v0, %v2120_v11 }
 0x28d   : > { %v2526_v58 = vmax.f32 %v2524_v45, %v2525_v36  ;;  %v1393_v42 = vpack.c.bf16 %v1325_v34, %v1324_v27  ;;  %v1896_v44 = vmax.f32 %v1728_v37, 0.0  ;;  %v2152_v50 = vmax.f32 %v1833_v14, %v2151_v40 }
 0x28e   : > { %v1572_v53 = vpop.f32.mrf.mxu1  ;;  %v1262_v16 = vmax.f32 %v1027_v60, 0.0  ;;  %v2138_v14 = vmax.f32 %v2136_v47, %v2137_v5  ;;  %v2144_v35 = vmax.f32 %v2142_v57, %v2143_v15  ;;  %v2855_v40 = vsel %vm2821_vm1, %v2132_v24, %v2854_v51 }
 0x28f   : > { %v2527_v52 = vrot.slane %v2526_v58, 1  ;;  %v2529_v1 = vrot.slane %v1896_v44, 4  ;;  %1769 = vmatmul.bf16.gmra.mxu3 %v1393_v42  ;;  %v2153_v59 = vrot.slane %v2152_v50, 2  ;;  %v1573_v61 = vadd.f32 %v4348_v4, %v1572_v53 }
 0x290   : > { %v1186_v62 = vpop.f32.mrf.mxu2 }
 0x291   : > { %v2528_v2 = vmax.f32 %v2526_v58, %v2527_v52  ;;  %v2530_v3 = vmax.f32 %v1896_v44, %v2529_v1  ;;  %v1834_v20 = vmax.f32 %v1573_v61, 0.0  ;;  %v2154_v9 = vmax.f32 %v2152_v50, %v2153_v59 }
 0x292   : > { %v1028_v7 = vpop.f32.mrf.mxu0  ;;  %v1730_v8 = vpop.f32.mrf.mxu3  ;;  %v1187_v21 = vadd.f32 %v4295_v49, %v1186_v62  ;;  %v2856_v52 = vsel %vm2823_vm2, %v2138_v14, %v2855_v40 }
 0x293   : > { %v2531_v10 = vrot.slane %v2530_v3, 2  ;;  %v1029_v55 = vadd.f32 %v4295_v49, %v1028_v7  ;;  %v1731_v12 = vadd.f32 %v4348_v4, %v1730_v8  ;;  %v2157_v17 = vrot.slane %v1834_v20, 4 }
 0x294   : > { %v2913_v18 = vsel %vm2825_vm3, %v2528_v2, %v2912_v31  ;;  %v2155_v27 = vrot.slane %v2154_v9, 1  ;;  %v1326_v37 = vmax.f32 %v1187_v21, 0.0  ;;  %v2150_v31 = vmax.f32 %v2148_v6, %v2149_v25 }
 0x295   : > { %v2532_v19 = vmax.f32 %v2530_v3, %v2531_v10  ;;  %v1263_v22 = vmax.f32 %v1029_v55, 0.0  ;;  %v1897_v23 = vmax.f32 %v1731_v12, 0.0  ;;  %v2158_v26 = vmax.f32 %v1834_v20, %v2157_v17 }
 0x296   : > { %v4362_v30 = vpop.f32.mrf.mxu1  ;;  %v2156_v44 = vmax.f32 %v2154_v9, %v2155_v27  ;;  %v2857_v60 = vsel %vm2825_vm3, %v2144_v35, %v2856_v52 }
 0x297   : > { %v2533_v45 = vrot.slane %v2532_v19, 1  ;;  %v1362_v28 = vpack.c.bf16 %v1263_v22, %v1262_v16  ;;  %v2535_v29 = vrot.slane %v1897_v23, 4  ;;  %v2159_v33 = vrot.slane %v2158_v26, 2 }
 0x298   : > { %v1188_v36 = vpop.f32.mrf.mxu2  ;;  %v2858_v62 = vsel %vm2827_vm4, %v2150_v31, %v2857_v60  ;;  %v1576_v60 = vadd.f32 %v4348_v4, %v4362_v30 }
 0x299   : > { %v2534_v34 = vmax.f32 %v2532_v19, %v2533_v45  ;;  %v2536_v39 = vmax.f32 %v1897_v23, %v2535_v29  ;;  %v1189_v38 = vadd.f32 %v4295_v49, %v1188_v36  ;;  %v2160_v41 = vmax.f32 %v2158_v26, %v2159_v33  ;;  %1614 = vmatmul.bf16.gmra.mxu1 %v1362_v28 }
 0x29a   : > { %v1031_v58 = vpop.f32.mrf.mxu0  ;;  %v1732_v42 = vpop.f32.mrf.mxu3  ;;  %v2859_v3 = vsel %vm2829_vm5, %v2156_v44, %v2858_v62 }
 0x29b   : > { %v2537_v46 = vrot.slane %v2536_v39, 2  ;;  %v1327_v48 = vmax.f32 %v1189_v38, 0.0  ;;  %v1733_v47 = vadd.f32 %v4348_v4, %v1732_v42  ;;  %v2161_v50 = vrot.slane %v2160_v41, 1 }
 0x29c   : > { %v2914_v1 = vsel %vm2827_vm4, %v2534_v34, %v2913_v18  ;;  %v1032_v43 = vadd.f32 %v4295_v49, %v1031_v58 }
 0x29d   : > { %v2538_v53 = vmax.f32 %v2536_v39, %v2537_v46  ;;  %v1394_v57 = vpack.c.bf16 %v1327_v48, %v1326_v37  ;;  %v1898_v59 = vmax.f32 %v1733_v47, 0.0  ;;  %v2162_v61 = vmax.f32 %v2160_v41, %v2161_v50 }
 0x29e   : > { %v1577_v2 = vpop.f32.mrf.mxu1  ;;  %v1264_v15 = vmax.f32 %v1032_v43, 0.0 }
 0x29f   : > { %v2539_v63 = vrot.slane %v2538_v53, 1  ;;  %v2541_v0 = vrot.slane %v1898_v59, 4  ;;  %1774 = vmatmul.bf16.gmra.mxu3 %v1394_v57  ;;  %v2860_v6 = vsel %vm2831_vm6, %v2162_v61, %v2859_v3  ;;  %v1578_v61 = vadd.f32 %v4348_v4, %v1577_v2 }
 0x2a0   : > { %v1191_v5 = vpop.f32.mrf.mxu2  ;;  %2958 = vxpose.xlu0.b32.cont [5/16] %v2860_v6, 128 }
 0x2a1   : > { %v2540_v20 = vmax.f32 %v2538_v53, %v2539_v63  ;;  %v2542_v7 = vmax.f32 %v1898_v59, %v2541_v0  ;;  %v1192_v18 = vadd.f32 %v4295_v49, %v1191_v5  ;;  %v1836_v30 = vmax.f32 %v1578_v61, 0.0 }
 0x2a2   : > { %v1033_v8 = vpop.f32.mrf.mxu0  ;;  %v1735_v9 = vpop.f32.mrf.mxu3 }
 0x2a3   : > { %v2543_v10 = vrot.slane %v2542_v7, 2  ;;  %v1034_v55 = vadd.f32 %v4295_v49, %v1033_v8  ;;  %v1736_v12 = vadd.f32 %v4348_v4, %v1735_v9  ;;  %v2915_v16 = vsel %vm2829_vm5, %v2540_v20, %v2914_v1 }
 0x2a4   : > { %v1328_v26 = vmax.f32 %v1192_v18, 0.0  ;;  %v1835_v9 = vmax.f32 %v1576_v60, 0.0 }
 0x2a5   : > { %v2544_v17 = vmax.f32 %v2542_v7, %v2543_v10  ;;  %v1265_v19 = vmax.f32 %v1034_v55, 0.0  ;;  %v1899_v21 = vmax.f32 %v1736_v12, 0.0 }
 0x2a6   : > { %v1580_v11 = vpop.f32.mrf.mxu1 }
 0x2a7   : > { %v1363_v22 = vpack.c.bf16 %v1265_v19, %v1264_v15  ;;  %v2547_v23 = vrot.slane %v1899_v21, 4  ;;  %v2545_v24 = vrot.slane %v2544_v17, 1  ;;  %v1581_v10 = vadd.f32 %v4348_v4, %v1580_v11 }
 0x2a8   : > { %v1193_v25 = vpop.f32.mrf.mxu2  ;;  %v2169_v11 = vrot.slane %v1836_v30, 4 }
 0x2a9   : > { %v2548_v27 = vmax.f32 %v1899_v21, %v2547_v23  ;;  %v1194_v45 = vadd.f32 %v4295_v49, %v1193_v25  ;;  %v2546_v28 = vmax.f32 %v2544_v17, %v2545_v24  ;;  %1619 = vmatmul.bf16.gmra.mxu1 %v1363_v22  ;;  %v1837_v23 = vmax.f32 %v1581_v10, 0.0 }
 0x2aa   : > { %v1036_v29 = vpop.f32.mrf.mxu0  ;;  %v1737_v51 = vpop.f32.mrf.mxu3  ;;  %v2163_v25 = vrot.slane %v1835_v9, 4 }
 0x2ab   : > { %v2549_v14 = vrot.slane %v2548_v27, 2  ;;  %v1329_v35 = vmax.f32 %v1194_v45, 0.0  ;;  %v1738_v33 = vadd.f32 %v4348_v4, %v1737_v51  ;;  %v4382_v36 = vsel %vm2831_vm6, %v2546_v28, %v2915_v16 }
 0x2ac   : > { %v1037_v31 = vadd.f32 %v4295_v49, %v1036_v29 }
 0x2ad   : > { %v1395_v34 = vpack.c.bf16 %v1329_v35, %v1328_v26  ;;  %v1900_v37 = vmax.f32 %v1738_v33, 0.0  ;;  %v2550_v39 = vmax.f32 %v2548_v27, %v2549_v14 }
 0x2ae   : > { %v1582_v40 = vpop.f32.mrf.mxu1  ;;  %v1266_v52 = vmax.f32 %v1037_v31, 0.0  ;;  %v2164_v31 = vmax.f32 %v1835_v9, %v2163_v25 }
 0x2af   : > { %v2553_v38 = vrot.slane %v1900_v37, 4  ;;  %1779 = vmatmul.bf16.gmra.mxu3 %v1395_v34  ;;  %v2551_v46 = vrot.slane %v2550_v39, 1  ;;  %v1583_v17 = vadd.f32 %v4348_v4, %v1582_v40  ;;  %v2175_v34 = vrot.slane %v1837_v23, 4 }
 0x2b0   : > { %v1196_v41 = vpop.f32.mrf.mxu2  ;;  %v2165_v61 = vrot.slane %v2164_v31, 2 }
 0x2b1   : > { %v2554_v58 = vmax.f32 %v1900_v37, %v2553_v38  ;;  %v1197_v53 = vadd.f32 %v4295_v49, %v1196_v41  ;;  %v2552_v62 = vmax.f32 %v2550_v39, %v2551_v46  ;;  %v1838_v45 = vmax.f32 %v1583_v17, 0.0 }
 0x2b2   : > { %v1038_v42 = vpop.f32.mrf.mxu0  ;;  %v1740_v44 = vpop.f32.mrf.mxu3 }
 0x2b3   : > { %v2555_v48 = vrot.slane %v2554_v58, 2  ;;  %v1039_v47 = vadd.f32 %v4295_v49, %v1038_v42  ;;  %v1741_v50 = vadd.f32 %v4348_v4, %v1740_v44  ;;  %v1330_v20 = vmax.f32 %v1197_v53, 0.0 }
 0x2b4   : > { %v2170_v44 = vmax.f32 %v1836_v30, %v2169_v11  ;;  %v2181_v46 = vrot.slane %v1838_v45, 4 }
 0x2b5   : > { %v2556_v1 = vmax.f32 %v2554_v58, %v2555_v48  ;;  %v1267_v57 = vmax.f32 %v1039_v47, 0.0  ;;  %v1901_v59 = vmax.f32 %v1741_v50, 0.0 }
 0x2b6   : > { %v1585_v43 = vpop.f32.mrf.mxu1 }
 0x2b7   : > { %v2557_v63 = vrot.slane %v2556_v1, 1  ;;  %v1364_v0 = vpack.c.bf16 %v1267_v57, %v1266_v52  ;;  %v2559_v3 = vrot.slane %v1901_v59, 4  ;;  %v1586_v18 = vadd.f32 %v4348_v4, %v1585_v43 }
 0x2b8   : > { %v1198_v5 = vpop.f32.mrf.mxu2  ;;  %v2176_v57 = vmax.f32 %v1837_v23, %v2175_v34  ;;  %v2182_v43 = vmax.f32 %v1838_v45, %v2181_v46 }
 0x2b9   : > { %v2558_v6 = vmax.f32 %v2556_v1, %v2557_v63  ;;  %v2560_v7 = vmax.f32 %v1901_v59, %v2559_v3  ;;  %v1199_v8 = vadd.f32 %v4295_v49, %v1198_v5  ;;  %1624 = vmatmul.bf16.gmra.mxu1 %v1364_v0  ;;  %v1839_v28 = vmax.f32 %v1586_v18, 0.0 }
 0x2ba   : > { %v1041_v55 = vpop.f32.mrf.mxu0  ;;  %v1742_v12 = vpop.f32.mrf.mxu3  ;;  %v2171_v3 = vrot.slane %v2170_v44, 2 }
 0x2bb   : > { %v2917_v2 = vsel %vm2819_vm0, %v2558_v6, %v2552_v62  ;;  %v2561_v15 = vrot.slane %v2560_v7, 2  ;;  %v1331_v16 = vmax.f32 %v1199_v8, 0.0  ;;  %v1743_v19 = vadd.f32 %v4348_v4, %v1742_v12 }
 0x2bc   : > { %v1042_v33 = vadd.f32 %v4295_v49, %v1041_v55  ;;  %v2187_v48 = vrot.slane %v1839_v28, 4  ;;  %v2177_v55 = vrot.slane %v2176_v57, 2 }
 0x2bd   : > { %v2562_v21 = vmax.f32 %v2560_v7, %v2561_v15  ;;  %v1396_v22 = vpack.c.bf16 %v1331_v16, %v1330_v20  ;;  %v1902_v24 = vmax.f32 %v1743_v19, 0.0  ;;  %v2172_v19 = vmax.f32 %v2170_v44, %v2171_v3 }
 0x2be   : > { %v1587_v27 = vpop.f32.mrf.mxu1  ;;  %v1268_v50 = vmax.f32 %v1042_v33, 0.0  ;;  %v2188_v7 = vmax.f32 %v1839_v28, %v2187_v48 }
 0x2bf   : > { %v2563_v26 = vrot.slane %v2562_v21, 1  ;;  %1784 = vmatmul.bf16.gmra.mxu3 %v1396_v22  ;;  %v2565_v29 = vrot.slane %v1902_v24, 4  ;;  %v1588_v51 = vadd.f32 %v4348_v4, %v1587_v27  ;;  %v2178_v27 = vmax.f32 %v2176_v57, %v2177_v55 }
 0x2c0   : > { %v1201_v14 = vpop.f32.mrf.mxu2 }
 0x2c1   : > { %v2564_v35 = vmax.f32 %v2562_v21, %v2563_v26  ;;  %v2566_v37 = vmax.f32 %v1902_v24, %v2565_v29  ;;  %v1840_v39 = vmax.f32 %v1588_v51, 0.0  ;;  %v1202_v52 = vadd.f32 %v4295_v49, %v1201_v14 }
 0x2c2   : > { %v1043_v38 = vpop.f32.mrf.mxu0  ;;  %v1745_v40 = vpop.f32.mrf.mxu3  ;;  %v2183_v21 = vrot.slane %v2182_v43, 2  ;;  %v2189_v24 = vrot.slane %v2188_v7, 2 }
 0x2c3   : > { %v2918_v41 = vsel %vm2821_vm1, %v2564_v35, %v2917_v2  ;;  %v1044_v58 = vadd.f32 %v4295_v49, %v1043_v38  ;;  %v1746_v42 = vadd.f32 %v4348_v4, %v1745_v40  ;;  %v2567_v47 = vrot.slane %v2566_v37, 2 }
 0x2c4   : > { %v2193_v60 = vrot.slane %v1840_v39, 4  ;;  %v1332_v8 = vmax.f32 %v1202_v52, 0.0  ;;  %v2184_v35 = vmax.f32 %v2182_v43, %v2183_v21 }
 0x2c5   : > { %v1269_v1 = vmax.f32 %v1044_v58, 0.0  ;;  %v1903_v53 = vmax.f32 %v1746_v42, 0.0  ;;  %v2568_v59 = vmax.f32 %v2566_v37, %v2567_v47  ;;  %v2173_v37 = vrot.slane %v2172_v19, 1 }
 0x2c6   : > { %v1590_v0 = vpop.f32.mrf.mxu1  ;;  %v2194_v30 = vmax.f32 %v1840_v39, %v2193_v60  ;;  %v2190_v39 = vmax.f32 %v2188_v7, %v2189_v24  ;;  %v2179_v58 = vrot.slane %v2178_v27, 1  ;;  %v2185_v52 = vrot.slane %v2184_v35, 1 }
 0x2c7   : > { %v1365_v62 = vpack.c.bf16 %v1269_v1, %v1268_v50  ;;  %v2571_v63 = vrot.slane %v1903_v53, 4  ;;  %v2569_v5 = vrot.slane %v2568_v59, 1  ;;  %v1591_v6 = vadd.f32 %v4348_v4, %v1590_v0 }
 0x2c8   : > { %v1203_v20 = vpop.f32.mrf.mxu2  ;;  %v2195_v45 = vrot.slane %v2194_v30, 2  ;;  %v2191_v57 = vrot.slane %v2190_v39, 1 }
 0x2c9   : > { %v2572_v9 = vmax.f32 %v1903_v53, %v2571_v63  ;;  %v1204_v10 = vadd.f32 %v4295_v49, %v1203_v20  ;;  %v2570_v12 = vmax.f32 %v2568_v59, %v2569_v5  ;;  %v1841_v2 = vmax.f32 %v1591_v6, 0.0  ;;  %1629 = vmatmul.bf16.gmra.mxu1 %v1365_v62 }
 0x2ca   : > { %v1747_v15 = vpop.f32.mrf.mxu3  ;;  %v2166_v49 = vmax.f32 %v2164_v31, %v2165_v61  ;;  %v2196_v42 = vmax.f32 %v2194_v30, %v2195_v45  ;;  %v2174_v53 = vmax.f32 %v2172_v19, %v2173_v37  ;;  %v2180_v61 = vmax.f32 %v2178_v27, %v2179_v58 }
 0x2cb   : > { %v2573_v16 = vrot.slane %v2572_v9, 2  ;;  %v1333_v17 = vmax.f32 %v1204_v10, 0.0  ;;  %v1748_v18 = vadd.f32 %v4348_v4, %v1747_v15  ;;  %v2199_v22 = vrot.slane %v1841_v2, 4 }
 0x2cc   : > { %v2919_v23 = vsel %vm2823_vm2, %v2570_v12, %v2918_v41  ;;  %v2167_v41 = vrot.slane %v2166_v49, 1  ;;  %v2197_v62 = vrot.slane %v2196_v42, 1  ;;  %v2186_v20 = vmax.f32 %v2184_v35, %v2185_v52 }
 0x2cd   : > { %v2574_v25 = vmax.f32 %v2572_v9, %v2573_v16  ;;  %v1397_v11 = vpack.c.bf16 %v1333_v17, %v1332_v8  ;;  %v1904_v26 = vmax.f32 %v1748_v18, 0.0  ;;  %v2200_v28 = vmax.f32 %v1841_v2, %v2199_v22 }
 0x2ce   : > { %v1592_v14 = vpop.f32.mrf.mxu1  ;;  %v2168_v0 = vmax.f32 %v2166_v49, %v2167_v41  ;;  %v2192_v9 = vmax.f32 %v2190_v39, %v2191_v57  ;;  %v2198_v30 = vmax.f32 %v2196_v42, %v2197_v62 }
 0x2cf   : > { %v2575_v29 = vrot.slane %v2574_v25, 1  ;;  %v2577_v51 = vrot.slane %v1904_v26, 4  ;;  %1789 = vmatmul.bf16.gmra.mxu3 %v1397_v11  ;;  %v2201_v33 = vrot.slane %v2200_v28, 2  ;;  %v1593_v34 = vadd.f32 %v4348_v4, %v1592_v14 }
 0x2d0   : > { %v2861_v8 = vsel %vm2819_vm0, %v2174_v53, %v2168_v0 }
 0x2d1   : > { %v2576_v38 = vmax.f32 %v2574_v25, %v2575_v29  ;;  %v2578_v40 = vmax.f32 %v1904_v26, %v2577_v51  ;;  %v1842_v44 = vmax.f32 %v1593_v34, 0.0  ;;  %v2202_v46 = vmax.f32 %v2200_v28, %v2201_v33 }
 0x2d2   : > { %v1750_v31 = vpop.f32.mrf.mxu3  ;;  %v2862_v12 = vsel %vm2821_vm1, %v2180_v61, %v2861_v8 }
 0x2d3   : > { %v2579_v48 = vrot.slane %v2578_v40, 2  ;;  %v1751_v47 = vadd.f32 %v4348_v4, %v1750_v31  ;;  %v2920_v50 = vsel %vm2825_vm3, %v2576_v38, %v2919_v23  ;;  %v2205_v1 = vrot.slane %v1842_v44, 4 }
 0x2d4   : > { %v2203_v3 = vrot.slane %v2202_v46, 1  ;;  %v2863_v22 = vsel %vm2823_vm2, %v2186_v20, %v2862_v12 }
 0x2d5   : > { %v2580_v59 = vmax.f32 %v2578_v40, %v2579_v48  ;;  %v1905_v60 = vmax.f32 %v1751_v47, 0.0  ;;  %v2206_v63 = vmax.f32 %v1842_v44, %v2205_v1  ;;  %v2864_v25 = vsel %vm2825_vm3, %v2192_v9, %v2863_v22 }
 0x2d6   : > { %v4410_v6 = vpop.f32.mrf.mxu1  ;;  %v2204_v16 = vmax.f32 %v2202_v46, %v2203_v3  ;;  %v2865_v26 = vsel %vm2827_vm4, %v2198_v30, %v2864_v25 }
 0x2d7   : > { %v2581_v43 = vrot.slane %v2580_v59, 1  ;;  %v2583_v5 = vrot.slane %v1905_v60, 4  ;;  %v2207_v7 = vrot.slane %v2206_v63, 2 }
 0x2d8   : > { %v2866_v28 = vsel %vm2829_vm5, %v2204_v16, %v2865_v26 }
 0x2d9   : > { %v2582_v10 = vmax.f32 %v2580_v59, %v2581_v43  ;;  %v2584_v55 = vmax.f32 %v1905_v60, %v2583_v5  ;;  %v2208_v2 = vmax.f32 %v2206_v63, %v2207_v7 }
 0x2da   : > { %v1752_v15 = vpop.f32.mrf.mxu3 }
 0x2db   : > { %v2585_v17 = vrot.slane %v2584_v55, 2  ;;  %v1753_v18 = vadd.f32 %v4348_v4, %v1752_v15  ;;  %v2921_v19 = vsel %vm2827_vm4, %v2582_v10, %v2920_v50  ;;  %v2209_v21 = vrot.slane %v2208_v2, 1 }
 0x2dc   : > { %v1596_v15 = vadd.f32 %v4348_v4, %v4410_v6 }
 0x2dd   : > { %v2586_v23 = vmax.f32 %v2584_v55, %v2585_v17  ;;  %v1906_v24 = vmax.f32 %v1753_v18, 0.0  ;;  %v2210_v11 = vmax.f32 %v2208_v2, %v2209_v21 }
 0x2de   : > { %v1597_v45 = vpop.f32.mrf.mxu1 }
 0x2df   : > { %v2587_v49 = vrot.slane %v2586_v23, 1  ;;  %v2589_v27 = vrot.slane %v1906_v24, 4  ;;  %v2867_v29 = vsel %vm2831_vm6, %v2210_v11, %v2866_v28  ;;  %v1598_v9 = vadd.f32 %v4348_v4, %v1597_v45 }
 0x2e0   : > { %2959 = vxpose.xlu0.b32.cont [6/16] %v2867_v29, 128  ;;  %v1843_v11 = vmax.f32 %v1596_v15, 0.0 }
 0x2e1   : > { %v2588_v51 = vmax.f32 %v2586_v23, %v2587_v49  ;;  %v2590_v14 = vmax.f32 %v1906_v24, %v2589_v27  ;;  %v1844_v21 = vmax.f32 %v1598_v9, 0.0 }
 0x2e2   : > { %v1755_v35 = vpop.f32.mrf.mxu3 }
 0x2e3   : > { %v2591_v33 = vrot.slane %v2590_v14, 2  ;;  %v1756_v34 = vadd.f32 %v4348_v4, %v1755_v35  ;;  %v2922_v37 = vsel %vm2829_vm5, %v2588_v51, %v2921_v19  ;;  %v2217_v29 = vrot.slane %v1844_v21, 4 }
 0x2e5   : > { %v2592_v39 = vmax.f32 %v2590_v14, %v2591_v33  ;;  %v1907_v38 = vmax.f32 %v1756_v34, 0.0 }
 0x2e6   : > { %v1600_v41 = vpop.f32.mrf.mxu1 }
 0x2e7   : > { %v2595_v40 = vrot.slane %v1907_v38, 4  ;;  %v2593_v58 = vrot.slane %v2592_v39, 1  ;;  %v1601_v55 = vadd.f32 %v4348_v4, %v1600_v41 }
 0x2e9   : > { %v2596_v42 = vmax.f32 %v1907_v38, %v2595_v40  ;;  %v2594_v44 = vmax.f32 %v2592_v39, %v2593_v58  ;;  %v1845_v22 = vmax.f32 %v1601_v55, 0.0  ;;  %v2218_v58 = vmax.f32 %v1844_v21, %v2217_v29 }
 0x2ea   : > { %v1757_v31 = vpop.f32.mrf.mxu3 }
 0x2eb   : > { %v2597_v46 = vrot.slane %v2596_v42, 2  ;;  %v1758_v48 = vadd.f32 %v4348_v4, %v1757_v31  ;;  %v4425_v47 = vsel %vm2831_vm6, %v2594_v44, %v2922_v37  ;;  %v2223_v14 = vrot.slane %v1845_v22, 4 }
 0x2ec   : > { %v2211_v37 = vrot.slane %v1843_v11, 4 }
 0x2ed   : > { %v1908_v50 = vmax.f32 %v1758_v48, 0.0  ;;  %v2598_v52 = vmax.f32 %v2596_v42, %v2597_v46  ;;  %v2224_v44 = vmax.f32 %v1845_v22, %v2223_v14 }
 0x2ee   : > { %v1602_v53 = vpop.f32.mrf.mxu1 }
 0x2ef   : > { %v2601_v1 = vrot.slane %v1908_v50, 4  ;;  %v2599_v60 = vrot.slane %v2598_v52, 1  ;;  %v1603_v16 = vadd.f32 %v4348_v4, %v1602_v53 }
 0x2f1   : > { %v2602_v57 = vmax.f32 %v1908_v50, %v2601_v1  ;;  %v2600_v3 = vmax.f32 %v2598_v52, %v2599_v60  ;;  %v1846_v26 = vmax.f32 %v1603_v16, 0.0  ;;  %v2212_v50 = vmax.f32 %v1843_v11, %v2211_v37 }
 0x2f2   : > { %v1760_v59 = vpop.f32.mrf.mxu3  ;;  %v2219_v60 = vrot.slane %v2218_v58, 2 }
 0x2f3   : > { %v2603_v61 = vrot.slane %v2602_v57, 2  ;;  %v1761_v62 = vadd.f32 %v4348_v4, %v1760_v59  ;;  %v2229_v39 = vrot.slane %v1846_v26, 4 }
 0x2f5   : > { %v2604_v63 = vmax.f32 %v2602_v57, %v2603_v61  ;;  %v1909_v0 = vmax.f32 %v1761_v62, 0.0  ;;  %v2230_v52 = vmax.f32 %v1846_v26, %v2229_v39 }
 0x2f6   : > { %v1605_v20 = vpop.f32.mrf.mxu1 }
 0x2f7   : > { %v2605_v43 = vrot.slane %v2604_v63, 1  ;;  %v2607_v5 = vrot.slane %v1909_v0, 4  ;;  %v1606_v18 = vadd.f32 %v4348_v4, %v1605_v20  ;;  %v2213_v20 = vrot.slane %v2212_v50, 2 }
 0x2f9   : > { %v2606_v7 = vmax.f32 %v2604_v63, %v2605_v43  ;;  %v2608_v8 = vmax.f32 %v1909_v0, %v2607_v5  ;;  %v1847_v45 = vmax.f32 %v1606_v18, 0.0  ;;  %v2225_v0 = vrot.slane %v2224_v44, 2 }
 0x2fa   : > { %v1762_v10 = vpop.f32.mrf.mxu3 }
 0x2fb   : > { %v2924_v12 = vsel %vm2819_vm0, %v2606_v7, %v2600_v3  ;;  %v2609_v30 = vrot.slane %v2608_v8, 2  ;;  %v1763_v2 = vadd.f32 %v4348_v4, %v1762_v10  ;;  %v2235_v38 = vrot.slane %v1847_v45, 4 }
 0x2fc   : > { %v2231_v7 = vrot.slane %v2230_v52, 2  ;;  %v2226_v15 = vmax.f32 %v2224_v44, %v2225_v0 }
 0x2fd   : > { %v2610_v17 = vmax.f32 %v2608_v8, %v2609_v30  ;;  %v1910_v19 = vmax.f32 %v1763_v2, 0.0  ;;  %v2236_v53 = vmax.f32 %v1847_v45, %v2235_v38 }
 0x2fe   : > { %v1607_v25 = vpop.f32.mrf.mxu1  ;;  %v2232_v21 = vmax.f32 %v2230_v52, %v2231_v7  ;;  %v2227_v45 = vrot.slane %v2226_v15, 1 }
 0x2ff   : > { %v2611_v23 = vrot.slane %v2610_v17, 1  ;;  %v2613_v24 = vrot.slane %v1910_v19, 4  ;;  %v1608_v49 = vadd.f32 %v4348_v4, %v1607_v25  ;;  %v2237_v9 = vrot.slane %v2236_v53, 2 }
 0x300   : > { %v2233_v14 = vrot.slane %v2232_v21, 1 }
 0x301   : > { %v2612_v27 = vmax.f32 %v2610_v17, %v2611_v23  ;;  %v2614_v28 = vmax.f32 %v1910_v19, %v2613_v24  ;;  %v1848_v6 = vmax.f32 %v1608_v49, 0.0  ;;  %v2214_v19 = vmax.f32 %v2212_v50, %v2213_v20 }
 0x302   : > { %v1765_v51 = vpop.f32.mrf.mxu3  ;;  %v2238_v24 = vmax.f32 %v2236_v53, %v2237_v9 }
 0x303   : > { %v2925_v35 = vsel %vm2821_vm1, %v2612_v27, %v2924_v12  ;;  %v2615_v33 = vrot.slane %v2614_v28, 2  ;;  %v1766_v34 = vadd.f32 %v4348_v4, %v1765_v51  ;;  %v2241_v42 = vrot.slane %v1848_v6, 4 }
 0x304   : > { %v2220_v12 = vmax.f32 %v2218_v58, %v2219_v60  ;;  %v2215_v51 = vrot.slane %v2214_v19, 1 }
 0x305   : > { %v2616_v40 = vmax.f32 %v2614_v28, %v2615_v33  ;;  %v1911_v41 = vmax.f32 %v1766_v34, 0.0  ;;  %v2242_v61 = vmax.f32 %v1848_v6, %v2241_v42  ;;  %v2239_v33 = vrot.slane %v2238_v24, 1 }
 0x306   : > { %v1610_v48 = vpop.f32.mrf.mxu1  ;;  %v2221_v26 = vrot.slane %v2220_v12, 1  ;;  %v2216_v44 = vmax.f32 %v2214_v19, %v2215_v51 }
 0x307   : > { %v2617_v31 = vrot.slane %v2616_v40, 1  ;;  %v2619_v46 = vrot.slane %v1911_v41, 4  ;;  %v1611_v1 = vadd.f32 %v4348_v4, %v1610_v48  ;;  %v2243_v30 = vrot.slane %v2242_v61, 2 }
 0x308   : > { %v2222_v37 = vmax.f32 %v2220_v12, %v2221_v26  ;;  %v2240_v48 = vmax.f32 %v2238_v24, %v2239_v33 }
 0x309   : > { %v2618_v57 = vmax.f32 %v2616_v40, %v2617_v31  ;;  %v2620_v59 = vmax.f32 %v1911_v41, %v2619_v46  ;;  %v1849_v62 = vmax.f32 %v1611_v1, 0.0  ;;  %v2244_v49 = vmax.f32 %v2242_v61, %v2243_v30 }
 0x30a   : > { %v1767_v63 = vpop.f32.mrf.mxu3  ;;  %v2228_v40 = vmax.f32 %v2226_v15, %v2227_v45  ;;  %v2234_v31 = vmax.f32 %v2232_v21, %v2233_v14  ;;  %v2868_v52 = vsel %vm2819_vm0, %v2222_v37, %v2216_v44 }
 0x30b   : > { %v2621_v3 = vrot.slane %v2620_v59, 2  ;;  %v1768_v43 = vadd.f32 %v4348_v4, %v1767_v63  ;;  %v2926_v5 = vsel %vm2823_vm2, %v2618_v57, %v2925_v35  ;;  %v2247_v8 = vrot.slane %v1849_v62, 4 }
 0x30c   : > { %v2245_v39 = vrot.slane %v2244_v49, 1  ;;  %v2869_v57 = vsel %vm2821_vm1, %v2228_v40, %v2868_v52 }
 0x30d   : > { %v2622_v10 = vmax.f32 %v2620_v59, %v2621_v3  ;;  %v1912_v55 = vmax.f32 %v1768_v43, 0.0  ;;  %v2248_v2 = vmax.f32 %v1849_v62, %v2247_v8  ;;  %v2870_v62 = vsel %vm2823_vm2, %v2234_v31, %v2869_v57 }
 0x30e   : > { %v1612_v18 = vpop.f32.mrf.mxu1  ;;  %v2246_v1 = vmax.f32 %v2244_v49, %v2245_v39  ;;  %v2871_v63 = vsel %vm2825_vm3, %v2240_v48, %v2870_v62 }
 0x30f   : > { %v2623_v16 = vrot.slane %v2622_v10, 1  ;;  %v2625_v17 = vrot.slane %v1912_v55, 4  ;;  %v2249_v22 = vrot.slane %v2248_v2, 2  ;;  %v1613_v23 = vadd.f32 %v4348_v4, %v1612_v18 }
 0x310   : > { %v2872_v3 = vsel %vm2827_vm4, %v2246_v1, %v2871_v63 }
 0x311   : > { %v2624_v25 = vmax.f32 %v2622_v10, %v2623_v16  ;;  %v2626_v11 = vmax.f32 %v1912_v55, %v2625_v17  ;;  %v1850_v27 = vmax.f32 %v1613_v23, 0.0  ;;  %v2250_v28 = vmax.f32 %v2248_v2, %v2249_v22 }
 0x312   : > { %v4454_v7 = vpop.f32.mrf.mxu3 }
 0x313   : > { %v2627_v29 = vrot.slane %v2626_v11, 2  ;;  %v2927_v6 = vsel %vm2825_vm3, %v2624_v25, %v2926_v5  ;;  %v2253_v35 = vrot.slane %v1850_v27, 4  ;;  %v2251_v41 = vrot.slane %v2250_v28, 1 }
 0x315   : > { %v2628_v34 = vmax.f32 %v2626_v11, %v2627_v29  ;;  %v2254_v38 = vmax.f32 %v1850_v27, %v2253_v35  ;;  %v2252_v59 = vmax.f32 %v2250_v28, %v2251_v41 }
 0x316   : > { %v1615_v42 = vpop.f32.mrf.mxu1 }
 0x317   : > { %v2629_v58 = vrot.slane %v2628_v34, 1  ;;  %v2255_v46 = vrot.slane %v2254_v38, 2  ;;  %v2873_v5 = vsel %vm2829_vm5, %v2252_v59, %v2872_v3  ;;  %v1616_v15 = vadd.f32 %v4348_v4, %v1615_v42 }
 0x319   : > { %v2630_v50 = vmax.f32 %v2628_v34, %v2629_v58  ;;  %v2256_v53 = vmax.f32 %v2254_v38, %v2255_v46  ;;  %v1851_v22 = vmax.f32 %v1616_v15, 0.0 }
 0x31a   : > { %v4456_v9 = vpop.f32.mrf.mxu3 }
 0x31b   : > { %v4447_v60 = vsel %vm2827_vm4, %v2630_v50, %v2927_v6  ;;  %v2257_v61 = vrot.slane %v2256_v53, 1  ;;  %v2259_v45 = vrot.slane %v1851_v22, 4 }
 0x31d   : > { %v2258_v0 = vmax.f32 %v2256_v53, %v2257_v61  ;;  %v2260_v33 = vmax.f32 %v1851_v22, %v2259_v45 }
 0x31e   : > { %v1617_v43 = vpop.f32.mrf.mxu1 }
 0x31f   : > { %v2874_v20 = vsel %vm2831_vm6, %v2258_v0, %v2873_v5  ;;  %v1618_v30 = vadd.f32 %v4348_v4, %v1617_v43  ;;  %v2261_v44 = vrot.slane %v2260_v33, 2 }
 0x320   : > { %2960 = vxpose.xlu0.b32.cont [7/16] %v2874_v20, 128 }
 0x321   : > { %v1852_v18 = vmax.f32 %v1618_v30, 0.0  ;;  %v2262_v59 = vmax.f32 %v2260_v33, %v2261_v44 }
 0x322   : > { %v4458_v55 = vpop.f32.mrf.mxu3 }
 0x323   : > { %v2265_v26 = vrot.slane %v1852_v18, 4 }
 0x325   : > { %v2266_v6 = vmax.f32 %v1852_v18, %v2265_v26 }
 0x326   : > { %v1620_v8 = vpop.f32.mrf.mxu1 }
 0x327   : > { %v1621_v2 = vadd.f32 %v4348_v4, %v1620_v8  ;;  %v2267_v38 = vrot.slane %v2266_v6, 2 }
 0x329   : > { %v1853_v19 = vmax.f32 %v1621_v2, 0.0  ;;  %v2268_v50 = vmax.f32 %v2266_v6, %v2267_v38 }
 0x32a   : > { %v4466_v25 = vpop.f32.mrf.mxu3 }
 0x32b   : > { %v2271_v27 = vrot.slane %v1853_v19, 4  ;;  %v2269_v3 = vrot.slane %v2268_v50, 1 }
 0x32d   : > { %v2272_v14 = vmax.f32 %v1853_v19, %v2271_v27 }
 0x32e   : > { %v1622_v10 = vpop.f32.mrf.mxu1 }
 0x32f   : > { %v1623_v16 = vadd.f32 %v4348_v4, %v1622_v10  ;;  %v2273_v58 = vrot.slane %v2272_v14, 2  ;;  %v2263_v10 = vrot.slane %v2262_v59, 1 }
 0x331   : > { %v1854_v23 = vmax.f32 %v1623_v16, 0.0  ;;  %v2274_v53 = vmax.f32 %v2272_v14, %v2273_v58  ;;  %v2270_v16 = vmax.f32 %v2268_v50, %v2269_v3  ;;  %v2264_v22 = vmax.f32 %v2262_v59, %v2263_v10 }
 0x332   : > { %v1780_v42 = vpop.f32.mrf.mxu3 }
 0x333   : > { %v2277_v28 = vrot.slane %v1854_v23, 4  ;;  %v2275_v20 = vrot.slane %v2274_v53, 1  ;;  %v2875_v26 = vsel %vm2819_vm0, %v2270_v16, %v2264_v22 }
 0x335   : > { %v2278_v34 = vmax.f32 %v1854_v23, %v2277_v28  ;;  %v2276_v19 = vmax.f32 %v2274_v53, %v2275_v20 }
 0x336   : > { %v1625_v12 = vpop.f32.mrf.mxu1 }
 0x337   : > { %v1626_v17 = vadd.f32 %v4348_v4, %v1625_v12  ;;  %v2279_v31 = vrot.slane %v2278_v34, 2  ;;  %v2876_v45 = vsel %vm2821_vm1, %v2276_v19, %v2875_v26 }
 0x339   : > { %v1855_v11 = vmax.f32 %v1626_v17, 0.0  ;;  %v2280_v61 = vmax.f32 %v2278_v34, %v2279_v31 }
 0x33a   : > { %v1782_v15 = vpop.f32.mrf.mxu3 }
 0x33b   : > { %v2283_v29 = vrot.slane %v1855_v11, 4  ;;  %v2281_v12 = vrot.slane %v2280_v61, 1 }
 0x33d   : > { %v2284_v39 = vmax.f32 %v1855_v11, %v2283_v29  ;;  %v2282_v23 = vmax.f32 %v2280_v61, %v2281_v12 }
 0x33e   : > { %v1627_v21 = vpop.f32.mrf.mxu1 }
 0x33f   : > { %v1628_v24 = vadd.f32 %v4348_v4, %v1627_v21  ;;  %v2285_v48 = vrot.slane %v2284_v39, 2  ;;  %v2877_v6 = vsel %vm2823_vm2, %v2282_v23, %v2876_v45 }
 0x341   : > { %v1856_v49 = vmax.f32 %v1628_v24, 0.0  ;;  %v2286_v0 = vmax.f32 %v2284_v39, %v2285_v48 }
 0x342   : > { %v1785_v33 = vpop.f32.mrf.mxu3 }
 0x343   : > { %v2289_v51 = vrot.slane %v1856_v49, 4  ;;  %v2287_v2 = vrot.slane %v2286_v0, 1 }
 0x345   : > { %v2290_v40 = vmax.f32 %v1856_v49, %v2289_v51  ;;  %v2288_v11 = vmax.f32 %v2286_v0, %v2287_v2 }
 0x346   : > { %v1630_v35 = vpop.f32.mrf.mxu1 }
 0x347   : > { %v1631_v37 = vadd.f32 %v4348_v4, %v1630_v35  ;;  %v2291_v52 = vrot.slane %v2290_v40, 2  ;;  %v4472_v4 = vld [vmem:[%s4574_s4] ss:$0 sm:$0xff]  ;;  %v2878_v51 = vsel %vm2825_vm3, %v2288_v11, %v2877_v6 }
 0x348   : > { %v1776_v38 = vadd.f32 %v4472_v4, %v4458_v55  ;;  %v1781_v58 = vadd.f32 %v4472_v4, %v1780_v42  ;;  %v1773_v48 = vadd.f32 %v4472_v4, %v4456_v9 }
 0x349   : > { %v1857_v41 = vmax.f32 %v1631_v37, 0.0  ;;  %v2292_v43 = vmax.f32 %v2290_v40, %v2291_v52  ;;  %v1778_v40 = vadd.f32 %v4472_v4, %v4466_v25  ;;  %v1786_v25 = vadd.f32 %v4472_v4, %v1785_v33 }
 0x34a   : > { %v1787_v39 = vpop.f32.mrf.mxu3  ;;  %v1915_v44 = vmax.f32 %v1776_v38, 0.0 }
 0x34b   : > { %v2295_v46 = vrot.slane %v1857_v41, 4  ;;  %v2293_v17 = vrot.slane %v2292_v43, 1  ;;  %v1916_v31 = vmax.f32 %v1778_v40, 0.0  ;;  %v1919_v9 = vmax.f32 %v1786_v25, 0.0 }
 0x34c   : > { %v2643_v55 = vrot.slane %v1915_v44, 4 }
 0x34d   : > { %v2296_v1 = vmax.f32 %v1857_v41, %v2295_v46  ;;  %v2294_v49 = vmax.f32 %v2292_v43, %v2293_v17  ;;  %v1771_v46 = vadd.f32 %v4472_v4, %v4454_v7  ;;  %v2649_v50 = vrot.slane %v1916_v31, 4 }
 0x34e   : > { %v1632_v57 = vpop.f32.mrf.mxu1  ;;  %v2644_v59 = vmax.f32 %v1915_v44, %v2643_v55  ;;  %v1788_v7 = vadd.f32 %v4472_v4, %v1787_v39  ;;  %v2667_v12 = vrot.slane %v1919_v9, 4 }
 0x34f   : > { %v2297_v62 = vrot.slane %v2296_v1, 2  ;;  %v1633_v63 = vadd.f32 %v4472_v4, %v1632_v57  ;;  %v2879_v35 = vsel %vm2827_vm4, %v2294_v49, %v2878_v51  ;;  %v1913_v52 = vmax.f32 %v1771_v46, 0.0 }
 0x350   : > { %v2650_v61 = vmax.f32 %v1916_v31, %v2649_v50  ;;  %v2668_v23 = vmax.f32 %v1919_v9, %v2667_v12 }
 0x351   : > { %v1858_v5 = vmax.f32 %v1633_v63, 0.0  ;;  %v2298_v8 = vmax.f32 %v2296_v1, %v2297_v62  ;;  %v1914_v1 = vmax.f32 %v1773_v48, 0.0  ;;  %v2631_v62 = vrot.slane %v1913_v52, 4 }
 0x352   : > { %v1790_v41 = vpop.f32.mrf.mxu3  ;;  %v2651_v20 = vrot.slane %v2650_v61, 2 }
 0x353   : > { %v2301_v30 = vrot.slane %v1858_v5, 4  ;;  %v2299_v21 = vrot.slane %v2298_v8, 1  ;;  %v1791_v63 = vadd.f32 %v4472_v4, %v1790_v41  ;;  %v2637_v0 = vrot.slane %v1914_v1, 4 }
 0x354   : > { %v2632_v10 = vmax.f32 %v1913_v52, %v2631_v62  ;;  %v2652_v19 = vmax.f32 %v2650_v61, %v2651_v20 }
 0x355   : > { %v2302_v18 = vmax.f32 %v1858_v5, %v2301_v30  ;;  %v2300_v28 = vmax.f32 %v2298_v8, %v2299_v21  ;;  %v2645_v5 = vrot.slane %v2644_v59, 2  ;;  %v1920_v8 = vmax.f32 %v1788_v7, 0.0 }
 0x356   : > { %v1921_v30 = vmax.f32 %v1791_v63, 0.0  ;;  %v2638_v2 = vmax.f32 %v1914_v1, %v2637_v0  ;;  %v2633_v22 = vrot.slane %v2632_v10, 2 }
 0x357   : > { %v2303_v24 = vrot.slane %v2302_v18, 2  ;;  %v2880_v34 = vsel %vm2829_vm5, %v2300_v28, %v2879_v35  ;;  %v2673_v21 = vrot.slane %v1920_v8, 4 }
 0x358   : > { %v2634_v28 = vmax.f32 %v2632_v10, %v2633_v22 }
 0x359   : > { %v2304_v27 = vmax.f32 %v2302_v18, %v2303_v24  ;;  %v2646_v18 = vmax.f32 %v2644_v59, %v2645_v5  ;;  %v2679_v24 = vrot.slane %v1921_v30, 4  ;;  %v2674_v45 = vmax.f32 %v1920_v8, %v2673_v21 }
 0x35a   : > { %v1792_v57 = vpop.f32.mrf.mxu3  ;;  %v2635_v38 = vrot.slane %v2634_v28, 1 }
 0x35b   : > { %v2305_v29 = vrot.slane %v2304_v27, 1  ;;  %v2647_v49 = vrot.slane %v2646_v18, 1  ;;  %v2680_v6 = vmax.f32 %v1921_v30, %v2679_v24  ;;  %v2675_v39 = vrot.slane %v2674_v45, 2 }
 0x35d   : > { %v2306_v14 = vmax.f32 %v2304_v27, %v2305_v29  ;;  %v2653_v27 = vrot.slane %v2652_v19, 1  ;;  %v2669_v29 = vrot.slane %v2668_v23, 2  ;;  %v2681_v41 = vrot.slane %v2680_v6, 2 }
 0x35e   : > { %v2676_v48 = vmax.f32 %v2674_v45, %v2675_v39 }
 0x35f   : > { %v2881_v37 = vsel %vm2831_vm6, %v2306_v14, %v2880_v34  ;;  %v2648_v34 = vmax.f32 %v2646_v18, %v2647_v49  ;;  %v2670_v40 = vmax.f32 %v2668_v23, %v2669_v29  ;;  %v2682_v55 = vmax.f32 %v2680_v6, %v2681_v41 }
 0x360   : > { %2961 = vxpose.xlu0.b32.cont [8/16] %v2881_v37, 128  ;;  %v2654_v37 = vmax.f32 %v2652_v19, %v2653_v27 }
 0x362   : > { %v2931_v46 = vsel %vm2819_vm0, %v2654_v37, %v2648_v34 }
 0x368   : > { %2962 = vxpose.xlu0.b32.cont [9/16] %v4136_v54, 128  ;;  %v1783_v54 = vadd.f32 %v4472_v4, %v1782_v15 }
 0x36a   : > { %v1918_v42 = vmax.f32 %v1783_v54, 0.0  ;;  %v2636_v54 = vmax.f32 %v2634_v28, %v2635_v38 }
 0x36c   : > { %v2661_v3 = vrot.slane %v1918_v42, 4  ;;  %v2929_v59 = vsel %vm2829_vm5, %v2636_v54, %v4447_v60 }
 0x36e   : > { %v2662_v15 = vmax.f32 %v1918_v42, %v2661_v3  ;;  %v2677_v42 = vrot.slane %v2676_v48, 1 }
 0x370   : > { %2963 = vxpose.xlu0.b32.cont [10/16] %v4203_v32, 128  ;;  %v1917_v32 = vmax.f32 %v1781_v58, 0.0  ;;  %v2663_v11 = vrot.slane %v2662_v15, 2  ;;  %v2678_v62 = vmax.f32 %v2676_v48, %v2677_v42 }
 0x372   : > { %v2655_v53 = vrot.slane %v1917_v32, 4  ;;  %v2664_v14 = vmax.f32 %v2662_v15, %v2663_v11 }
 0x374   : > { %v2656_v43 = vmax.f32 %v1917_v32, %v2655_v53  ;;  %v2665_v58 = vrot.slane %v2664_v14, 1  ;;  %v2671_v32 = vrot.slane %v2670_v40, 1 }
 0x376   : > { %v2657_v17 = vrot.slane %v2656_v43, 2  ;;  %v2666_v50 = vmax.f32 %v2664_v14, %v2665_v58  ;;  %v2672_v53 = vmax.f32 %v2670_v40, %v2671_v32 }
 0x378   : > { %2964 = vxpose.xlu0.b32.cont [11/16] %v4268_v13, 128  ;;  %v1793_v13 = vadd.f32 %v4472_v4, %v1792_v57  ;;  %v2639_v4 = vrot.slane %v2638_v2, 2  ;;  %v2683_v57 = vrot.slane %v2682_v55, 1 }
 0x37a   : > { %v1922_v16 = vmax.f32 %v1793_v13, 0.0  ;;  %v2640_v51 = vmax.f32 %v2638_v2, %v2639_v4  ;;  %v2684_v9 = vmax.f32 %v2682_v55, %v2683_v57 }
 0x37c   : > { %v2685_v26 = vrot.slane %v1922_v16, 4  ;;  %v2641_v31 = vrot.slane %v2640_v51, 1 }
 0x37e   : > { %v2686_v35 = vmax.f32 %v1922_v16, %v2685_v26  ;;  %v2642_v25 = vmax.f32 %v2640_v51, %v2641_v31 }
 0x380   : > { %2965 = vxpose.xlu0.b32.cont [12/16] %v4326_v56, 128  ;;  %v2658_v56 = vmax.f32 %v2656_v43, %v2657_v17  ;;  %v2687_v44 = vrot.slane %v2686_v35, 2 }
 0x382   : > { %v2659_v33 = vrot.slane %v2658_v56, 1  ;;  %v2688_v52 = vmax.f32 %v2686_v35, %v2687_v44 }
 0x384   : > { %v2689_v61 = vrot.slane %v2688_v52, 1 }
 0x386   : > { %v2690_v0 = vmax.f32 %v2688_v52, %v2689_v61 }
 0x388   : > { %2966 = vxpose.xlu0.b32.cont [13/16] %v4382_v36, 128  ;;  %v2660_v36 = vmax.f32 %v2658_v56, %v2659_v33 }
 0x38a   : > { %v2932_v1 = vsel %vm2821_vm1, %v2660_v36, %v2931_v46 }
 0x38b   : > { %v2933_v7 = vsel %vm2823_vm2, %v2666_v50, %v2932_v1 }
 0x38c   : > { %v2934_v63 = vsel %vm2825_vm3, %v2672_v53, %v2933_v7 }
 0x38d   : > { %v2935_v3 = vsel %vm2827_vm4, %v2678_v62, %v2934_v63 }
 0x38e   : > { %v2936_v13 = vsel %vm2829_vm5, %v2684_v9, %v2935_v3 }
 0x38f   : > { %v2937_v43 = vsel %vm2831_vm6, %v2690_v0, %v2936_v13 }
 0x390   : > { %2967 = vxpose.xlu0.b32.cont [14/16] %v4425_v47, 128  ;;  %v2930_v47 = vsel %vm2831_vm6, %v2642_v25, %v2929_v59 }
 0x398   : > { %2968 = vxpose.xlu0.b32.cont [15/16] %v2930_v47, 128 }
 0x3a0   : > { %2969 = vxpose.xlu0.b32.end [16/16] %v2937_v43, 128 }
 0x3cc   : > { %v2970_v60 = vpop.trf.xlu0 }
 0x3cd   : > { %2986 = vst [vmem:[%s4513_s24] sm:$0xff] %v2970_v60 }
 0x3d4   : > { %v2971_v5 = vpop.trf.xlu0 }
 0x3d5   : > { %2987 = vst [vmem:[%s4513_s24 + $0x8] sm:$0xff] %v2971_v5 }
 0x3dc   : > { %v2972_v20 = vpop.trf.xlu0 }
 0x3dd   : > { %2988 = vst [vmem:[%s4513_s24 + $0x10] sm:$0xff] %v2972_v20 }
 0x3e4   : > { %v2973_v8 = vpop.trf.xlu0 }
 0x3e5   : > { %2989 = vst [vmem:[%s4513_s24 + $0x18] sm:$0xff] %v2973_v8 }
 0x3ec   : > { %v2974_v10 = vpop.trf.xlu0 }
 0x3ed   : > { %2990 = vst [vmem:[%s4513_s24 + $0x20] sm:$0xff] %v2974_v10 }
 0x3f4   : > { %v2975_v12 = vpop.trf.xlu0 }
 0x3f5   : > { %2991 = vst [vmem:[%s4513_s24 + $0x28] sm:$0xff] %v2975_v12 }
 0x3fc   : > { %v2976_v30 = vpop.trf.xlu0 }
 0x3fd   : > { %2992 = vst [vmem:[%s4513_s24 + $0x30] sm:$0xff] %v2976_v30 }
 0x404   : > { %v2977_v2 = vpop.trf.xlu0 }
 0x405   : > { %2993 = vst [vmem:[%s4513_s24 + $0x38] sm:$0xff] %v2977_v2 }
 0x40c   : > { %v2978_v15 = vpop.trf.xlu0 }
 0x40d   : > { %2994 = vst [vmem:[%s4513_s24 + $0x40] sm:$0xff] %v2978_v15 }
 0x414   : > { %v2979_v16 = vpop.trf.xlu0 }
 0x415   : > { %2995 = vst [vmem:[%s4513_s24 + $0x48] sm:$0xff] %v2979_v16 }
 0x41c   : > { %v2980_v17 = vpop.trf.xlu0 }
 0x41d   : > { %2996 = vst [vmem:[%s4513_s24 + $0x50] sm:$0xff] %v2980_v17 }
 0x424   : > { %v2981_v18 = vpop.trf.xlu0 }
 0x425   : > { %2997 = vst [vmem:[%s4513_s24 + $0x58] sm:$0xff] %v2981_v18 }
 0x42c   : > { %v2982_v19 = vpop.trf.xlu0 }
 0x42d   : > { %2998 = vst [vmem:[%s4513_s24 + $0x60] sm:$0xff] %v2982_v19 }
 0x434   : > { %v2983_v21 = vpop.trf.xlu0 }
 0x435   : > { %2999 = vst [vmem:[%s4513_s24 + $0x68] sm:$0xff] %v2983_v21 }
 0x43c   : > { %v2984_v22 = vpop.trf.xlu0 }
 0x43d   : > { %3000 = vst [vmem:[%s4513_s24 + $0x70] sm:$0xff] %v2984_v22 }
 0x444   : > { %v2985_v23 = vpop.trf.xlu0 }
 0x445   : > { %3001 = vst [vmem:[%s4513_s24 + $0x78] sm:$0xff] %v2985_v23 }
 0x446   : > { %3772 = shalt.err (!%p3769_p0)
}
 0x447   : > { %s3837_s25 = smov 128   ;;  %s3838_s30 = smov 8  }
 0x448   : > { %3571 = dma.vmem_to_hbm [thread:$0]  (%p3951_p2), %s3017_s7, 2048, %s3019_s13, %s3003_s14, %s3837_s25, %s3837_s25, %s3838_s30  }
 0x449 PF: > { %s3033_s8 = sand.u32 1, %s3811_s18   ;;  %p3585_p4 = pnand %p3129_p10, %p3916_p5 }
 0x44a   : > { %s3034_s24 = scalar_lea.sflag [#allocation4], %s3033_s8 }
 0x44b   : > { %p3586_p6 = pneg %p3585_p4 }
 0x44d   : > { %3806 = dma.done.wait (%p3586_p6), %s3034_s24, 2048  }
 0x44e   : > { %3808 = vsyncadd (%p3586_p6), %s3034_s24, 4294965248  ;;  %s22_s23 = sadd.s32 1, %s3831_s23   ;;  %s4589_s18 = smov %s3815_s19 }
 0x44f   : > { %p19_p8 = scmp.ge.s32.totalorder %s22_s23, 4   ;;  %s4590_s19 = smov %s3819_s20 }
 0x450   : > { %s4591_s20 = smov %s3961_s9  ;;  %s4592_s21 = smov %s3827_s22 }
 0x451   : > { %s4593_s22 = smov %s4595_s17  ;;  %21 = sbr.rel (!%p19_p8) target bundleno = 10 (0xa), region = 93 }
 0x456   :  { %3040 = vsyncpa [#allocation3], 1 }
 0x457   :  { %3042 = vsyncpa [#allocation3 + $0x1], 1 }
 0x458   :  { %3043 = vsyncpa [#allocation6], 1 }
 0x459   :  { %3044 = vsyncpa [#allocation4], 1 }
 0x45a   :  { %3046 = vsyncpa [#allocation4 + $0x1], 1 }

</bundles_post_ra>
